<compile_context>
chip_gen: v6e
topology: v6e:2x2x1
jax: 0.10.0
libtpu: 0.0.40
codegen_flags: <defaults>
</compile_context>

<pallas_src>
import functools

import jax
import jax.numpy as jnp
from jax import lax
from jax.experimental import pallas as pl
from jax.experimental.pallas import tpu as pltpu

# ----------------------------- configuration --------------------------------
CHANNELS = 4          # `channels`        (must be even; split in half)
HIDDEN = 32           # `hidden_channels`
KERNEL_SIZE = 5       # `kernel_size`
DILATION_RATE = 1     # `dilation_rate`
N_LAYERS = 4          # `n_layers`
N_FLOWS = 4           # `n_flows`
GIN_CHANNELS = 0      # gin_channels=0  ->  g=None (no conditioning path)
HALF = CHANNELS // 2

BATCH = 2
TIME = 64             # B*T = 128 -> lane-dense single block


# --------------------------- fused Pallas kernel -----------------------------
def flow_step_kernel(
    x_lo_ref, x_hi_ref, mask_ref, seam_ref,
    w_pre_ref, b_pre_ref, w_in_ref, b_in_ref,
    w_rs_ref, b_rs_ref, w_post_ref, b_post_ref,
    lo_ref, hi_ref,
    *, hidden, n_layers, kernel_size, tap_plan,
):
  """One ResidualCouplingLayer (+ folded Flip).  Grid axis 0 = flow index."""
  f = pl.program_id(0)
  L = lo_ref.shape[-1]

  # Flow 0: seed the resident carry (lo/hi output blocks) from the input.
  @pl.when(f == 0)
  def _init():
    lo_ref[...] = x_lo_ref[...]
    hi_ref[...] = x_hi_ref[...]

  mask = mask_ref[...]                              # (1, L) f32
  x_low = lo_ref[...].astype(jnp.float32)           # (half, L)
  x_high = hi_ref[...].astype(jnp.float32)          # (half, L)

  # Even flows couple on the low half (x0 = lo, update hi); odd flows couple
  # on the high half (x0 = hi, update lo).  The Flip()'s channel reversal is
  # baked into the per-flow weight packing, so no row shuffles happen here.
  odd = (f % 2).astype(jnp.float32)                 # scalar 0.0 / 1.0
  is_even = (f % 2) == 0
  is_odd = (f % 2) == 1
  x0 = x_low * (1.0 - odd) + x_high * odd           # exact 0/1 select

  # ---- pre 1x1 conv (MXU) ----
  h = jnp.dot(w_pre_ref[0], x0.astype(jnp.bfloat16),
              preferred_element_type=jnp.float32)
  h = (h + b_pre_ref[0]) * mask                     # (H, L) f32

  # ---- WaveNet stack: per-tap matmul accumulation (no im2col concat) ----
  output = jnp.zeros((hidden, L), jnp.float32)
  for li in range(n_layers):
    h_bf = h.astype(jnp.bfloat16)
    x_in = b_in_ref[0, li]                          # (2H, L) f32
    for j, (d, row) in enumerate(tap_plan[li]):
      if d == 0:
        tap = h_bf
      else:
        # Rolled tap + batch-seam mask == per-batch zero padding of Conv1d.
        tap = (pltpu.roll(h, (-d) % L, axis=1)
               * seam_ref[row]).astype(jnp.bfloat16)
      x_in = x_in + jnp.dot(w_in_ref[0, li * kernel_size + j], tap,
                            preferred_element_type=jnp.float32)

    # fused_add_tanh_sigmoid_multiply (g = 0); sigmoid written via tanh so
    # each gate half is a single EUP push.
    t = jnp.tanh(x_in[:hidden, :])
    s = 0.5 * (jnp.tanh(0.5 * x_in[hidden:, :]) + 1.0)
    acts = (t * s).astype(jnp.bfloat16)

    if li < n_layers - 1:
      rs = jnp.dot(w_rs_ref[0, li], acts,
                   preferred_element_type=jnp.float32) + b_rs_ref[0, li]
      h = (h + rs[:hidden, :]) * mask
      output = output + rs[hidden:, :]
    else:
      # Last layer: only the skip rows are used -> slice refs before loading.
      rs = (jnp.dot(w_rs_ref[0, li, :hidden, :], acts,
                    preferred_element_type=jnp.float32)
            + b_rs_ref[0, li, :hidden, :])
      output = output + rs
  output = output * mask

  # ---- post 1x1 conv on the MXU (not a cross-sublane VPU/XLU reduce) ----
  stats = jnp.dot(w_post_ref[0], output.astype(jnp.bfloat16),
                  preferred_element_type=jnp.float32)
  stats = (stats + b_post_ref[0]) * mask            # (half, L)

  # ---- affine coupling (mean_only, forward): x1 <- m + x1 * mask ----
  @pl.when(is_even)
  def _update_hi():
    hi_ref[...] = (stats + x_high * mask).astype(hi_ref.dtype)

  @pl.when(is_odd)
  def _update_lo():
    lo_ref[...] = (stats + x_low * mask).astype(lo_ref.dtype)


# ------------------------------- wrapper -------------------------------------
def _make_tap_plan_and_seams(n_layers, kernel_size, dilation_rate,
                             seg_len, L, hidden):
  """Static per-layer tap offsets + seam masks for the folded (C, B*T) layout."""
  shifts, plan = [], []
  for li in range(n_layers):
    dil = dilation_rate ** li
    pad = (kernel_size * dil - dil) // 2
    taps = []
    for j in range(kernel_size):
      d = j * dil - pad
      if d == 0:
        taps.append((0, -1))
      else:
        if d not in shifts:
          shifts.append(d)
        taps.append((d, shifts.index(d)))
    plan.append(tuple(taps))
  pos = jnp.arange(L, dtype=jnp.int32) % seg_len
  rows = [(((pos + d) >= 0) & ((pos + d) < seg_len)).astype(jnp.float32)
          for d in shifts]
  if not rows:                                      # kernel_size == 1
    rows = [jnp.ones((L,), jnp.float32)]
  seam = jnp.broadcast_to(jnp.stack(rows)[:, None, :],
                          (len(rows), hidden, L))   # (n_shifts, H, L)
  return tuple(plan), seam


def _pack_flow_params(flow_params, L):
  """Stack per-flow weights with each trailing Flip() folded into the packing:
  odd flows read x0 from the high half (w_pre columns reversed) and write the
  coupling mean into the low half (w_post / b_post rows reversed).  Biases are
  pre-broadcast to L lanes (dense DMA, no in-kernel splats); MXU weights bf16."""
  hidden = flow_params[0]["w_pre"].shape[0]
  n_layers, ksize = flow_params[0]["w_in"].shape[:2]
  half = flow_params[0]["w_post"].shape[0]
  wd = jnp.bfloat16
  w_pre, b_pre, w_in, b_in, w_rs, b_rs, w_post, b_post = ([] for _ in range(8))
  for f, p in enumerate(flow_params):
    flip = (f % 2) == 1
    wp = p["w_pre"][:, ::-1] if flip else p["w_pre"]
    wo = p["w_post"][::-1, :] if flip else p["w_post"]
    bo = p["b_post"][::-1, :] if flip else p["b_post"]
    w_pre.append(wp)
    b_pre.append(jnp.broadcast_to(p["b_pre"], (hidden, L)))
    w_in.append(p["w_in"].reshape(n_layers * ksize, 2 * hidden, hidden))
    b_in.append(jnp.broadcast_to(p["b_in"], (n_layers, 2 * hidden, L)))
    w_rs.append(p["w_rs"])
    b_rs.append(jnp.broadcast_to(p["b_rs"], (n_layers, 2 * hidden, L)))
    w_post.append(wo)
    b_post.append(jnp.broadcast_to(bo, (half, L)))
  return (jnp.stack(w_pre).astype(wd),    # (F, H, half)
          jnp.stack(b_pre),               # (F, H, L)        f32 lane-dense
          jnp.stack(w_in).astype(wd),     # (F, nl*k, 2H, H)
          jnp.stack(b_in),                # (F, nl, 2H, L)   f32 lane-dense
          jnp.stack(w_rs).astype(wd),     # (F, nl, 2H, H)
          jnp.stack(b_rs),                # (F, nl, 2H, L)   f32 lane-dense
          jnp.stack(w_post).astype(wd),   # (F, half, H)
          jnp.stack(b_post))              # (F, half, L)     f32 lane-dense


def residual_coupling_block_forward(x, x_mask, flow_params):
  """ResidualCouplingBlock.forward(x, x_mask, g=None, reverse=False)."""
  B, C, T = x.shape
  half = C // 2
  hidden = flow_params[0]["w_pre"].shape[0]
  n_layers, ksize = flow_params[0]["w_in"].shape[:2]
  n_flows = len(flow_params)
  L = B * T

  # Lane-dense layout: fold batch into the lane axis -> (C, B*T); keep the
  # two coupling halves as separate arrays (the carry of the flow loop).
  x_flat = x.transpose(1, 0, 2).reshape(C, L)
  x_lo, x_hi = x_flat[:half], x_flat[half:]
  mask_flat = x_mask.transpose(1, 0, 2).reshape(1, L)

  tap_plan, seam = _make_tap_plan_and_seams(
      n_layers, ksize, DILATION_RATE, T, L, hidden)
  packed = _pack_flow_params(flow_params, L)

  kern = functools.partial(
      flow_step_kernel, hidden=hidden, n_layers=n_layers,
      kernel_size=ksize, tap_plan=tap_plan)

  def const_spec(a):
    nd = a.ndim
    return pl.BlockSpec(a.shape, lambda f, _n=nd: (0,) * _n)

  def flow_spec(a):
    nd = a.ndim
    return pl.BlockSpec((1,) + a.shape[1:],
                        lambda f, _n=nd: (f,) + (0,) * (_n - 1))

  in_arrays = (x_lo, x_hi, mask_flat, seam) + packed
  in_specs = ([const_spec(a) for a in (x_lo, x_hi, mask_flat, seam)]
              + [flow_spec(a) for a in packed])

  # Rough advisory cost for XLA's scheduler around this tiny fused kernel.
  flops = n_flows * (
      n_layers * ksize * 2 * (2 * hidden) * hidden * L
      + (n_layers - 1) * 2 * (2 * hidden) * hidden * L
      + 2 * hidden * hidden * L
      + 2 * (2 * half * hidden * L))
  transcendentals = n_flows * n_layers * 2 * hidden * L
  bytes_accessed = (sum(int(a.size) * a.dtype.itemsize for a in in_arrays)
                    + 4 * C * L)

  out_lo, out_hi = pl.pallas_call(
      kern,
      grid=(n_flows,),
      in_specs=in_specs,
      out_specs=(pl.BlockSpec((half, L), lambda f: (0, 0)),
                 pl.BlockSpec((half, L), lambda f: (0, 0))),
      out_shape=(jax.ShapeDtypeStruct((half, L), x.dtype),
                 jax.ShapeDtypeStruct((half, L), x.dtype)),
      compiler_params=pltpu.CompilerParams(
          dimension_semantics=("arbitrary",)),
      cost_estimate=pl.CostEstimate(
          flops=flops, transcendentals=transcendentals,
          bytes_accessed=bytes_accessed),
  )(*in_arrays)

  out_flat = jnp.concatenate([out_lo, out_hi], axis=0)
  if n_flows % 2 == 1:        # odd number of Flip()s -> one static reversal
    out_flat = out_flat[::-1, :]
  return out_flat.reshape(C, B, T).transpose(1, 0, 2)


# ------------------------------ pure-JAX reference ---------------------------
def _conv1d_ref(x, w, b, dilation=1, padding=0):
  out = lax.conv_general_dilated(
      x, w, window_strides=(1,), padding=[(padding, padding)],
      rhs_dilation=(dilation,), dimension_numbers=("NCH", "OIH", "NCH"))
  return out + b[None, :, None]


def coupling_layer_ref(x, x_mask, p):
  half = x.shape[1] // 2
  x0, x1 = x[:, :half], x[:, half:]
  hidden = p["w_pre"].shape[0]
  n_layers = p["w_in"].shape[0]

  h = _conv1d_ref(x0, p["w_pre"][:, :, None], p["b_pre"][:, 0]) * x_mask
  output = jnp.zeros_like(h)
  for i in range(n_layers):
    dilation = DILATION_RATE ** i
    pad = (KERNEL_SIZE * dilation - dilation) // 2
    w = jnp.transpose(p["w_in"][i], (1, 2, 0))     # (k,2H,H) -> (2H,H,k)
    x_in = _conv1d_ref(h, w, p["b_in"][i, :, 0], dilation=dilation, padding=pad)
    acts = jnp.tanh(x_in[:, :hidden]) * jax.nn.sigmoid(x_in[:, hidden:])
    rs = _conv1d_ref(acts, p["w_rs"][i][:, :, None], p["b_rs"][i, :, 0])
    if i < n_layers - 1:
      h = (h + rs[:, :hidden]) * x_mask
      output = output + rs[:, hidden:]
    else:
      output = output + rs[:, :hidden]
  output = output * x_mask
  stats = _conv1d_ref(output, p["w_post"][:, :, None], p["b_post"][:, 0]) * x_mask
  x1_new = stats + x1 * x_mask
  return jnp.concatenate([x0, x1_new], axis=1)


def block_ref(x, x_mask, flow_params):
  for p in flow_params:
    x = coupling_layer_ref(x, x_mask, p)
    x = jnp.flip(x, axis=1)
  return x


# ------------------------------- parameter init ------------------------------
def init_flow_params(key):
  """Deterministic params for one ResidualCouplingLayer (effective weights
  after weight_norm). NOTE: the real module zero-inits `post`; we use small
  nonzero values so the kernel compute is actually exercised."""
  ks = jax.random.split(key, 8)
  s = 0.1
  return {
      "w_pre":  s * jax.random.normal(ks[0], (HIDDEN, HALF), jnp.float32),
      "b_pre":  s * jax.random.normal(ks[1], (HIDDEN, 1), jnp.float32),
      "w_in":   s * jax.random.normal(ks[2], (N_LAYERS, KERNEL_SIZE, 2 * HIDDEN, HIDDEN), jnp.float32),
      "b_in":   s * jax.random.normal(ks[3], (N_LAYERS, 2 * HIDDEN, 1), jnp.float32),
      # last layer only uses first HIDDEN output rows (skip-only)
      "w_rs":   s * jax.random.normal(ks[4], (N_LAYERS, 2 * HIDDEN, HIDDEN), jnp.float32),
      "b_rs":   s * jax.random.normal(ks[5], (N_LAYERS, 2 * HIDDEN, 1), jnp.float32),
      "w_post": s * jax.random.normal(ks[6], (HALF, HIDDEN), jnp.float32),
      "b_post": s * jax.random.normal(ks[7], (HALF, 1), jnp.float32),
  }


# ------------------------------------ main ------------------------------------
if __name__ == "__main__":
  key = jax.random.PRNGKey(0)
  k_x, k_p = jax.random.split(key)

  x = jax.random.normal(k_x, (BATCH, CHANNELS, TIME), jnp.float32)
  lengths = jnp.array([TIME, TIME - 13], jnp.int32)
  x_mask = (jnp.arange(TIME)[None, None, :] < lengths[:, None, None]).astype(jnp.float32)

  flow_params = [init_flow_params(k) for k in jax.random.split(k_p, N_FLOWS)]

  fwd = jax.jit(lambda xx, mm: residual_coupling_block_forward(xx, mm, flow_params))
  out = fwd(x, x_mask)
  jax.block_until_ready(out)

  ref = block_ref(x, x_mask, flow_params)
  err = float(jnp.max(jnp.abs(out - ref)))
  assert out.shape == (BATCH, CHANNELS, TIME)
  # Tolerance accounts for bf16 MXU operands (f32 accumulation); structural
  # bugs would produce O(0.1+) errors, bf16 rounding stays ~1e-2.
  assert jnp.allclose(out, ref, rtol=3e-2, atol=3e-2), f"mismatch vs reference, max abs err={err}"

  print("KERNEL_OK")
</pallas_src>

<mosaic_0001>
module attributes {stable_mosaic.version = 11 : i64} {
  func.func @flow_step_kernel(%arg0: i32, %arg1: memref<2x128xf32, #tpu.memory_space<vmem>>, %arg2: memref<2x128xf32, #tpu.memory_space<vmem>>, %arg3: memref<1x128xf32, #tpu.memory_space<vmem>>, %arg4: memref<4x32x128xf32, #tpu.memory_space<vmem>>, %arg5: memref<1x32x2xbf16, #tpu.memory_space<vmem>>, %arg6: memref<1x32x128xf32, #tpu.memory_space<vmem>>, %arg7: memref<1x20x64x32xbf16, #tpu.memory_space<vmem>>, %arg8: memref<1x4x64x128xf32, #tpu.memory_space<vmem>>, %arg9: memref<1x4x64x32xbf16, #tpu.memory_space<vmem>>, %arg10: memref<1x4x64x128xf32, #tpu.memory_space<vmem>>, %arg11: memref<1x2x32xbf16, #tpu.memory_space<vmem>>, %arg12: memref<1x2x128xf32, #tpu.memory_space<vmem>>, %arg13: memref<2x128xf32, #tpu.memory_space<vmem>>, %arg14: memref<2x128xf32, #tpu.memory_space<vmem>>) attributes {dimension_semantics = [#tpu.dimension_semantics<arbitrary>], iteration_bounds = array<i64: 4>, scalar_prefetch = 0 : i64, scratch_operands = 0 : i64, tpu.core_type = #tpu.core_type<tc>, window_params = [{pipeline_mode = #tpu.pipeline_mode<synchronous>, transform_indices = @transform_0, window_bounds = array<i64: 2, 128>}, {pipeline_mode = #tpu.pipeline_mode<synchronous>, transform_indices = @transform_1, window_bounds = array<i64: 2, 128>}, {pipeline_mode = #tpu.pipeline_mode<synchronous>, transform_indices = @transform_2, window_bounds = array<i64: 1, 128>}, {pipeline_mode = #tpu.pipeline_mode<synchronous>, transform_indices = @transform_3, window_bounds = array<i64: 4, 32, 128>}, {transform_indices = @transform_4, window_bounds = array<i64: 1, 32, 2>}, {transform_indices = @transform_5, window_bounds = array<i64: 1, 32, 128>}, {transform_indices = @transform_6, window_bounds = array<i64: 1, 20, 64, 32>}, {transform_indices = @transform_7, window_bounds = array<i64: 1, 4, 64, 128>}, {transform_indices = @transform_8, window_bounds = array<i64: 1, 4, 64, 32>}, {transform_indices = @transform_9, window_bounds = array<i64: 1, 4, 64, 128>}, {transform_indices = @transform_10, window_bounds = array<i64: 1, 2, 32>}, {transform_indices = @transform_11, window_bounds = array<i64: 1, 2, 128>}, {pipeline_mode = #tpu.pipeline_mode<synchronous>, transform_indices = @transform_12, window_bounds = array<i64: 2, 128>}, {pipeline_mode = #tpu.pipeline_mode<synchronous>, transform_indices = @transform_13, window_bounds = array<i64: 2, 128>}]} {
    %c0_i32 = arith.constant 0 : i32
    %0 = arith.cmpi eq, %arg0, %c0_i32 : i32
    %1 = arith.extui %0 : i1 to i32
    %c0_i32_0 = arith.constant 0 : i32
    %2 = arith.cmpi ne, %1, %c0_i32_0 : i32
    scf.if %2 {
      %c0_248 = arith.constant 0 : index
      %c0_249 = arith.constant 0 : index
      %333 = vector.load %arg1[%c0_248, %c0_249] : memref<2x128xf32, #tpu.memory_space<vmem>>, vector<2x128xf32>
      %c0_250 = arith.constant 0 : index
      %c0_251 = arith.constant 0 : index
      %334 = vector.load %arg13[%c0_250, %c0_251] : memref<2x128xf32, #tpu.memory_space<vmem>>, vector<2x128xf32>
      tpu.vector_store %arg13[%c0_250, %c0_251], %333 {strides = array<i32>} : memref<2x128xf32, #tpu.memory_space<vmem>>, vector<2x128xf32>,
      %c0_252 = arith.constant 0 : index
      %c0_253 = arith.constant 0 : index
      %335 = vector.load %arg2[%c0_252, %c0_253] : memref<2x128xf32, #tpu.memory_space<vmem>>, vector<2x128xf32>
      %c0_254 = arith.constant 0 : index
      %c0_255 = arith.constant 0 : index
      %336 = vector.load %arg14[%c0_254, %c0_255] : memref<2x128xf32, #tpu.memory_space<vmem>>, vector<2x128xf32>
      tpu.vector_store %arg14[%c0_254, %c0_255], %335 {strides = array<i32>} : memref<2x128xf32, #tpu.memory_space<vmem>>, vector<2x128xf32>,
    } else {
    }
    %c0 = arith.constant 0 : index
    %c0_1 = arith.constant 0 : index
    %3 = vector.load %arg3[%c0, %c0_1] : memref<1x128xf32, #tpu.memory_space<vmem>>, vector<1x128xf32>
    %c0_2 = arith.constant 0 : index
    %c0_3 = arith.constant 0 : index
    %4 = vector.load %arg13[%c0_2, %c0_3] : memref<2x128xf32, #tpu.memory_space<vmem>>, vector<2x128xf32>
    %c0_4 = arith.constant 0 : index
    %c0_5 = arith.constant 0 : index
    %5 = vector.load %arg14[%c0_4, %c0_5] : memref<2x128xf32, #tpu.memory_space<vmem>>, vector<2x128xf32>
    %c2_i32 = arith.constant 2 : i32
    %c0_i32_6 = arith.constant 0 : i32
    %6 = arith.cmpi eq, %c2_i32, %c0_i32_6 : i32
    %c1_i32 = arith.constant 1 : i32
    %7 = arith.select %6, %c1_i32, %c2_i32 : i32
    %8 = arith.remsi %arg0, %7 : i32
    %c0_i32_7 = arith.constant 0 : i32
    %9 = arith.cmpi ne, %8, %c0_i32_7 : i32
    %c0_i32_8 = arith.constant 0 : i32
    %10 = arith.cmpi slt, %8, %c0_i32_8 : i32
    %c0_i32_9 = arith.constant 0 : i32
    %11 = arith.cmpi slt, %7, %c0_i32_9 : i32
    %12 = arith.xori %10, %11 : i1
    %13 = arith.andi %12, %9 : i1
    %14 = arith.addi %8, %7 : i32
    %15 = arith.select %13, %14, %8 : i32
    %16 = arith.sitofp %15 : i32 to f32
    %c2_i32_10 = arith.constant 2 : i32
    %c0_i32_11 = arith.constant 0 : i32
    %17 = arith.cmpi eq, %c2_i32_10, %c0_i32_11 : i32
    %c1_i32_12 = arith.constant 1 : i32
    %18 = arith.select %17, %c1_i32_12, %c2_i32_10 : i32
    %19 = arith.remsi %arg0, %18 : i32
    %c0_i32_13 = arith.constant 0 : i32
    %20 = arith.cmpi ne, %19, %c0_i32_13 : i32
    %c0_i32_14 = arith.constant 0 : i32
    %21 = arith.cmpi slt, %19, %c0_i32_14 : i32
    %c0_i32_15 = arith.constant 0 : i32
    %22 = arith.cmpi slt, %18, %c0_i32_15 : i32
    %23 = arith.xori %21, %22 : i1
    %24 = arith.andi %23, %20 : i1
    %25 = arith.addi %19, %18 : i32
    %26 = arith.select %24, %25, %19 : i32
    %c0_i32_16 = arith.constant 0 : i32
    %27 = arith.cmpi eq, %26, %c0_i32_16 : i32
    %c2_i32_17 = arith.constant 2 : i32
    %c0_i32_18 = arith.constant 0 : i32
    %28 = arith.cmpi eq, %c2_i32_17, %c0_i32_18 : i32
    %c1_i32_19 = arith.constant 1 : i32
    %29 = arith.select %28, %c1_i32_19, %c2_i32_17 : i32
    %30 = arith.remsi %arg0, %29 : i32
    %c0_i32_20 = arith.constant 0 : i32
    %31 = arith.cmpi ne, %30, %c0_i32_20 : i32
    %c0_i32_21 = arith.constant 0 : i32
    %32 = arith.cmpi slt, %30, %c0_i32_21 : i32
    %c0_i32_22 = arith.constant 0 : i32
    %33 = arith.cmpi slt, %29, %c0_i32_22 : i32
    %34 = arith.xori %32, %33 : i1
    %35 = arith.andi %34, %31 : i1
    %36 = arith.addi %30, %29 : i32
    %37 = arith.select %35, %36, %30 : i32
    %c1_i32_23 = arith.constant 1 : i32
    %38 = arith.cmpi eq, %37, %c1_i32_23 : i32
    %cst = arith.constant 1.000000e+00 : f32
    %39 = arith.subf %cst, %16 : f32
    %40 = vector.broadcast %39 : f32 to vector<2x128xf32>
    %41 = arith.mulf %4, %40 : vector<2x128xf32>
    %42 = vector.broadcast %16 : f32 to vector<2x128xf32>
    %43 = arith.mulf %5, %42 : vector<2x128xf32>
    %44 = arith.addf %41, %43 : vector<2x128xf32>
    %c0_24 = arith.constant 0 : index
    %c0_25 = arith.constant 0 : index
    %c0_26 = arith.constant 0 : index
    %45 = vector.load %arg5[%c0_24, %c0_25, %c0_26] : memref<1x32x2xbf16, #tpu.memory_space<vmem>>, vector<1x32x2xbf16>
    %46 = vector.shape_cast %45 : vector<1x32x2xbf16> to vector<32x2xbf16>
    %47 = arith.truncf %44 : vector<2x128xf32> to vector<2x128xbf16>
    %cst_27 = arith.constant dense<0.000000e+00> : vector<32x128xf32>
    %48 = tpu.matmul %46, %47, %cst_27 {dimension_numbers = #tpu.dot_dimension_numbers<[1], [0], [0], [1], [0, 0, 1, 1], [], []>} : vector<32x2xbf16>, vector<2x128xbf16>, vector<32x128xf32> -> vector<32x128xf32>
    %c0_28 = arith.constant 0 : index
    %c0_29 = arith.constant 0 : index
    %c0_30 = arith.constant 0 : index
    %49 = vector.load %arg6[%c0_28, %c0_29, %c0_30] : memref<1x32x128xf32, #tpu.memory_space<vmem>>, vector<1x32x128xf32>
    %50 = vector.shape_cast %49 : vector<1x32x128xf32> to vector<32x128xf32>
    %51 = arith.addf %48, %50 : vector<32x128xf32>
    %52 = vector.broadcast %3 : vector<1x128xf32> to vector<32x128xf32>
    %53 = arith.mulf %51, %52 : vector<32x128xf32>
    %cst_31 = arith.constant 0.000000e+00 : f32
    %54 = vector.broadcast %cst_31 : f32 to vector<32x128xf32>
    %55 = arith.truncf %53 : vector<32x128xf32> to vector<32x128xbf16>
    %c0_32 = arith.constant 0 : index
    %c0_33 = arith.constant 0 : index
    %c0_34 = arith.constant 0 : index
    %c0_35 = arith.constant 0 : index
    %56 = vector.load %arg8[%c0_32, %c0_33, %c0_34, %c0_35] : memref<1x4x64x128xf32, #tpu.memory_space<vmem>>, vector<1x1x64x128xf32>
    %57 = vector.shape_cast %56 : vector<1x1x64x128xf32> to vector<64x128xf32>
    %c2_i32_36 = arith.constant 2 : i32
    %58 = tpu.dynamic_rotate %53 by %c2_i32_36 dim 1 : vector<32x128xf32>, i32 -> vector<32x128xf32>
    %c0_37 = arith.constant 0 : index
    %c0_38 = arith.constant 0 : index
    %c0_39 = arith.constant 0 : index
    %59 = vector.load %arg4[%c0_37, %c0_38, %c0_39] : memref<4x32x128xf32, #tpu.memory_space<vmem>>, vector<1x32x128xf32>
    %60 = vector.shape_cast %59 : vector<1x32x128xf32> to vector<32x128xf32>
    %61 = arith.mulf %58, %60 : vector<32x128xf32>
    %62 = arith.truncf %61 : vector<32x128xf32> to vector<32x128xbf16>
    %c0_40 = arith.constant 0 : index
    %c0_41 = arith.constant 0 : index
    %c0_42 = arith.constant 0 : index
    %c0_43 = arith.constant 0 : index
    %63 = vector.load %arg7[%c0_40, %c0_41, %c0_42, %c0_43] : memref<1x20x64x32xbf16, #tpu.memory_space<vmem>>, vector<1x1x64x32xbf16>
    %64 = vector.shape_cast %63 : vector<1x1x64x32xbf16> to vector<64x32xbf16>
    %cst_44 = arith.constant dense<0.000000e+00> : vector<64x128xf32>
    %65 = tpu.matmul %64, %62, %cst_44 {dimension_numbers = #tpu.dot_dimension_numbers<[1], [0], [0], [1], [0, 0, 1, 1], [], []>} : vector<64x32xbf16>, vector<32x128xbf16>, vector<64x128xf32> -> vector<64x128xf32>
    %66 = arith.addf %57, %65 : vector<64x128xf32>
    %c1_i32_45 = arith.constant 1 : i32
    %67 = tpu.dynamic_rotate %53 by %c1_i32_45 dim 1 : vector<32x128xf32>, i32 -> vector<32x128xf32>
    %c1 = arith.constant 1 : index
    %c0_46 = arith.constant 0 : index
    %c0_47 = arith.constant 0 : index
    %68 = vector.load %arg4[%c1, %c0_46, %c0_47] : memref<4x32x128xf32, #tpu.memory_space<vmem>>, vector<1x32x128xf32>
    %69 = vector.shape_cast %68 : vector<1x32x128xf32> to vector<32x128xf32>
    %70 = arith.mulf %67, %69 : vector<32x128xf32>
    %71 = arith.truncf %70 : vector<32x128xf32> to vector<32x128xbf16>
    %c0_48 = arith.constant 0 : index
    %c1_49 = arith.constant 1 : index
    %c0_50 = arith.constant 0 : index
    %c0_51 = arith.constant 0 : index
    %72 = vector.load %arg7[%c0_48, %c1_49, %c0_50, %c0_51] : memref<1x20x64x32xbf16, #tpu.memory_space<vmem>>, vector<1x1x64x32xbf16>
    %73 = vector.shape_cast %72 : vector<1x1x64x32xbf16> to vector<64x32xbf16>
    %cst_52 = arith.constant dense<0.000000e+00> : vector<64x128xf32>
    %74 = tpu.matmul %73, %71, %cst_52 {dimension_numbers = #tpu.dot_dimension_numbers<[1], [0], [0], [1], [0, 0, 1, 1], [], []>} : vector<64x32xbf16>, vector<32x128xbf16>, vector<64x128xf32> -> vector<64x128xf32>
    %75 = arith.addf %66, %74 : vector<64x128xf32>
    %c0_53 = arith.constant 0 : index
    %c2 = arith.constant 2 : index
    %c0_54 = arith.constant 0 : index
    %c0_55 = arith.constant 0 : index
    %76 = vector.load %arg7[%c0_53, %c2, %c0_54, %c0_55] : memref<1x20x64x32xbf16, #tpu.memory_space<vmem>>, vector<1x1x64x32xbf16>
    %77 = vector.shape_cast %76 : vector<1x1x64x32xbf16> to vector<64x32xbf16>
    %cst_56 = arith.constant dense<0.000000e+00> : vector<64x128xf32>
    %78 = tpu.matmul %77, %55, %cst_56 {dimension_numbers = #tpu.dot_dimension_numbers<[1], [0], [0], [1], [0, 0, 1, 1], [], []>} : vector<64x32xbf16>, vector<32x128xbf16>, vector<64x128xf32> -> vector<64x128xf32>
    %79 = arith.addf %75, %78 : vector<64x128xf32>
    %c127_i32 = arith.constant 127 : i32
    %80 = tpu.dynamic_rotate %53 by %c127_i32 dim 1 : vector<32x128xf32>, i32 -> vector<32x128xf32>
    %c2_57 = arith.constant 2 : index
    %c0_58 = arith.constant 0 : index
    %c0_59 = arith.constant 0 : index
    %81 = vector.load %arg4[%c2_57, %c0_58, %c0_59] : memref<4x32x128xf32, #tpu.memory_space<vmem>>, vector<1x32x128xf32>
    %82 = vector.shape_cast %81 : vector<1x32x128xf32> to vector<32x128xf32>
    %83 = arith.mulf %80, %82 : vector<32x128xf32>
    %84 = arith.truncf %83 : vector<32x128xf32> to vector<32x128xbf16>
    %c0_60 = arith.constant 0 : index
    %c3 = arith.constant 3 : index
    %c0_61 = arith.constant 0 : index
    %c0_62 = arith.constant 0 : index
    %85 = vector.load %arg7[%c0_60, %c3, %c0_61, %c0_62] : memref<1x20x64x32xbf16, #tpu.memory_space<vmem>>, vector<1x1x64x32xbf16>
    %86 = vector.shape_cast %85 : vector<1x1x64x32xbf16> to vector<64x32xbf16>
    %cst_63 = arith.constant dense<0.000000e+00> : vector<64x128xf32>
    %87 = tpu.matmul %86, %84, %cst_63 {dimension_numbers = #tpu.dot_dimension_numbers<[1], [0], [0], [1], [0, 0, 1, 1], [], []>} : vector<64x32xbf16>, vector<32x128xbf16>, vector<64x128xf32> -> vector<64x128xf32>
    %88 = arith.addf %79, %87 : vector<64x128xf32>
    %c126_i32 = arith.constant 126 : i32
    %89 = tpu.dynamic_rotate %53 by %c126_i32 dim 1 : vector<32x128xf32>, i32 -> vector<32x128xf32>
    %c3_64 = arith.constant 3 : index
    %c0_65 = arith.constant 0 : index
    %c0_66 = arith.constant 0 : index
    %90 = vector.load %arg4[%c3_64, %c0_65, %c0_66] : memref<4x32x128xf32, #tpu.memory_space<vmem>>, vector<1x32x128xf32>
    %91 = vector.shape_cast %90 : vector<1x32x128xf32> to vector<32x128xf32>
    %92 = arith.mulf %89, %91 : vector<32x128xf32>
    %93 = arith.truncf %92 : vector<32x128xf32> to vector<32x128xbf16>
    %c0_67 = arith.constant 0 : index
    %c4 = arith.constant 4 : index
    %c0_68 = arith.constant 0 : index
    %c0_69 = arith.constant 0 : index
    %94 = vector.load %arg7[%c0_67, %c4, %c0_68, %c0_69] : memref<1x20x64x32xbf16, #tpu.memory_space<vmem>>, vector<1x1x64x32xbf16>
    %95 = vector.shape_cast %94 : vector<1x1x64x32xbf16> to vector<64x32xbf16>
    %cst_70 = arith.constant dense<0.000000e+00> : vector<64x128xf32>
    %96 = tpu.matmul %95, %93, %cst_70 {dimension_numbers = #tpu.dot_dimension_numbers<[1], [0], [0], [1], [0, 0, 1, 1], [], []>} : vector<64x32xbf16>, vector<32x128xbf16>, vector<64x128xf32> -> vector<64x128xf32>
    %97 = arith.addf %88, %96 : vector<64x128xf32>
    %98 = vector.extract_strided_slice %97 {offsets = [0, 0], sizes = [32, 128], strides = [1, 1]} : vector<64x128xf32> to vector<32x128xf32>
    %99 = math.tanh %98 : vector<32x128xf32>
    %100 = vector.extract_strided_slice %97 {offsets = [32, 0], sizes = [32, 128], strides = [1, 1]} : vector<64x128xf32> to vector<32x128xf32>
    %cst_71 = arith.constant 5.000000e-01 : f32
    %101 = vector.broadcast %cst_71 : f32 to vector<32x128xf32>
    %102 = arith.mulf %101, %100 : vector<32x128xf32>
    %103 = math.tanh %102 : vector<32x128xf32>
    %cst_72 = arith.constant 1.000000e+00 : f32
    %104 = vector.broadcast %cst_72 : f32 to vector<32x128xf32>
    %105 = arith.addf %103, %104 : vector<32x128xf32>
    %cst_73 = arith.constant 5.000000e-01 : f32
    %106 = vector.broadcast %cst_73 : f32 to vector<32x128xf32>
    %107 = arith.mulf %106, %105 : vector<32x128xf32>
    %108 = arith.mulf %99, %107 : vector<32x128xf32>
    %109 = arith.truncf %108 : vector<32x128xf32> to vector<32x128xbf16>
    %c0_74 = arith.constant 0 : index
    %c0_75 = arith.constant 0 : index
    %c0_76 = arith.constant 0 : index
    %c0_77 = arith.constant 0 : index
    %110 = vector.load %arg9[%c0_74, %c0_75, %c0_76, %c0_77] : memref<1x4x64x32xbf16, #tpu.memory_space<vmem>>, vector<1x1x64x32xbf16>
    %111 = vector.shape_cast %110 : vector<1x1x64x32xbf16> to vector<64x32xbf16>
    %cst_78 = arith.constant dense<0.000000e+00> : vector<64x128xf32>
    %112 = tpu.matmul %111, %109, %cst_78 {dimension_numbers = #tpu.dot_dimension_numbers<[1], [0], [0], [1], [0, 0, 1, 1], [], []>} : vector<64x32xbf16>, vector<32x128xbf16>, vector<64x128xf32> -> vector<64x128xf32>
    %c0_79 = arith.constant 0 : index
    %c0_80 = arith.constant 0 : index
    %c0_81 = arith.constant 0 : index
    %c0_82 = arith.constant 0 : index
    %113 = vector.load %arg10[%c0_79, %c0_80, %c0_81, %c0_82] : memref<1x4x64x128xf32, #tpu.memory_space<vmem>>, vector<1x1x64x128xf32>
    %114 = vector.shape_cast %113 : vector<1x1x64x128xf32> to vector<64x128xf32>
    %115 = arith.addf %112, %114 : vector<64x128xf32>
    %116 = vector.extract_strided_slice %115 {offsets = [0, 0], sizes = [32, 128], strides = [1, 1]} : vector<64x128xf32> to vector<32x128xf32>
    %117 = arith.addf %53, %116 : vector<32x128xf32>
    %118 = vector.broadcast %3 : vector<1x128xf32> to vector<32x128xf32>
    %119 = arith.mulf %117, %118 : vector<32x128xf32>
    %120 = vector.extract_strided_slice %115 {offsets = [32, 0], sizes = [32, 128], strides = [1, 1]} : vector<64x128xf32> to vector<32x128xf32>
    %121 = arith.addf %54, %120 : vector<32x128xf32>
    %122 = arith.truncf %119 : vector<32x128xf32> to vector<32x128xbf16>
    %c0_83 = arith.constant 0 : index
    %c1_84 = arith.constant 1 : index
    %c0_85 = arith.constant 0 : index
    %c0_86 = arith.constant 0 : index
    %123 = vector.load %arg8[%c0_83, %c1_84, %c0_85, %c0_86] : memref<1x4x64x128xf32, #tpu.memory_space<vmem>>, vector<1x1x64x128xf32>
    %124 = vector.shape_cast %123 : vector<1x1x64x128xf32> to vector<64x128xf32>
    %c2_i32_87 = arith.constant 2 : i32
    %125 = tpu.dynamic_rotate %119 by %c2_i32_87 dim 1 : vector<32x128xf32>, i32 -> vector<32x128xf32>
    %c0_88 = arith.constant 0 : index
    %c0_89 = arith.constant 0 : index
    %c0_90 = arith.constant 0 : index
    %126 = vector.load %arg4[%c0_88, %c0_89, %c0_90] : memref<4x32x128xf32, #tpu.memory_space<vmem>>, vector<1x32x128xf32>
    %127 = vector.shape_cast %126 : vector<1x32x128xf32> to vector<32x128xf32>
    %128 = arith.mulf %125, %127 : vector<32x128xf32>
    %129 = arith.truncf %128 : vector<32x128xf32> to vector<32x128xbf16>
    %c0_91 = arith.constant 0 : index
    %c5 = arith.constant 5 : index
    %c0_92 = arith.constant 0 : index
    %c0_93 = arith.constant 0 : index
    %130 = vector.load %arg7[%c0_91, %c5, %c0_92, %c0_93] : memref<1x20x64x32xbf16, #tpu.memory_space<vmem>>, vector<1x1x64x32xbf16>
    %131 = vector.shape_cast %130 : vector<1x1x64x32xbf16> to vector<64x32xbf16>
    %cst_94 = arith.constant dense<0.000000e+00> : vector<64x128xf32>
    %132 = tpu.matmul %131, %129, %cst_94 {dimension_numbers = #tpu.dot_dimension_numbers<[1], [0], [0], [1], [0, 0, 1, 1], [], []>} : vector<64x32xbf16>, vector<32x128xbf16>, vector<64x128xf32> -> vector<64x128xf32>
    %133 = arith.addf %124, %132 : vector<64x128xf32>
    %c1_i32_95 = arith.constant 1 : i32
    %134 = tpu.dynamic_rotate %119 by %c1_i32_95 dim 1 : vector<32x128xf32>, i32 -> vector<32x128xf32>
    %c1_96 = arith.constant 1 : index
    %c0_97 = arith.constant 0 : index
    %c0_98 = arith.constant 0 : index
    %135 = vector.load %arg4[%c1_96, %c0_97, %c0_98] : memref<4x32x128xf32, #tpu.memory_space<vmem>>, vector<1x32x128xf32>
    %136 = vector.shape_cast %135 : vector<1x32x128xf32> to vector<32x128xf32>
    %137 = arith.mulf %134, %136 : vector<32x128xf32>
    %138 = arith.truncf %137 : vector<32x128xf32> to vector<32x128xbf16>
    %c0_99 = arith.constant 0 : index
    %c6 = arith.constant 6 : index
    %c0_100 = arith.constant 0 : index
    %c0_101 = arith.constant 0 : index
    %139 = vector.load %arg7[%c0_99, %c6, %c0_100, %c0_101] : memref<1x20x64x32xbf16, #tpu.memory_space<vmem>>, vector<1x1x64x32xbf16>
    %140 = vector.shape_cast %139 : vector<1x1x64x32xbf16> to vector<64x32xbf16>
    %cst_102 = arith.constant dense<0.000000e+00> : vector<64x128xf32>
    %141 = tpu.matmul %140, %138, %cst_102 {dimension_numbers = #tpu.dot_dimension_numbers<[1], [0], [0], [1], [0, 0, 1, 1], [], []>} : vector<64x32xbf16>, vector<32x128xbf16>, vector<64x128xf32> -> vector<64x128xf32>
    %142 = arith.addf %133, %141 : vector<64x128xf32>
    %c0_103 = arith.constant 0 : index
    %c7 = arith.constant 7 : index
    %c0_104 = arith.constant 0 : index
    %c0_105 = arith.constant 0 : index
    %143 = vector.load %arg7[%c0_103, %c7, %c0_104, %c0_105] : memref<1x20x64x32xbf16, #tpu.memory_space<vmem>>, vector<1x1x64x32xbf16>
    %144 = vector.shape_cast %143 : vector<1x1x64x32xbf16> to vector<64x32xbf16>
    %cst_106 = arith.constant dense<0.000000e+00> : vector<64x128xf32>
    %145 = tpu.matmul %144, %122, %cst_106 {dimension_numbers = #tpu.dot_dimension_numbers<[1], [0], [0], [1], [0, 0, 1, 1], [], []>} : vector<64x32xbf16>, vector<32x128xbf16>, vector<64x128xf32> -> vector<64x128xf32>
    %146 = arith.addf %142, %145 : vector<64x128xf32>
    %c127_i32_107 = arith.constant 127 : i32
    %147 = tpu.dynamic_rotate %119 by %c127_i32_107 dim 1 : vector<32x128xf32>, i32 -> vector<32x128xf32>
    %c2_108 = arith.constant 2 : index
    %c0_109 = arith.constant 0 : index
    %c0_110 = arith.constant 0 : index
    %148 = vector.load %arg4[%c2_108, %c0_109, %c0_110] : memref<4x32x128xf32, #tpu.memory_space<vmem>>, vector<1x32x128xf32>
    %149 = vector.shape_cast %148 : vector<1x32x128xf32> to vector<32x128xf32>
    %150 = arith.mulf %147, %149 : vector<32x128xf32>
    %151 = arith.truncf %150 : vector<32x128xf32> to vector<32x128xbf16>
    %c0_111 = arith.constant 0 : index
    %c8 = arith.constant 8 : index
    %c0_112 = arith.constant 0 : index
    %c0_113 = arith.constant 0 : index
    %152 = vector.load %arg7[%c0_111, %c8, %c0_112, %c0_113] : memref<1x20x64x32xbf16, #tpu.memory_space<vmem>>, vector<1x1x64x32xbf16>
    %153 = vector.shape_cast %152 : vector<1x1x64x32xbf16> to vector<64x32xbf16>
    %cst_114 = arith.constant dense<0.000000e+00> : vector<64x128xf32>
    %154 = tpu.matmul %153, %151, %cst_114 {dimension_numbers = #tpu.dot_dimension_numbers<[1], [0], [0], [1], [0, 0, 1, 1], [], []>} : vector<64x32xbf16>, vector<32x128xbf16>, vector<64x128xf32> -> vector<64x128xf32>
    %155 = arith.addf %146, %154 : vector<64x128xf32>
    %c126_i32_115 = arith.constant 126 : i32
    %156 = tpu.dynamic_rotate %119 by %c126_i32_115 dim 1 : vector<32x128xf32>, i32 -> vector<32x128xf32>
    %c3_116 = arith.constant 3 : index
    %c0_117 = arith.constant 0 : index
    %c0_118 = arith.constant 0 : index
    %157 = vector.load %arg4[%c3_116, %c0_117, %c0_118] : memref<4x32x128xf32, #tpu.memory_space<vmem>>, vector<1x32x128xf32>
    %158 = vector.shape_cast %157 : vector<1x32x128xf32> to vector<32x128xf32>
    %159 = arith.mulf %156, %158 : vector<32x128xf32>
    %160 = arith.truncf %159 : vector<32x128xf32> to vector<32x128xbf16>
    %c0_119 = arith.constant 0 : index
    %c9 = arith.constant 9 : index
    %c0_120 = arith.constant 0 : index
    %c0_121 = arith.constant 0 : index
    %161 = vector.load %arg7[%c0_119, %c9, %c0_120, %c0_121] : memref<1x20x64x32xbf16, #tpu.memory_space<vmem>>, vector<1x1x64x32xbf16>
    %162 = vector.shape_cast %161 : vector<1x1x64x32xbf16> to vector<64x32xbf16>
    %cst_122 = arith.constant dense<0.000000e+00> : vector<64x128xf32>
    %163 = tpu.matmul %162, %160, %cst_122 {dimension_numbers = #tpu.dot_dimension_numbers<[1], [0], [0], [1], [0, 0, 1, 1], [], []>} : vector<64x32xbf16>, vector<32x128xbf16>, vector<64x128xf32> -> vector<64x128xf32>
    %164 = arith.addf %155, %163 : vector<64x128xf32>
    %165 = vector.extract_strided_slice %164 {offsets = [0, 0], sizes = [32, 128], strides = [1, 1]} : vector<64x128xf32> to vector<32x128xf32>
    %166 = math.tanh %165 : vector<32x128xf32>
    %167 = vector.extract_strided_slice %164 {offsets = [32, 0], sizes = [32, 128], strides = [1, 1]} : vector<64x128xf32> to vector<32x128xf32>
    %cst_123 = arith.constant 5.000000e-01 : f32
    %168 = vector.broadcast %cst_123 : f32 to vector<32x128xf32>
    %169 = arith.mulf %168, %167 : vector<32x128xf32>
    %170 = math.tanh %169 : vector<32x128xf32>
    %cst_124 = arith.constant 1.000000e+00 : f32
    %171 = vector.broadcast %cst_124 : f32 to vector<32x128xf32>
    %172 = arith.addf %170, %171 : vector<32x128xf32>
    %cst_125 = arith.constant 5.000000e-01 : f32
    %173 = vector.broadcast %cst_125 : f32 to vector<32x128xf32>
    %174 = arith.mulf %173, %172 : vector<32x128xf32>
    %175 = arith.mulf %166, %174 : vector<32x128xf32>
    %176 = arith.truncf %175 : vector<32x128xf32> to vector<32x128xbf16>
    %c0_126 = arith.constant 0 : index
    %c1_127 = arith.constant 1 : index
    %c0_128 = arith.constant 0 : index
    %c0_129 = arith.constant 0 : index
    %177 = vector.load %arg9[%c0_126, %c1_127, %c0_128, %c0_129] : memref<1x4x64x32xbf16, #tpu.memory_space<vmem>>, vector<1x1x64x32xbf16>
    %178 = vector.shape_cast %177 : vector<1x1x64x32xbf16> to vector<64x32xbf16>
    %cst_130 = arith.constant dense<0.000000e+00> : vector<64x128xf32>
    %179 = tpu.matmul %178, %176, %cst_130 {dimension_numbers = #tpu.dot_dimension_numbers<[1], [0], [0], [1], [0, 0, 1, 1], [], []>} : vector<64x32xbf16>, vector<32x128xbf16>, vector<64x128xf32> -> vector<64x128xf32>
    %c0_131 = arith.constant 0 : index
    %c1_132 = arith.constant 1 : index
    %c0_133 = arith.constant 0 : index
    %c0_134 = arith.constant 0 : index
    %180 = vector.load %arg10[%c0_131, %c1_132, %c0_133, %c0_134] : memref<1x4x64x128xf32, #tpu.memory_space<vmem>>, vector<1x1x64x128xf32>
    %181 = vector.shape_cast %180 : vector<1x1x64x128xf32> to vector<64x128xf32>
    %182 = arith.addf %179, %181 : vector<64x128xf32>
    %183 = vector.extract_strided_slice %182 {offsets = [0, 0], sizes = [32, 128], strides = [1, 1]} : vector<64x128xf32> to vector<32x128xf32>
    %184 = arith.addf %119, %183 : vector<32x128xf32>
    %185 = vector.broadcast %3 : vector<1x128xf32> to vector<32x128xf32>
    %186 = arith.mulf %184, %185 : vector<32x128xf32>
    %187 = vector.extract_strided_slice %182 {offsets = [32, 0], sizes = [32, 128], strides = [1, 1]} : vector<64x128xf32> to vector<32x128xf32>
    %188 = arith.addf %121, %187 : vector<32x128xf32>
    %189 = arith.truncf %186 : vector<32x128xf32> to vector<32x128xbf16>
    %c0_135 = arith.constant 0 : index
    %c2_136 = arith.constant 2 : index
    %c0_137 = arith.constant 0 : index
    %c0_138 = arith.constant 0 : index
    %190 = vector.load %arg8[%c0_135, %c2_136, %c0_137, %c0_138] : memref<1x4x64x128xf32, #tpu.memory_space<vmem>>, vector<1x1x64x128xf32>
    %191 = vector.shape_cast %190 : vector<1x1x64x128xf32> to vector<64x128xf32>
    %c2_i32_139 = arith.constant 2 : i32
    %192 = tpu.dynamic_rotate %186 by %c2_i32_139 dim 1 : vector<32x128xf32>, i32 -> vector<32x128xf32>
    %c0_140 = arith.constant 0 : index
    %c0_141 = arith.constant 0 : index
    %c0_142 = arith.constant 0 : index
    %193 = vector.load %arg4[%c0_140, %c0_141, %c0_142] : memref<4x32x128xf32, #tpu.memory_space<vmem>>, vector<1x32x128xf32>
    %194 = vector.shape_cast %193 : vector<1x32x128xf32> to vector<32x128xf32>
    %195 = arith.mulf %192, %194 : vector<32x128xf32>
    %196 = arith.truncf %195 : vector<32x128xf32> to vector<32x128xbf16>
    %c0_143 = arith.constant 0 : index
    %c10 = arith.constant 10 : index
    %c0_144 = arith.constant 0 : index
    %c0_145 = arith.constant 0 : index
    %197 = vector.load %arg7[%c0_143, %c10, %c0_144, %c0_145] : memref<1x20x64x32xbf16, #tpu.memory_space<vmem>>, vector<1x1x64x32xbf16>
    %198 = vector.shape_cast %197 : vector<1x1x64x32xbf16> to vector<64x32xbf16>
    %cst_146 = arith.constant dense<0.000000e+00> : vector<64x128xf32>
    %199 = tpu.matmul %198, %196, %cst_146 {dimension_numbers = #tpu.dot_dimension_numbers<[1], [0], [0], [1], [0, 0, 1, 1], [], []>} : vector<64x32xbf16>, vector<32x128xbf16>, vector<64x128xf32> -> vector<64x128xf32>
    %200 = arith.addf %191, %199 : vector<64x128xf32>
    %c1_i32_147 = arith.constant 1 : i32
    %201 = tpu.dynamic_rotate %186 by %c1_i32_147 dim 1 : vector<32x128xf32>, i32 -> vector<32x128xf32>
    %c1_148 = arith.constant 1 : index
    %c0_149 = arith.constant 0 : index
    %c0_150 = arith.constant 0 : index
    %202 = vector.load %arg4[%c1_148, %c0_149, %c0_150] : memref<4x32x128xf32, #tpu.memory_space<vmem>>, vector<1x32x128xf32>
    %203 = vector.shape_cast %202 : vector<1x32x128xf32> to vector<32x128xf32>
    %204 = arith.mulf %201, %203 : vector<32x128xf32>
    %205 = arith.truncf %204 : vector<32x128xf32> to vector<32x128xbf16>
    %c0_151 = arith.constant 0 : index
    %c11 = arith.constant 11 : index
    %c0_152 = arith.constant 0 : index
    %c0_153 = arith.constant 0 : index
    %206 = vector.load %arg7[%c0_151, %c11, %c0_152, %c0_153] : memref<1x20x64x32xbf16, #tpu.memory_space<vmem>>, vector<1x1x64x32xbf16>
    %207 = vector.shape_cast %206 : vector<1x1x64x32xbf16> to vector<64x32xbf16>
    %cst_154 = arith.constant dense<0.000000e+00> : vector<64x128xf32>
    %208 = tpu.matmul %207, %205, %cst_154 {dimension_numbers = #tpu.dot_dimension_numbers<[1], [0], [0], [1], [0, 0, 1, 1], [], []>} : vector<64x32xbf16>, vector<32x128xbf16>, vector<64x128xf32> -> vector<64x128xf32>
    %209 = arith.addf %200, %208 : vector<64x128xf32>
    %c0_155 = arith.constant 0 : index
    %c12 = arith.constant 12 : index
    %c0_156 = arith.constant 0 : index
    %c0_157 = arith.constant 0 : index
    %210 = vector.load %arg7[%c0_155, %c12, %c0_156, %c0_157] : memref<1x20x64x32xbf16, #tpu.memory_space<vmem>>, vector<1x1x64x32xbf16>
    %211 = vector.shape_cast %210 : vector<1x1x64x32xbf16> to vector<64x32xbf16>
    %cst_158 = arith.constant dense<0.000000e+00> : vector<64x128xf32>
    %212 = tpu.matmul %211, %189, %cst_158 {dimension_numbers = #tpu.dot_dimension_numbers<[1], [0], [0], [1], [0, 0, 1, 1], [], []>} : vector<64x32xbf16>, vector<32x128xbf16>, vector<64x128xf32> -> vector<64x128xf32>
    %213 = arith.addf %209, %212 : vector<64x128xf32>
    %c127_i32_159 = arith.constant 127 : i32
    %214 = tpu.dynamic_rotate %186 by %c127_i32_159 dim 1 : vector<32x128xf32>, i32 -> vector<32x128xf32>
    %c2_160 = arith.constant 2 : index
    %c0_161 = arith.constant 0 : index
    %c0_162 = arith.constant 0 : index
    %215 = vector.load %arg4[%c2_160, %c0_161, %c0_162] : memref<4x32x128xf32, #tpu.memory_space<vmem>>, vector<1x32x128xf32>
    %216 = vector.shape_cast %215 : vector<1x32x128xf32> to vector<32x128xf32>
    %217 = arith.mulf %214, %216 : vector<32x128xf32>
    %218 = arith.truncf %217 : vector<32x128xf32> to vector<32x128xbf16>
    %c0_163 = arith.constant 0 : index
    %c13 = arith.constant 13 : index
    %c0_164 = arith.constant 0 : index
    %c0_165 = arith.constant 0 : index
    %219 = vector.load %arg7[%c0_163, %c13, %c0_164, %c0_165] : memref<1x20x64x32xbf16, #tpu.memory_space<vmem>>, vector<1x1x64x32xbf16>
    %220 = vector.shape_cast %219 : vector<1x1x64x32xbf16> to vector<64x32xbf16>
    %cst_166 = arith.constant dense<0.000000e+00> : vector<64x128xf32>
    %221 = tpu.matmul %220, %218, %cst_166 {dimension_numbers = #tpu.dot_dimension_numbers<[1], [0], [0], [1], [0, 0, 1, 1], [], []>} : vector<64x32xbf16>, vector<32x128xbf16>, vector<64x128xf32> -> vector<64x128xf32>
    %222 = arith.addf %213, %221 : vector<64x128xf32>
    %c126_i32_167 = arith.constant 126 : i32
    %223 = tpu.dynamic_rotate %186 by %c126_i32_167 dim 1 : vector<32x128xf32>, i32 -> vector<32x128xf32>
    %c3_168 = arith.constant 3 : index
    %c0_169 = arith.constant 0 : index
    %c0_170 = arith.constant 0 : index
    %224 = vector.load %arg4[%c3_168, %c0_169, %c0_170] : memref<4x32x128xf32, #tpu.memory_space<vmem>>, vector<1x32x128xf32>
    %225 = vector.shape_cast %224 : vector<1x32x128xf32> to vector<32x128xf32>
    %226 = arith.mulf %223, %225 : vector<32x128xf32>
    %227 = arith.truncf %226 : vector<32x128xf32> to vector<32x128xbf16>
    %c0_171 = arith.constant 0 : index
    %c14 = arith.constant 14 : index
    %c0_172 = arith.constant 0 : index
    %c0_173 = arith.constant 0 : index
    %228 = vector.load %arg7[%c0_171, %c14, %c0_172, %c0_173] : memref<1x20x64x32xbf16, #tpu.memory_space<vmem>>, vector<1x1x64x32xbf16>
    %229 = vector.shape_cast %228 : vector<1x1x64x32xbf16> to vector<64x32xbf16>
    %cst_174 = arith.constant dense<0.000000e+00> : vector<64x128xf32>
    %230 = tpu.matmul %229, %227, %cst_174 {dimension_numbers = #tpu.dot_dimension_numbers<[1], [0], [0], [1], [0, 0, 1, 1], [], []>} : vector<64x32xbf16>, vector<32x128xbf16>, vector<64x128xf32> -> vector<64x128xf32>
    %231 = arith.addf %222, %230 : vector<64x128xf32>
    %232 = vector.extract_strided_slice %231 {offsets = [0, 0], sizes = [32, 128], strides = [1, 1]} : vector<64x128xf32> to vector<32x128xf32>
    %233 = math.tanh %232 : vector<32x128xf32>
    %234 = vector.extract_strided_slice %231 {offsets = [32, 0], sizes = [32, 128], strides = [1, 1]} : vector<64x128xf32> to vector<32x128xf32>
    %cst_175 = arith.constant 5.000000e-01 : f32
    %235 = vector.broadcast %cst_175 : f32 to vector<32x128xf32>
    %236 = arith.mulf %235, %234 : vector<32x128xf32>
    %237 = math.tanh %236 : vector<32x128xf32>
    %cst_176 = arith.constant 1.000000e+00 : f32
    %238 = vector.broadcast %cst_176 : f32 to vector<32x128xf32>
    %239 = arith.addf %237, %238 : vector<32x128xf32>
    %cst_177 = arith.constant 5.000000e-01 : f32
    %240 = vector.broadcast %cst_177 : f32 to vector<32x128xf32>
    %241 = arith.mulf %240, %239 : vector<32x128xf32>
    %242 = arith.mulf %233, %241 : vector<32x128xf32>
    %243 = arith.truncf %242 : vector<32x128xf32> to vector<32x128xbf16>
    %c0_178 = arith.constant 0 : index
    %c2_179 = arith.constant 2 : index
    %c0_180 = arith.constant 0 : index
    %c0_181 = arith.constant 0 : index
    %244 = vector.load %arg9[%c0_178, %c2_179, %c0_180, %c0_181] : memref<1x4x64x32xbf16, #tpu.memory_space<vmem>>, vector<1x1x64x32xbf16>
    %245 = vector.shape_cast %244 : vector<1x1x64x32xbf16> to vector<64x32xbf16>
    %cst_182 = arith.constant dense<0.000000e+00> : vector<64x128xf32>
    %246 = tpu.matmul %245, %243, %cst_182 {dimension_numbers = #tpu.dot_dimension_numbers<[1], [0], [0], [1], [0, 0, 1, 1], [], []>} : vector<64x32xbf16>, vector<32x128xbf16>, vector<64x128xf32> -> vector<64x128xf32>
    %c0_183 = arith.constant 0 : index
    %c2_184 = arith.constant 2 : index
    %c0_185 = arith.constant 0 : index
    %c0_186 = arith.constant 0 : index
    %247 = vector.load %arg10[%c0_183, %c2_184, %c0_185, %c0_186] : memref<1x4x64x128xf32, #tpu.memory_space<vmem>>, vector<1x1x64x128xf32>
    %248 = vector.shape_cast %247 : vector<1x1x64x128xf32> to vector<64x128xf32>
    %249 = arith.addf %246, %248 : vector<64x128xf32>
    %250 = vector.extract_strided_slice %249 {offsets = [0, 0], sizes = [32, 128], strides = [1, 1]} : vector<64x128xf32> to vector<32x128xf32>
    %251 = arith.addf %186, %250 : vector<32x128xf32>
    %252 = vector.broadcast %3 : vector<1x128xf32> to vector<32x128xf32>
    %253 = arith.mulf %251, %252 : vector<32x128xf32>
    %254 = vector.extract_strided_slice %249 {offsets = [32, 0], sizes = [32, 128], strides = [1, 1]} : vector<64x128xf32> to vector<32x128xf32>
    %255 = arith.addf %188, %254 : vector<32x128xf32>
    %256 = arith.truncf %253 : vector<32x128xf32> to vector<32x128xbf16>
    %c0_187 = arith.constant 0 : index
    %c3_188 = arith.constant 3 : index
    %c0_189 = arith.constant 0 : index
    %c0_190 = arith.constant 0 : index
    %257 = vector.load %arg8[%c0_187, %c3_188, %c0_189, %c0_190] : memref<1x4x64x128xf32, #tpu.memory_space<vmem>>, vector<1x1x64x128xf32>
    %258 = vector.shape_cast %257 : vector<1x1x64x128xf32> to vector<64x128xf32>
    %c2_i32_191 = arith.constant 2 : i32
    %259 = tpu.dynamic_rotate %253 by %c2_i32_191 dim 1 : vector<32x128xf32>, i32 -> vector<32x128xf32>
    %c0_192 = arith.constant 0 : index
    %c0_193 = arith.constant 0 : index
    %c0_194 = arith.constant 0 : index
    %260 = vector.load %arg4[%c0_192, %c0_193, %c0_194] : memref<4x32x128xf32, #tpu.memory_space<vmem>>, vector<1x32x128xf32>
    %261 = vector.shape_cast %260 : vector<1x32x128xf32> to vector<32x128xf32>
    %262 = arith.mulf %259, %261 : vector<32x128xf32>
    %263 = arith.truncf %262 : vector<32x128xf32> to vector<32x128xbf16>
    %c0_195 = arith.constant 0 : index
    %c15 = arith.constant 15 : index
    %c0_196 = arith.constant 0 : index
    %c0_197 = arith.constant 0 : index
    %264 = vector.load %arg7[%c0_195, %c15, %c0_196, %c0_197] : memref<1x20x64x32xbf16, #tpu.memory_space<vmem>>, vector<1x1x64x32xbf16>
    %265 = vector.shape_cast %264 : vector<1x1x64x32xbf16> to vector<64x32xbf16>
    %cst_198 = arith.constant dense<0.000000e+00> : vector<64x128xf32>
    %266 = tpu.matmul %265, %263, %cst_198 {dimension_numbers = #tpu.dot_dimension_numbers<[1], [0], [0], [1], [0, 0, 1, 1], [], []>} : vector<64x32xbf16>, vector<32x128xbf16>, vector<64x128xf32> -> vector<64x128xf32>
    %267 = arith.addf %258, %266 : vector<64x128xf32>
    %c1_i32_199 = arith.constant 1 : i32
    %268 = tpu.dynamic_rotate %253 by %c1_i32_199 dim 1 : vector<32x128xf32>, i32 -> vector<32x128xf32>
    %c1_200 = arith.constant 1 : index
    %c0_201 = arith.constant 0 : index
    %c0_202 = arith.constant 0 : index
    %269 = vector.load %arg4[%c1_200, %c0_201, %c0_202] : memref<4x32x128xf32, #tpu.memory_space<vmem>>, vector<1x32x128xf32>
    %270 = vector.shape_cast %269 : vector<1x32x128xf32> to vector<32x128xf32>
    %271 = arith.mulf %268, %270 : vector<32x128xf32>
    %272 = arith.truncf %271 : vector<32x128xf32> to vector<32x128xbf16>
    %c0_203 = arith.constant 0 : index
    %c16 = arith.constant 16 : index
    %c0_204 = arith.constant 0 : index
    %c0_205 = arith.constant 0 : index
    %273 = vector.load %arg7[%c0_203, %c16, %c0_204, %c0_205] : memref<1x20x64x32xbf16, #tpu.memory_space<vmem>>, vector<1x1x64x32xbf16>
    %274 = vector.shape_cast %273 : vector<1x1x64x32xbf16> to vector<64x32xbf16>
    %cst_206 = arith.constant dense<0.000000e+00> : vector<64x128xf32>
    %275 = tpu.matmul %274, %272, %cst_206 {dimension_numbers = #tpu.dot_dimension_numbers<[1], [0], [0], [1], [0, 0, 1, 1], [], []>} : vector<64x32xbf16>, vector<32x128xbf16>, vector<64x128xf32> -> vector<64x128xf32>
    %276 = arith.addf %267, %275 : vector<64x128xf32>
    %c0_207 = arith.constant 0 : index
    %c17 = arith.constant 17 : index
    %c0_208 = arith.constant 0 : index
    %c0_209 = arith.constant 0 : index
    %277 = vector.load %arg7[%c0_207, %c17, %c0_208, %c0_209] : memref<1x20x64x32xbf16, #tpu.memory_space<vmem>>, vector<1x1x64x32xbf16>
    %278 = vector.shape_cast %277 : vector<1x1x64x32xbf16> to vector<64x32xbf16>
    %cst_210 = arith.constant dense<0.000000e+00> : vector<64x128xf32>
    %279 = tpu.matmul %278, %256, %cst_210 {dimension_numbers = #tpu.dot_dimension_numbers<[1], [0], [0], [1], [0, 0, 1, 1], [], []>} : vector<64x32xbf16>, vector<32x128xbf16>, vector<64x128xf32> -> vector<64x128xf32>
    %280 = arith.addf %276, %279 : vector<64x128xf32>
    %c127_i32_211 = arith.constant 127 : i32
    %281 = tpu.dynamic_rotate %253 by %c127_i32_211 dim 1 : vector<32x128xf32>, i32 -> vector<32x128xf32>
    %c2_212 = arith.constant 2 : index
    %c0_213 = arith.constant 0 : index
    %c0_214 = arith.constant 0 : index
    %282 = vector.load %arg4[%c2_212, %c0_213, %c0_214] : memref<4x32x128xf32, #tpu.memory_space<vmem>>, vector<1x32x128xf32>
    %283 = vector.shape_cast %282 : vector<1x32x128xf32> to vector<32x128xf32>
    %284 = arith.mulf %281, %283 : vector<32x128xf32>
    %285 = arith.truncf %284 : vector<32x128xf32> to vector<32x128xbf16>
    %c0_215 = arith.constant 0 : index
    %c18 = arith.constant 18 : index
    %c0_216 = arith.constant 0 : index
    %c0_217 = arith.constant 0 : index
    %286 = vector.load %arg7[%c0_215, %c18, %c0_216, %c0_217] : memref<1x20x64x32xbf16, #tpu.memory_space<vmem>>, vector<1x1x64x32xbf16>
    %287 = vector.shape_cast %286 : vector<1x1x64x32xbf16> to vector<64x32xbf16>
    %cst_218 = arith.constant dense<0.000000e+00> : vector<64x128xf32>
    %288 = tpu.matmul %287, %285, %cst_218 {dimension_numbers = #tpu.dot_dimension_numbers<[1], [0], [0], [1], [0, 0, 1, 1], [], []>} : vector<64x32xbf16>, vector<32x128xbf16>, vector<64x128xf32> -> vector<64x128xf32>
    %289 = arith.addf %280, %288 : vector<64x128xf32>
    %c126_i32_219 = arith.constant 126 : i32
    %290 = tpu.dynamic_rotate %253 by %c126_i32_219 dim 1 : vector<32x128xf32>, i32 -> vector<32x128xf32>
    %c3_220 = arith.constant 3 : index
    %c0_221 = arith.constant 0 : index
    %c0_222 = arith.constant 0 : index
    %291 = vector.load %arg4[%c3_220, %c0_221, %c0_222] : memref<4x32x128xf32, #tpu.memory_space<vmem>>, vector<1x32x128xf32>
    %292 = vector.shape_cast %291 : vector<1x32x128xf32> to vector<32x128xf32>
    %293 = arith.mulf %290, %292 : vector<32x128xf32>
    %294 = arith.truncf %293 : vector<32x128xf32> to vector<32x128xbf16>
    %c0_223 = arith.constant 0 : index
    %c19 = arith.constant 19 : index
    %c0_224 = arith.constant 0 : index
    %c0_225 = arith.constant 0 : index
    %295 = vector.load %arg7[%c0_223, %c19, %c0_224, %c0_225] : memref<1x20x64x32xbf16, #tpu.memory_space<vmem>>, vector<1x1x64x32xbf16>
    %296 = vector.shape_cast %295 : vector<1x1x64x32xbf16> to vector<64x32xbf16>
    %cst_226 = arith.constant dense<0.000000e+00> : vector<64x128xf32>
    %297 = tpu.matmul %296, %294, %cst_226 {dimension_numbers = #tpu.dot_dimension_numbers<[1], [0], [0], [1], [0, 0, 1, 1], [], []>} : vector<64x32xbf16>, vector<32x128xbf16>, vector<64x128xf32> -> vector<64x128xf32>
    %298 = arith.addf %289, %297 : vector<64x128xf32>
    %299 = vector.extract_strided_slice %298 {offsets = [0, 0], sizes = [32, 128], strides = [1, 1]} : vector<64x128xf32> to vector<32x128xf32>
    %300 = math.tanh %299 : vector<32x128xf32>
    %301 = vector.extract_strided_slice %298 {offsets = [32, 0], sizes = [32, 128], strides = [1, 1]} : vector<64x128xf32> to vector<32x128xf32>
    %cst_227 = arith.constant 5.000000e-01 : f32
    %302 = vector.broadcast %cst_227 : f32 to vector<32x128xf32>
    %303 = arith.mulf %302, %301 : vector<32x128xf32>
    %304 = math.tanh %303 : vector<32x128xf32>
    %cst_228 = arith.constant 1.000000e+00 : f32
    %305 = vector.broadcast %cst_228 : f32 to vector<32x128xf32>
    %306 = arith.addf %304, %305 : vector<32x128xf32>
    %cst_229 = arith.constant 5.000000e-01 : f32
    %307 = vector.broadcast %cst_229 : f32 to vector<32x128xf32>
    %308 = arith.mulf %307, %306 : vector<32x128xf32>
    %309 = arith.mulf %300, %308 : vector<32x128xf32>
    %310 = arith.truncf %309 : vector<32x128xf32> to vector<32x128xbf16>
    %c0_230 = arith.constant 0 : index
    %c3_231 = arith.constant 3 : index
    %c0_232 = arith.constant 0 : index
    %c0_233 = arith.constant 0 : index
    %311 = vector.load %arg9[%c0_230, %c3_231, %c0_232, %c0_233] : memref<1x4x64x32xbf16, #tpu.memory_space<vmem>>, vector<1x1x32x32xbf16>
    %312 = vector.shape_cast %311 : vector<1x1x32x32xbf16> to vector<32x32xbf16>
    %cst_234 = arith.constant dense<0.000000e+00> : vector<32x128xf32>
    %313 = tpu.matmul %312, %310, %cst_234 {dimension_numbers = #tpu.dot_dimension_numbers<[1], [0], [0], [1], [0, 0, 1, 1], [], []>} : vector<32x32xbf16>, vector<32x128xbf16>, vector<32x128xf32> -> vector<32x128xf32>
    %c0_235 = arith.constant 0 : index
    %c3_236 = arith.constant 3 : index
    %c0_237 = arith.constant 0 : index
    %c0_238 = arith.constant 0 : index
    %314 = vector.load %arg10[%c0_235, %c3_236, %c0_237, %c0_238] : memref<1x4x64x128xf32, #tpu.memory_space<vmem>>, vector<1x1x32x128xf32>
    %315 = vector.shape_cast %314 : vector<1x1x32x128xf32> to vector<32x128xf32>
    %316 = arith.addf %313, %315 : vector<32x128xf32>
    %317 = arith.addf %255, %316 : vector<32x128xf32>
    %318 = vector.broadcast %3 : vector<1x128xf32> to vector<32x128xf32>
    %319 = arith.mulf %317, %318 : vector<32x128xf32>
    %c0_239 = arith.constant 0 : index
    %c0_240 = arith.constant 0 : index
    %c0_241 = arith.constant 0 : index
    %320 = vector.load %arg11[%c0_239, %c0_240, %c0_241] : memref<1x2x32xbf16, #tpu.memory_space<vmem>>, vector<1x2x32xbf16>
    %321 = vector.shape_cast %320 : vector<1x2x32xbf16> to vector<2x32xbf16>
    %322 = arith.truncf %319 : vector<32x128xf32> to vector<32x128xbf16>
    %cst_242 = arith.constant dense<0.000000e+00> : vector<2x128xf32>
    %323 = tpu.matmul %321, %322, %cst_242 {dimension_numbers = #tpu.dot_dimension_numbers<[1], [0], [0], [1], [0, 0, 1, 1], [], []>} : vector<2x32xbf16>, vector<32x128xbf16>, vector<2x128xf32> -> vector<2x128xf32>
    %c0_243 = arith.constant 0 : index
    %c0_244 = arith.constant 0 : index
    %c0_245 = arith.constant 0 : index
    %324 = vector.load %arg12[%c0_243, %c0_244, %c0_245] : memref<1x2x128xf32, #tpu.memory_space<vmem>>, vector<1x2x128xf32>
    %325 = vector.shape_cast %324 : vector<1x2x128xf32> to vector<2x128xf32>
    %326 = arith.addf %323, %325 : vector<2x128xf32>
    %327 = vector.broadcast %3 : vector<1x128xf32> to vector<2x128xf32>
    %328 = arith.mulf %326, %327 : vector<2x128xf32>
    %329 = arith.extui %27 : i1 to i32
    %c0_i32_246 = arith.constant 0 : i32
    %330 = arith.cmpi ne, %329, %c0_i32_246 : i32
    scf.if %330 {
      %333 = vector.broadcast %3 : vector<1x128xf32> to vector<2x128xf32>
      %334 = arith.mulf %5, %333 : vector<2x128xf32>
      %335 = arith.addf %328, %334 : vector<2x128xf32>
      %c0_248 = arith.constant 0 : index
      %c0_249 = arith.constant 0 : index
      %336 = vector.load %arg14[%c0_248, %c0_249] : memref<2x128xf32, #tpu.memory_space<vmem>>, vector<2x128xf32>
      tpu.vector_store %arg14[%c0_248, %c0_249], %335 {strides = array<i32>} : memref<2x128xf32, #tpu.memory_space<vmem>>, vector<2x128xf32>,
    } else {
    }
    %331 = arith.extui %38 : i1 to i32
    %c0_i32_247 = arith.constant 0 : i32
    %332 = arith.cmpi ne, %331, %c0_i32_247 : i32
    scf.if %332 {
      %333 = vector.broadcast %3 : vector<1x128xf32> to vector<2x128xf32>
      %334 = arith.mulf %4, %333 : vector<2x128xf32>
      %335 = arith.addf %328, %334 : vector<2x128xf32>
      %c0_248 = arith.constant 0 : index
      %c0_249 = arith.constant 0 : index
      %336 = vector.load %arg13[%c0_248, %c0_249] : memref<2x128xf32, #tpu.memory_space<vmem>>, vector<2x128xf32>
      tpu.vector_store %arg13[%c0_248, %c0_249], %335 {strides = array<i32>} : memref<2x128xf32, #tpu.memory_space<vmem>>, vector<2x128xf32>,
    } else {
    }
    return
  }
  func.func @transform_0(%arg0: i32) -> (i32, i32) {
    %c0_i32 = arith.constant 0 : i32
    %c0_i32_0 = arith.constant 0 : i32
    %c0_i32_1 = arith.constant 0 : i32
    return %c0_i32, %c0_i32_0 : i32, i32
  }
  func.func @transform_1(%arg0: i32) -> (i32, i32) {
    %c0_i32 = arith.constant 0 : i32
    %c0_i32_0 = arith.constant 0 : i32
    %c0_i32_1 = arith.constant 0 : i32
    return %c0_i32, %c0_i32_0 : i32, i32
  }
  func.func @transform_2(%arg0: i32) -> (i32, i32) {
    %c0_i32 = arith.constant 0 : i32
    %c0_i32_0 = arith.constant 0 : i32
    %c0_i32_1 = arith.constant 0 : i32
    return %c0_i32, %c0_i32_0 : i32, i32
  }
  func.func @transform_3(%arg0: i32) -> (i32, i32, i32) {
    %c0_i32 = arith.constant 0 : i32
    %c0_i32_0 = arith.constant 0 : i32
    %c0_i32_1 = arith.constant 0 : i32
    %c0_i32_2 = arith.constant 0 : i32
    return %c0_i32, %c0_i32_0, %c0_i32_1 : i32, i32, i32
  }
  func.func @transform_4(%arg0: i32) -> (i32, i32, i32) {
    %c0_i32 = arith.constant 0 : i32
    %c0_i32_0 = arith.constant 0 : i32
    %c0_i32_1 = arith.constant 0 : i32
    return %arg0, %c0_i32, %c0_i32_0 : i32, i32, i32
  }
  func.func @transform_5(%arg0: i32) -> (i32, i32, i32) {
    %c0_i32 = arith.constant 0 : i32
    %c0_i32_0 = arith.constant 0 : i32
    %c0_i32_1 = arith.constant 0 : i32
    return %arg0, %c0_i32, %c0_i32_0 : i32, i32, i32
  }
  func.func @transform_6(%arg0: i32) -> (i32, i32, i32, i32) {
    %c0_i32 = arith.constant 0 : i32
    %c0_i32_0 = arith.constant 0 : i32
    %c0_i32_1 = arith.constant 0 : i32
    %c0_i32_2 = arith.constant 0 : i32
    return %arg0, %c0_i32, %c0_i32_0, %c0_i32_1 : i32, i32, i32, i32
  }
  func.func @transform_7(%arg0: i32) -> (i32, i32, i32, i32) {
    %c0_i32 = arith.constant 0 : i32
    %c0_i32_0 = arith.constant 0 : i32
    %c0_i32_1 = arith.constant 0 : i32
    %c0_i32_2 = arith.constant 0 : i32
    return %arg0, %c0_i32, %c0_i32_0, %c0_i32_1 : i32, i32, i32, i32
  }
  func.func @transform_8(%arg0: i32) -> (i32, i32, i32, i32) {
    %c0_i32 = arith.constant 0 : i32
    %c0_i32_0 = arith.constant 0 : i32
    %c0_i32_1 = arith.constant 0 : i32
    %c0_i32_2 = arith.constant 0 : i32
    return %arg0, %c0_i32, %c0_i32_0, %c0_i32_1 : i32, i32, i32, i32
  }
  func.func @transform_9(%arg0: i32) -> (i32, i32, i32, i32) {
    %c0_i32 = arith.constant 0 : i32
    %c0_i32_0 = arith.constant 0 : i32
    %c0_i32_1 = arith.constant 0 : i32
    %c0_i32_2 = arith.constant 0 : i32
    return %arg0, %c0_i32, %c0_i32_0, %c0_i32_1 : i32, i32, i32, i32
  }
  func.func @transform_10(%arg0: i32) -> (i32, i32, i32) {
    %c0_i32 = arith.constant 0 : i32
    %c0_i32_0 = arith.constant 0 : i32
    %c0_i32_1 = arith.constant 0 : i32
    return %arg0, %c0_i32, %c0_i32_0 : i32, i32, i32
  }
  func.func @transform_11(%arg0: i32) -> (i32, i32, i32) {
    %c0_i32 = arith.constant 0 : i32
    %c0_i32_0 = arith.constant 0 : i32
    %c0_i32_1 = arith.constant 0 : i32
    return %arg0, %c0_i32, %c0_i32_0 : i32, i32, i32
  }
  func.func @transform_12(%arg0: i32) -> (i32, i32) {
    %c0_i32 = arith.constant 0 : i32
    %c0_i32_0 = arith.constant 0 : i32
    %c0_i32_1 = arith.constant 0 : i32
    return %c0_i32, %c0_i32_0 : i32, i32
  }
  func.func @transform_13(%arg0: i32) -> (i32, i32) {
    %c0_i32 = arith.constant 0 : i32
    %c0_i32_0 = arith.constant 0 : i32
    %c0_i32_1 = arith.constant 0 : i32
    return %c0_i32, %c0_i32_0 : i32, i32
  }
}

</mosaic_0001>

<bundles_post_ra>
// kernel: _lambda_.1
= control target key start
LH: loop header
LB: loop body
LE: loop exit
PB: predicated region body
PF: predicated region fallthrough
CT: control target
= control target key end

     0   :  { %s5159_s25 = smov 0   ;;  %s6015_s0 = inlined_call_operand.vmem [shape: f32[2,128], index: 0, kind: input, shape index: {}]   ;;  %s6016_s1 = inlined_call_operand.vmem [shape: f32[2,128], index: 1, kind: input, shape index: {}]   ;;  %s6017_s2 = inlined_call_operand.vmem [shape: f32[1,128], index: 2, kind: input, shape index: {}]   ;;  %s6018_s3 = inlined_call_operand.vmem [shape: f32[4,32,128], index: 3, kind: input, shape index: {}]   ;;  %s6019_s4 = inlined_call_operand.vmem [shape: bf16[4,32,2], index: 4, kind: input, shape index: {}]   ;;  %s6020_s5 = inlined_call_operand.vmem [shape: f32[4,32,128], index: 5, kind: input, shape index: {}]   ;;  %s6021_s6 = inlined_call_operand.vmem [shape: bf16[4,20,64,32], index: 6, kind: input, shape index: {}]   ;;  %s6022_s7 = inlined_call_operand.vmem [shape: f32[4,4,64,128], index: 7, kind: input, shape index: {}]   ;;  %s6023_s8 = inlined_call_operand.vmem [shape: bf16[4,4,64,32], index: 8, kind: input, shape index: {}]   ;;  %s6024_s9 = inlined_call_operand.vmem [shape: f32[4,4,64,128], index: 9, kind: input, shape index: {}]   ;;  %s6025_s10 = inlined_call_operand.vmem [shape: bf16[4,2,32], index: 10, kind: input, shape index: {}]   ;;  %s6026_s11 = inlined_call_operand.vmem [shape: f32[4,2,128], index: 11, kind: input, shape index: {}]   ;;  %s6027_s12 = inlined_call_operand.vmem [shape: f32[2,128], index: 12, kind: output, shape index: {0}]   ;;  %s6028_s13 = inlined_call_operand.vmem [shape: f32[2,128], index: 13, kind: output, shape index: {1}]  }
   0x1   :  { %6066 = sst [smem:[#allocation26_spill]] %s6017_s2 }
   0x2   :  { %6067 = sst [smem:[#allocation27_spill]] %s6018_s3 }
   0x3   :  { %6068 = sst [smem:[#allocation28_spill]] %s6019_s4 }
   0x4   :  { %6069 = sst [smem:[#allocation29_spill]] %s6020_s5 }
   0x5   :  { %6070 = sst [smem:[#allocation30_spill]] %s6022_s7 }
   0x6 LB: > { %6071 = sst [smem:[#allocation2_spill]] %s5081_s25  ;;  %s5165_s26 = sadd.s32 4294967295, %s5081_s25   ;;  %s5081_s25 = sphi %s5159_s25, %s24_s25  }
   0x7   : > { %p3987_p0 = scmp.ge.s32.totalorder %s5081_s25, 1  ;;  %p447_p1 = scmp.lt.s32.totalorder %s5081_s25, 5 }
   0x9   : > { %p448_p2 = pnand %p3987_p0, %p447_p1 }
   0xb   : > { %451 = sbr.rel (%p448_p2) target bundleno = 2890 (0xb4a), region = 68 }
  0x10   : > { %p518_p3 = scmp.lt.s32.totalorder %s5165_s26, 3  ;;  %s6072_s4 = sld [smem:[#allocation28_spill]] }
  0x11   : > { %s6073_s5 = sld [smem:[#allocation29_spill]]  ;;  %p4000_p4 = scmp.ne.s32.totalorder %s5165_s26, 0 }
  0x12   : > { %s5171_s27 = scalar_select %p518_p3, %s5165_s26, 3 }
  0x13   : > { %s6074_s7 = sld [smem:[#allocation30_spill]] }
  0x14   : > { %s4430_s28 = sshll.u32 %s5171_s27, 4  ;;  %s4431_s29 = sshll.u32 %s5171_s27, 5 }
  0x15   : > { %s4882_s19 = smul.u32 640, %s5171_s27  ;;  %s4432_s20 = sshll.u32 %s5171_s27, 8 }
  0x16   : > { %s5178_s15 = scalar_lea.vmem %s6072_s4, %s4430_s28  ;;  %s4433_s24 = sshll.u32 %s5171_s27, 7 }
  0x17   : > { %s5183_s18 = scalar_lea.vmem %s6073_s5, %s4431_s29  ;;  %s5196_s2 = scalar_lea.vmem %s6021_s6, %s4882_s19 }
  0x18   : > { %s5201_s14 = scalar_lea.vmem %s6023_s8, %s4433_s24  ;;  %s5206_s17 = scalar_lea.vmem %s6024_s9, %s4432_s20 }
  0x19   : > { %s5190_s23 = scalar_lea.vmem %s6074_s7, %s4432_s20  ;;  %s550_s22 = scalar_lea.vmem %s6025_s10, %s5171_s27 }
  0x1a   : > { %6075 = sst [smem:[#allocation3_spill]] %s5190_s23  ;;  %s3999_s5 = sshll.u32 %s5171_s27, 1 }
  0x1b   : > { %s5216_s3 = scalar_lea.vmem %s6026_s11, %s3999_s5  ;;  %559 = sbr.rel (%p4000_p4) target bundleno = 35 (0x23), region = 72 }
  0x20   : > { %v560_v0 = vld [vmem:[%s6015_s0] sm:$0x3] }
  0x21   : > { %v562_v1 = vld [vmem:[%s6016_s1] sm:$0x3]  ;;  %561 = vst [vmem:[%s6027_s12] sm:$0x3] %v560_v0 }
  0x22   : > { %563 = vst [vmem:[%s6028_s13] sm:$0x3] %v562_v1 }
  0x23 PF: > { %p567_p5 = scmp.lt.s32.totalorder %s5165_s26, 0  ;;  %s568_s5 = ssub.s32 0, %s5165_s26  ;;  %v4897_v2 = vld [vmem:[%s5178_s15] sm:$0xff]   ;;  %vm607_vm0 = vcmask 15360   ;;  %vm614_vm1 = vcmask 1040384   ;;  %v4898_v12 = vld [vmem:[%s5178_s15 + $0x8] sm:$0xff]  }
  0x24   : > { %s4001_s7 = smin.u32 %s5165_s26, %s568_s5  ;;  %4585 = vmatprep.mubr.msk.bf16.mxu0 %vm607_vm0, %v4897_v2  ;;  %v595_v13 = vld [vmem:[%s5183_s18 + $0x10] sm:$0xff]  ;;  %s6078_s29 = sld [smem:[#allocation26_spill]]  ;;  %v593_v16 = vld [vmem:[%s5183_s18] sm:$0xff]  ;;  %v596_v19 = vld [vmem:[%s5183_s18 + $0x18] sm:$0xff]  ;;  %vm733_vm2 = vcmask 261120   ;;  %vm5088_vm3 = vmmov 0  }
  0x25   : > { %s570_s23 = sand.u32 1, %s4001_s7   ;;  %v594_v23 = vld [vmem:[%s5183_s18 + $0x8] sm:$0xff]  ;;  %s5083_s15 = smov 2   ;;  %v4899_v26 = vld [vmem:[%s5196_s2] sm:$0xff]   ;;  %v4903_v59 = vld [vmem:[%s5196_s2 + $0x10] sm:$0xff]  }
  0x26   : > { %s571_s16 = ssub.s32 0, %s570_s23  ;;  %4593 = vmatprep.mubr.msk.bf16.mxu1 %vm733_vm2, %v4899_v26  ;;  %v4901_v31 = vld [vmem:[%s5196_s2 + $0x20] sm:$0xff]   ;;  %s5084_s18 = smov 1   ;;  %v4900_v57 = vld [vmem:[%s5196_s2 + $0x8] sm:$0xff]  }
  0x27   : > { %s6155_s16 = smov (!%p567_p5, %s571_s16), %s570_s23  ;;  %s5085_s5 = smov 127  }
  0x28   : > { %p4003_p6 = scmp.lt.s32.totalorder %s6155_s16, 0  ;;  %s577_s21 = sadd.s32 2, %s6155_s16  ;;  %v5246_v4 = vld [vmem:[%s6027_s12] sm:$0x3] }
  0x29   : > { %v5239_v3 = vld [vmem:[%s6028_s13] sm:$0x3]  ;;  %6077 = vst [vmem:[#allocation5_spill] sm:$0xff] %v5246_v4  ;;  %s5086_s7 = smov 126   ;;  %s6080_s25 = sld [smem:[#allocation27_spill]] }
  0x2a   : > { %6076 = vst [vmem:[#allocation4_spill] sm:$0xff] %v5239_v3  ;;  %s6157_s21 = smov (!%p4003_p6, %s577_s21), %s6155_s16  ;;  %v5257_v14 = vld [vmem:[%s6078_s29] ss:$0 sm:$0xff] }
  0x2b   : > { %s579_s26 = scvt.s32.f32 %s6157_s21  ;;  %6079 = vst [vmem:[#allocation6_spill] sm:$0xff] %v5257_v14  ;;  %p4426_p7 = scmp.ne.s32.totalorder %s6157_s21, 0 }
  0x2d   : > { %s582_s28 = ssub.f32 1.0, %s579_s26  ;;  %v585_v5 = vstv %s579_s26 }
  0x2e   : > { %v586_v6 = vmul.f32 %v585_v5, %v5239_v3 }
  0x2f   : > { %v583_v7 = vstv %s582_s28  ;;  %s6081_s19 = smov %s6080_s25  ;;  %v5313_v33 = vld [vmem:[%s6080_s25 + $0x10] sm:$0xff]  ;;  %s6096_s28 = sld [smem:[#allocation3_spill]] }
  0x30   : > { %v584_v8 = vmul.f32 %v583_v7, %v5246_v4  ;;  %v5318_v35 = vld [vmem:[%s6081_s19 + $0x18] sm:$0xff]  ;;  %v5323_v36 = vld [vmem:[%s6081_s19] sm:$0xff]  ;;  %v5328_v38 = vld [vmem:[%s6081_s19 + $0x8] sm:$0xff] }
  0x31   : > { %6082 = vst [vmem:[#allocation7_spill] sm:$0xff] %v5323_v36  ;;  %6083 = vst [vmem:[#allocation8_spill] sm:$0xff] %v5328_v38  ;;  %v5337_v45 = vld [vmem:[%s6081_s19 + $0x30] sm:$0xff]  ;;  %v5342_v47 = vld [vmem:[%s6081_s19 + $0x38] sm:$0xff] }
  0x32   : > { %v587_v9 = vadd.f32 %v586_v6, %v584_v8  ;;  %6084 = vst [vmem:[#allocation9_spill] sm:$0xff] %v5337_v45  ;;  %6085 = vst [vmem:[#allocation10_spill] sm:$0xff] %v5342_v47  ;;  %v5349_v52 = vld [vmem:[%s6081_s19 + $0x20] sm:$0xff]  ;;  %v5354_v54 = vld [vmem:[%s6081_s19 + $0x28] sm:$0xff] }
  0x33   : > { %6086 = vst [vmem:[#allocation11_spill] sm:$0xff] %v5349_v52  ;;  %6087 = vst [vmem:[#allocation12_spill] sm:$0xff] %v5354_v54  ;;  %v5365_v62 = vld [vmem:[%s6081_s19 + $0x50] sm:$0xff]  ;;  %v5370_v0 = vld [vmem:[%s6081_s19 + $0x58] sm:$0xff] }
  0x34   : > { %v592_v10 = vpack.c.bf16 %v587_v9, %v587_v9  ;;  %6088 = vst [vmem:[#allocation13_spill] sm:$0xff] %v5365_v62  ;;  %6089 = vst [vmem:[#allocation14_spill] sm:$0xff] %v5370_v0  ;;  %v4902_v8 = vld [vmem:[%s5196_s2 + $0x28] sm:$0xff]   ;;  %v5382_v9 = vld [vmem:[%s6081_s19 + $0x70] sm:$0xff] }
  0x35   : > { %6090 = vst [vmem:[#allocation15_spill] sm:$0xff] %v5382_v9  ;;  %v682_v4 = vld [vmem:[%s6096_s28 + $0x18] sm:$0xff] }
  0x36   : > { %4881 = vmatprep.subr.msk.bf16.mxu0 %vm614_vm1, %v592_v10  ;;  %v616_v11 = vsel %vm614_vm1, %v592_v10, 0 }
  0x37   : > { %4584 = vmatpush3.bf16.msra.mxu0 %v616_v11  ;;  %v5387_v11 = vld [vmem:[%s6081_s19 + $0x78] sm:$0xff] }
  0x38   : > { %6091 = vst [vmem:[#allocation16_spill] sm:$0xff] %v5387_v11 }
  0x3a   : > { %4586 = vmatmul.mubr.msk.bf16.vlgmr.msra.gmra.mxu0 %vm607_vm0, %v4898_v12  ;;  %v4905_v12 = vld [vmem:[%s5196_s2 + $0x30] sm:$0xff]  }
  0x3b   : > { %4605 = vmatprep.mubr.msk.bf16.mxu0 %vm733_vm2, %v4901_v31  ;;  %v4906_v31 = vld [vmem:[%s5196_s2 + $0x38] sm:$0xff]  }
  0xfa   : > { %v4587_v15 = vpop.f32.mrf.mxu0 }
  0xfb   : > { %v661_v17 = vadd.f32 %v4587_v15, %v595_v13  ;;  %v4904_v15 = vld [vmem:[%s5196_s2 + $0x18] sm:$0xff]  }
  0xfc   : > { %v652_v18 = vpop.f32.mrf.mxu0 }
  0xfd   : > { %v5262_v20 = vmul.f32 %v5257_v14, %v661_v17  ;;  %v653_v21 = vadd.f32 %v652_v18, %v593_v16  ;;  %v4907_v17 = vld [vmem:[%s5196_s2 + $0x40] sm:$0xff]  }
  0xfe   : > { %v4588_v22 = vpop.f32.mrf.mxu0 }
  0xff   : > { %v5266_v24 = vmul.f32 %v5257_v14, %v653_v21  ;;  %v664_v25 = vadd.f32 %v4588_v22, %v596_v19  ;;  %691 = vrot.lane.b32.xlu0 %v5262_v20, %s5083_s15  ;;  %v5398_v21 = vld [vmem:[%s6081_s19 + $0x40] sm:$0xff] }
 0x100   : > { %v655_v27 = vpop.f32.mrf.mxu0  ;;  %6092 = vst [vmem:[#allocation17_spill] sm:$0xff] %v5398_v21 }
 0x101   : > { %v5272_v28 = vmul.f32 %v5257_v14, %v664_v25  ;;  %v656_v29 = vadd.f32 %v655_v27, %v594_v23  ;;  %687 = vrot.lane.b32.xlu1 %v5266_v24, %s5083_s15  ;;  %v5403_v23 = vld [vmem:[%s6081_s19 + $0x48] sm:$0xff] }
 0x102   : > { %6093 = vst [vmem:[#allocation18_spill] sm:$0xff] %v5403_v23 }
 0x103   : > { %v5278_v30 = vmul.f32 %v5257_v14, %v656_v29  ;;  %693 = vrot.lane.b32.xlu0 %v5272_v28, %s5083_s15  ;;  %v678_v56 = vpack.c.bf16 %v5272_v28, %v5262_v20 }
 0x105   : > { %689 = vrot.lane.b32.xlu1 %v5278_v30, %s5083_s15  ;;  %v677_v2 = vpack.c.bf16 %v5278_v30, %v5266_v24 }
 0x107   : > { %823 = vrot.lane.b32.xlu0 %v5262_v20, %s5084_s18 }
 0x109   : > { %825 = vrot.lane.b32.xlu1 %v5272_v28, %s5084_s18 }
 0x10b   : > { %819 = vrot.lane.b32.xlu0 %v5266_v24, %s5084_s18 }
 0x10d   : > { %821 = vrot.lane.b32.xlu1 %v5278_v30, %s5084_s18 }
 0x10f   : > { %1070 = vrot.lane.b32.xlu0 %v5262_v20, %s5085_s5 }
 0x111   : > { %1072 = vrot.lane.b32.xlu1 %v5272_v28, %s5085_s5 }
 0x113   : > { %1203 = vrot.lane.b32.xlu0 %v5262_v20, %s5086_s7 }
 0x115   : > { %1205 = vrot.lane.b32.xlu1 %v5272_v28, %s5086_s7 }
 0x117   : > { %1066 = vrot.lane.b32.xlu0 %v5266_v24, %s5085_s5 }
 0x119   : > { %1068 = vrot.lane.b32.xlu1 %v5278_v30, %s5085_s5 }
 0x11b   : > { %1199 = vrot.lane.b32.xlu0 %v5266_v24, %s5086_s7 }
 0x11d   : > { %1201 = vrot.lane.b32.xlu1 %v5278_v30, %s5086_s7 }
 0x171   : > { %v692_v32 = vpop.permute.xlu0 %691 }
 0x172   : > { %v701_v39 = vmul.f32 %v5313_v33, %v692_v32  ;;  %v5414_v32 = vld [vmem:[%s6081_s19 + $0x60] sm:$0xff] }
 0x173   : > { %v688_v34 = vpop.permute.xlu1 %687  ;;  %6094 = vst [vmem:[#allocation19_spill] sm:$0xff] %v5414_v32 }
 0x174   : > { %v699_v42 = vmul.f32 %v5323_v36, %v688_v34 }
 0x175   : > { %v694_v37 = vpop.permute.xlu0 %693 }
 0x176   : > { %v702_v40 = vmul.f32 %v5318_v35, %v694_v37  ;;  %v5419_v37 = vld [vmem:[%s6081_s19 + $0x68] sm:$0xff] }
 0x177   : > { %v690_v41 = vpop.permute.xlu1 %689  ;;  %6095 = vst [vmem:[#allocation20_spill] sm:$0xff] %v5419_v37 }
 0x178   : > { %v700_v43 = vmul.f32 %v5328_v38, %v690_v41  ;;  %v704_v44 = vpack.c.bf16 %v702_v40, %v701_v39  ;;  %v4909_v39 = vld [vmem:[%s5196_s2 + $0x60] sm:$0xff]   ;;  %v4908_v41 = vld [vmem:[%s5196_s2 + $0x48] sm:$0xff]  }
 0x179   : > { %v824_v46 = vpop.permute.xlu0 %823 }
 0x17a   : > { %v703_v48 = vpack.c.bf16 %v700_v43, %v699_v42  ;;  %4589 = vmatprep.subr.bf16.mxu1 %v704_v44  ;;  %v834_v50 = vmul.f32 %v5337_v45, %v824_v46  ;;  %v4911_v43 = vld [vmem:[%s5196_s2 + $0x50] sm:$0xff]  }
 0x17b   : > { %4590 = vmatpush3.bf16.msra.mxu1 %v704_v44  ;;  %v826_v49 = vpop.permute.xlu1 %825 }
 0x17c   : > { %v835_v51 = vmul.f32 %v5342_v47, %v826_v49  ;;  %4591 = vmatprep.subr.bf16.mxu1 %v703_v48  ;;  %v4910_v49 = vld [vmem:[%s5196_s2 + $0x68] sm:$0xff]  }
 0x17d   : > { %v820_v53 = vpop.permute.xlu0 %819 }
 0x17e   : > { %v837_v55 = vpack.c.bf16 %v835_v51, %v834_v50  ;;  %v832_v60 = vmul.f32 %v5349_v52, %v820_v53  ;;  %v4913_v50 = vld [vmem:[%s5196_s2 + $0x70] sm:$0xff]   ;;  %v4912_v51 = vld [vmem:[%s5196_s2 + $0x58] sm:$0xff]   ;;  %v4915_v53 = vld [vmem:[%s5196_s2 + $0x80] sm:$0xff]  }
 0x17f   : > { %4592 = vmatpush3.bf16.msra.mxu1 %v703_v48  ;;  %v822_v58 = vpop.permute.xlu1 %821 }
 0x180   : > { %v833_v61 = vmul.f32 %v5354_v54, %v822_v58  ;;  %4601 = vmatprep.subr.bf16.mxu0 %v837_v55  ;;  %4613 = vmatprep.subr.bf16.mxu1 %v678_v56  ;;  %v4918_v58 = vld [vmem:[%s5196_s2 + $0x98] sm:$0xff]  }
 0x181   : > { %v1071_v63 = vpop.permute.xlu0 %1070  ;;  %4602 = vmatpush3.bf16.msra.mxu0 %v837_v55  ;;  %v4914_v55 = vld [vmem:[%s5196_s2 + $0x78] sm:$0xff]  }
 0x182   : > { %v836_v1 = vpack.c.bf16 %v833_v61, %v832_v60  ;;  %4594 = vmatmul.mubr.msk.bf16.vlgmr.msra.gmra.mxu1 %vm733_vm2, %v4900_v57  ;;  %v1081_v6 = vmul.f32 %v5365_v62, %v1071_v63  ;;  %v4917_v57 = vld [vmem:[%s5196_s2 + $0x90] sm:$0xff]  }
 0x183   : > { %4614 = vmatpush3.bf16.msra.mxu1 %v678_v56  ;;  %v1073_v5 = vpop.permute.xlu1 %1072  ;;  %4597 = vmatprep.mubr.msk.bf16.mxu1 %vm733_vm2, %v4903_v59  ;;  %v4916_v56 = vld [vmem:[%s5196_s2 + $0x88] sm:$0xff]   ;;  %v4919_v59 = vld [vmem:[%s5201_s14] sm:$0xff]  }
 0x184   : > { %v1082_v7 = vmul.f32 %v5370_v0, %v1073_v5  ;;  %4603 = vmatprep.subr.bf16.mxu0 %v836_v1  ;;  %4615 = vmatprep.subr.bf16.mxu1 %v677_v2 }
 0x185   : > { %v1204_v10 = vpop.permute.xlu0 %1203  ;;  %4604 = vmatpush3.bf16.msra.mxu0 %v836_v1 }
 0x186   : > { %v1084_v13 = vpack.c.bf16 %v1082_v7, %v1081_v6  ;;  %v1214_v18 = vmul.f32 %v5382_v9, %v1204_v10  ;;  %v680_v9 = vld [vmem:[%s6096_s28 + $0x8] sm:$0xff] }
 0x187   : > { %v1206_v16 = vpop.permute.xlu1 %1205  ;;  %4616 = vmatpush3.bf16.msra.mxu1 %v677_v2 }
 0x188   : > { %v1215_v19 = vmul.f32 %v5387_v11, %v1206_v16  ;;  %4606 = vmatmul.mubr.msk.bf16.vlgmr.msra.gmra.mxu0 %vm733_vm2, %v4902_v8  ;;  %4625 = vmatprep.subr.bf16.mxu0 %v1084_v13  ;;  %v679_v11 = vld [vmem:[%s6096_s28] sm:$0xff] }
 0x189   : > { %v1067_v22 = vpop.permute.xlu0 %1066  ;;  %4626 = vmatpush3.bf16.msra.mxu0 %v1084_v13  ;;  %4609 = vmatprep.mubr.msk.bf16.mxu0 %vm733_vm2, %v4905_v12 }
 0x18a   : > { %v1217_v25 = vpack.c.bf16 %v1215_v19, %v1214_v18  ;;  %4598 = vmatmul.mubr.msk.bf16.gmra.mxu1 %vm733_vm2, %v4904_v15  ;;  %v1079_v27 = vmul.f32 %v5398_v21, %v1067_v22 }
 0x18b   : > { %v1069_v26 = vpop.permute.xlu1 %1068  ;;  %4617 = vmatprep.mubr.msk.bf16.mxu1 %vm733_vm2, %v4907_v17 }
 0x18c   : > { %v1080_v29 = vmul.f32 %v5403_v23, %v1069_v26  ;;  %4637 = vmatprep.subr.bf16.mxu1 %v1217_v25 }
 0x18d   : > { %v1200_v34 = vpop.permute.xlu0 %1199 }
 0x18e   : > { %v1083_v40 = vpack.c.bf16 %v1080_v29, %v1079_v27  ;;  %v1212_v44 = vmul.f32 %v5414_v32, %v1200_v34 }
 0x18f   : > { %v1202_v42 = vpop.permute.xlu1 %1201 }
 0x190   : > { %v1213_v46 = vmul.f32 %v5419_v37, %v1202_v42  ;;  %4610 = vmatmul.mubr.msk.bf16.gmra.mxu0 %vm733_vm2, %v4906_v31  ;;  %4627 = vmatprep.subr.bf16.mxu0 %v1083_v40  ;;  %v685_v42 = vld [vmem:[%s6096_s28 + $0x30] sm:$0xff] }
 0x191   : > { %4628 = vmatpush3.bf16.msra.mxu0 %v1083_v40  ;;  %4629 = vmatprep.mubr.msk.bf16.mxu0 %vm733_vm2, %v4909_v39 }
 0x192   : > { %v1216_v48 = vpack.c.bf16 %v1213_v46, %v1212_v44  ;;  %4618 = vmatmul.mubr.msk.bf16.vlgmr.msra.gmra.mxu1 %vm733_vm2, %v4908_v41  ;;  %v683_v46 = vld [vmem:[%s6096_s28 + $0x20] sm:$0xff] }
 0x193   : > { %4638 = vmatpush3.bf16.msra.mxu1 %v1217_v25  ;;  %4621 = vmatprep.mubr.msk.bf16.mxu1 %vm733_vm2, %v4911_v43 }
 0x194   : > { %4639 = vmatprep.subr.bf16.mxu1 %v1216_v48 }
 0x197   : > { %4640 = vmatpush3.bf16.msra.mxu1 %v1216_v48 }
 0x198   : > { %4630 = vmatmul.mubr.msk.bf16.vlgmr.msra.gmra.mxu0 %vm733_vm2, %v4910_v49 }
 0x199   : > { %4633 = vmatprep.mubr.msk.bf16.mxu0 %vm733_vm2, %v4913_v50  ;;  %v686_v50 = vld [vmem:[%s6096_s28 + $0x38] sm:$0xff] }
 0x19a   : > { %4622 = vmatmul.mubr.msk.bf16.gmra.mxu1 %vm733_vm2, %v4912_v51 }
 0x19b   : > { %4641 = vmatprep.mubr.msk.bf16.mxu1 %vm733_vm2, %v4915_v53 }
 0x1a0   : > { %4634 = vmatmul.mubr.msk.bf16.gmra.mxu0 %vm733_vm2, %v4914_v55 }
 0x1a1   : > { %4653 = vmatprep.mubr.msk.bf16.mxu0 %vm733_vm2, %v4919_v59  ;;  %v681_v59 = vld [vmem:[%s6096_s28 + $0x10] sm:$0xff] }
 0x1a2   : > { %4642 = vmatmul.mubr.msk.bf16.vlgmr.msra.gmra.mxu1 %vm733_vm2, %v4916_v56 }
 0x1a3   : > { %4645 = vmatprep.mubr.msk.bf16.mxu1 %vm733_vm2, %v4917_v57  ;;  %v684_v57 = vld [vmem:[%s6096_s28 + $0x28] sm:$0xff] }
 0x1aa   : > { %4646 = vmatmul.mubr.msk.bf16.gmra.mxu1 %vm733_vm2, %v4918_v58 }
 0x242   : > { %v4595_v60 = vpop.f32.mrf.mxu1 }
 0x243   : > { %v813_v54 = vadd.f32 %v4595_v60, %v681_v59 }
 0x244   : > { %v780_v61 = vpop.f32.mrf.mxu1 }
 0x245   : > { %v811_v45 = vadd.f32 %v780_v61, %v679_v11 }
 0x246   : > { %v4596_v63 = vpop.f32.mrf.mxu1 }
 0x247   : > { %v814_v52 = vadd.f32 %v4596_v63, %v682_v4 }
 0x248   : > { %v783_v1 = vpop.f32.mrf.mxu1  ;;  %v4607_v2 = vpop.f32.mrf.mxu0 }
 0x249   : > { %v812_v38 = vadd.f32 %v783_v1, %v680_v9 }
 0x24a   : > { %v4599_v5 = vpop.f32.mrf.mxu1  ;;  %v5448_v6 = vpop.f32.mrf.mxu0 }
 0x24b   : > { %v817_v49 = vadd.f32 %v4599_v5, %v685_v42 }
 0x24c   : > { %v796_v7 = vpop.f32.mrf.mxu1  ;;  %v4608_v8 = vpop.f32.mrf.mxu0 }
 0x24d   : > { %v815_v55 = vadd.f32 %v796_v7, %v683_v46 }
 0x24e   : > { %v4600_v10 = vpop.f32.mrf.mxu1  ;;  %v916_v12 = vpop.f32.mrf.mxu0 }
 0x24f   : > { %v818_v3 = vadd.f32 %v4600_v10, %v686_v50  ;;  %v946_v10 = vadd.f32 %v4607_v2, %v813_v54 }
 0x250   : > { %v799_v13 = vpop.f32.mrf.mxu1  ;;  %v4611_v15 = vpop.f32.mrf.mxu0 }
 0x251   : > { %v950_v56 = vadd.f32 %v4611_v15, %v817_v49  ;;  %v816_v0 = vadd.f32 %v799_v13, %v684_v57 }
 0x252   : > { %v929_v16 = vpop.f32.mrf.mxu0  ;;  %v4619_v17 = vpop.f32.mrf.mxu1 }
 0x253   : > { %v948_v37 = vadd.f32 %v929_v16, %v815_v55  ;;  %v947_v16 = vadd.f32 %v4608_v8, %v814_v52 }
 0x254   : > { %v4612_v18 = vpop.f32.mrf.mxu0  ;;  %v5450_v19 = vpop.f32.mrf.mxu1 }
 0x255   : > { %v951_v62 = vadd.f32 %v4612_v18, %v818_v3  ;;  %v944_v3 = vadd.f32 %v5448_v6, %v811_v45 }
 0x256   : > { %v932_v22 = vpop.f32.mrf.mxu0  ;;  %v4620_v25 = vpop.f32.mrf.mxu1 }
 0x257   : > { %v949_v7 = vadd.f32 %v932_v22, %v816_v0  ;;  %v1061_v4 = vadd.f32 %v4620_v25, %v947_v16  ;;  %v1058_v9 = vadd.f32 %v5450_v19, %v944_v3 }
 0x258   : > { %v1030_v26 = vpop.f32.mrf.mxu1  ;;  %v4631_v27 = vpop.f32.mrf.mxu0 }
 0x25a   : > { %v4623_v29 = vpop.f32.mrf.mxu1  ;;  %v5452_v31 = vpop.f32.mrf.mxu0 }
 0x25b   : > { %v1064_v32 = vadd.f32 %v4623_v29, %v950_v56  ;;  %v1191_v1 = vadd.f32 %v5452_v31, %v1058_v9 }
 0x25c   : > { %v1043_v34 = vpop.f32.mrf.mxu1  ;;  %v4632_v39 = vpop.f32.mrf.mxu0 }
 0x25d   : > { %v1062_v5 = vadd.f32 %v1043_v34, %v948_v37  ;;  %v1060_v37 = vadd.f32 %v4619_v17, %v946_v10  ;;  %v1194_v61 = vadd.f32 %v4632_v39, %v1061_v4  ;;  %v1369_v10 = vld [vmem:[%s5206_s17 + $0x18] sm:$0xff] }
 0x25e   : > { %v4624_v40 = vpop.f32.mrf.mxu1  ;;  %v5454_v41 = vpop.f32.mrf.mxu0 }
 0x25f   : > { %v1065_v15 = vadd.f32 %v4624_v40, %v951_v62  ;;  %v1193_v52 = vadd.f32 %v4631_v27, %v1060_v37 }
 0x260   : > { %v1046_v43 = vpop.f32.mrf.mxu1  ;;  %v4635_v44 = vpop.f32.mrf.mxu0 }
 0x261   : > { %v1197_v42 = vadd.f32 %v4635_v44, %v1064_v32  ;;  %v1063_v55 = vadd.f32 %v1046_v43, %v949_v7  ;;  %v945_v32 = vadd.f32 %v916_v12, %v812_v38 }
 0x262   : > { %v4643_v48 = vpop.f32.mrf.mxu1  ;;  %v1176_v51 = vpop.f32.mrf.mxu0 }
 0x263   : > { %v1195_v46 = vadd.f32 %v1176_v51, %v1062_v5  ;;  %v1059_v54 = vadd.f32 %v1030_v26, %v945_v32  ;;  %v1326_v45 = vadd.f32 %v4643_v48, %v1193_v52  ;;  %v4920_v5 = vld [vmem:[%s5201_s14 + $0x8] sm:$0xff]  }
 0x264   : > { %v1293_v53 = vpop.f32.mrf.mxu1  ;;  %v4636_v23 = vpop.f32.mrf.mxu0 }
 0x265   : > { %v1198_v56 = vadd.f32 %v4636_v23, %v1065_v15  ;;  %v1192_v38 = vadd.f32 %v5454_v41, %v1059_v54  ;;  %v1366_v15 = vld [vmem:[%s5206_s17] sm:$0xff] }
 0x266   : > { %v4644_v58 = vpop.f32.mrf.mxu1  ;;  %v1179_v29 = vpop.f32.mrf.mxu0 }
 0x267   : > { %v1196_v0 = vadd.f32 %v1179_v29, %v1063_v55  ;;  %v1327_v2 = vadd.f32 %v4644_v58, %v1194_v61  ;;  %v1367_v55 = vld [vmem:[%s5206_s17 + $0x8] sm:$0xff] }
 0x268   : > { %v1296_v21 = vpop.f32.mrf.mxu1 }
 0x269   : > { %v1325_v8 = vadd.f32 %v1296_v21, %v1192_v38 }
 0x26a   : > { %v4647_v47 = vpop.f32.mrf.mxu1 }
 0x26b   : > { %v1330_v49 = vadd.f32 %v4647_v47, %v1197_v42  ;;  %v1368_v42 = vld [vmem:[%s5206_s17 + $0x10] sm:$0xff] }
 0x26c   : > { %v1309_v50 = vpop.f32.mrf.mxu1 }
 0x26d   : > { %v1338_v36 = vmul.f32 0.5, %v1330_v49  ;;  %v1328_v13 = vadd.f32 %v1309_v50, %v1195_v46 }
 0x26e   : > { %v4648_v60 = vpop.f32.mrf.mxu1 }
 0x26f   : > { %4993 = vtanh.f32 %v1338_v36  ;;  %v1336_v62 = vmul.f32 0.5, %v1328_v13  ;;  %v1331_v47 = vadd.f32 %v4648_v60, %v1198_v56  ;;  %v1324_v36 = vadd.f32 %v1293_v53, %v1191_v1  ;;  %v4921_v60 = vld [vmem:[%s5201_s14 + $0x10] sm:$0xff]  }
 0x270   : > { %v1312_v11 = vpop.f32.mrf.mxu1 }
 0x271   : > { %4995 = vtanh.f32 %v1336_v62  ;;  %v1339_v23 = vmul.f32 0.5, %v1331_v47  ;;  %v1329_v63 = vadd.f32 %v1312_v11, %v1196_v0 }
 0x273   : > { %4997 = vtanh.f32 %v1339_v23  ;;  %v1337_v6 = vmul.f32 0.5, %v1329_v63 }
 0x275   : > { %4999 = vtanh.f32 %v1337_v6 }
 0x276   : > { %5001 = vtanh.f32 %v1326_v45  ;;  %v6097_v45 = vld [vmem:[#allocation7_spill] sm:$0xff] }
 0x277   : > { %5003 = vtanh.f32 %v1327_v2  ;;  %v6098_v2 = vld [vmem:[#allocation8_spill] sm:$0xff] }
 0x278   : > { %5005 = vtanh.f32 %v1324_v36 }
 0x279   : > { %5007 = vtanh.f32 %v1325_v8 }
 0x27c   : > { %v4994_v12 = vpop.eup %4993 }
 0x27d   : > { %v1346_v17 = vadd.f32 1.0, %v4994_v12 }
 0x27e   : > { %v4996_v18 = vpop.eup %4995 }
 0x27f   : > { %v1344_v19 = vadd.f32 1.0, %v4996_v18  ;;  %v1350_v25 = vmul.f32 0.5, %v1346_v17  ;;  %v6099_v17 = vld [vmem:[#allocation9_spill] sm:$0xff] }
 0x280   : > { %v4998_v22 = vpop.eup %4997 }
 0x281   : > { %v1347_v26 = vadd.f32 1.0, %v4998_v22  ;;  %v1348_v34 = vmul.f32 0.5, %v1344_v19  ;;  %v6100_v19 = vld [vmem:[#allocation10_spill] sm:$0xff]  ;;  %v4924_v22 = vld [vmem:[%s5196_s2 + $0xa8] sm:$0xff]  }
 0x282   : > { %v5000_v27 = vpop.eup %4999 }
 0x283   : > { %v5002_v31 = vpop.eup %5001  ;;  %v1351_v39 = vmul.f32 0.5, %v1347_v26  ;;  %v1345_v40 = vadd.f32 1.0, %v5000_v27  ;;  %v4926_v26 = vld [vmem:[%s5196_s2 + $0xb0] sm:$0xff]  }
 0x284   : > { %v5004_v41 = vpop.eup %5003  ;;  %v1354_v44 = vmul.f32 %v5002_v31, %v1350_v25 }
 0x285   : > { %v5006_v21 = vpop.eup %5005  ;;  %v1349_v43 = vmul.f32 0.5, %v1345_v40  ;;  %v1355_v48 = vmul.f32 %v5004_v41, %v1351_v39  ;;  %v6102_v40 = vld [vmem:[#allocation12_spill] sm:$0xff] }
 0x286   : > { %v5008_v51 = vpop.eup %5007  ;;  %v1352_v57 = vmul.f32 %v5006_v21, %v1348_v34  ;;  %v6101_v34 = vld [vmem:[#allocation11_spill] sm:$0xff] }
 0x287   : > { %v1357_v53 = vpack.c.bf16 %v1355_v48, %v1354_v44  ;;  %v1353_v58 = vmul.f32 %v5008_v51, %v1349_v43  ;;  %v6103_v51 = vld [vmem:[#allocation13_spill] sm:$0xff] }
 0x289   : > { %4649 = vmatprep.subr.bf16.mxu0 %v1357_v53  ;;  %v1356_v59 = vpack.c.bf16 %v1353_v58, %v1352_v57  ;;  %v6104_v57 = vld [vmem:[#allocation14_spill] sm:$0xff] }
 0x28a   : > { %4650 = vmatpush3.bf16.msra.mxu0 %v1357_v53 }
 0x28b   : > { %4651 = vmatprep.subr.bf16.mxu0 %v1356_v59 }
 0x28e   : > { %4652 = vmatpush3.bf16.msra.mxu0 %v1356_v59  ;;  %v4927_v59 = vld [vmem:[%s5196_s2 + $0xb8] sm:$0xff]  }
 0x291   : > { %4654 = vmatmul.mubr.msk.bf16.vlgmr.msra.gmra.mxu0 %vm733_vm2, %v4920_v5  ;;  %v4928_v5 = vld [vmem:[%s5196_s2 + $0xc8] sm:$0xff]  }
 0x292   : > { %4657 = vmatprep.mubr.msk.bf16.mxu0 %vm733_vm2, %v4921_v60  ;;  %v4931_v60 = vld [vmem:[%s5196_s2 + $0xd8] sm:$0xff]  }
 0x351   : > { %v4655_v7 = vpop.f32.mrf.mxu0 }
 0x352   : > { %v1449_v46 = vadd.f32 %v4655_v7, %v1368_v42  ;;  %v4929_v42 = vld [vmem:[%s5196_s2 + $0xd0] sm:$0xff]  }
 0x353   : > { %v1440_v49 = vpop.f32.mrf.mxu0 }
 0x354   : > { %v1473_v16 = vadd.f32 %v1449_v46, %v5262_v20  ;;  %v1441_v29 = vadd.f32 %v1440_v49, %v1366_v15  ;;  %v4922_v20 = vld [vmem:[%s5196_s2 + $0xa0] sm:$0xff]  }
 0x355   : > { %v4656_v50 = vpop.f32.mrf.mxu0  ;;  %4665 = vmatprep.mubr.msk.bf16.mxu1 %vm733_vm2, %v4922_v20  ;;  %v4930_v15 = vld [vmem:[%s5196_s2 + $0xe0] sm:$0xff]   ;;  %v4932_v20 = vld [vmem:[%s5196_s2 + $0xe8] sm:$0xff]  }
 0x356   : > { %v5476_v56 = vmul.f32 %v5257_v14, %v1473_v16  ;;  %v1471_v13 = vadd.f32 %v1441_v29, %v5266_v24  ;;  %v1452_v3 = vadd.f32 %v4656_v50, %v1369_v10  ;;  %v4923_v24 = vld [vmem:[%s5201_s14 + $0x18] sm:$0xff]   ;;  %v6106_v29 = vld [vmem:[#allocation16_spill] sm:$0xff] }
 0x357   : > { %v1443_v32 = vpop.f32.mrf.mxu0  ;;  %4658 = vmatmul.mubr.msk.bf16.gmra.mxu0 %vm733_vm2, %v4923_v24  ;;  %v6105_v10 = vld [vmem:[#allocation15_spill] sm:$0xff] }
 0x358   : > { %v1474_v37 = vadd.f32 %v1452_v3, %v5272_v28  ;;  %v1444_v4 = vadd.f32 %v1443_v32, %v1367_v55  ;;  %1498 = vrot.lane.b32.xlu0 %v5476_v56, %s5083_s15  ;;  %v5485_v0 = vmul.f32 %v5257_v14, %v1471_v13  ;;  %v6107_v3 = vld [vmem:[#allocation17_spill] sm:$0xff] }
 0x35a   : > { %v5488_v62 = vmul.f32 %v5257_v14, %v1474_v37  ;;  %v1472_v47 = vadd.f32 %v1444_v4, %v5278_v30  ;;  %v4925_v30 = vld [vmem:[%s5196_s2 + $0xc0] sm:$0xff]   ;;  %v6108_v37 = vld [vmem:[#allocation18_spill] sm:$0xff] }
 0x35b   : > { %4677 = vmatprep.mubr.msk.bf16.mxu0 %vm733_vm2, %v4925_v30  ;;  %v4933_v30 = vld [vmem:[%s5196_s2 + $0xf0] sm:$0xff]  }
 0x35c   : > { %1500 = vrot.lane.b32.xlu1 %v5488_v62, %s5083_s15  ;;  %1494 = vrot.lane.b32.xlu0 %v5485_v0, %s5083_s15  ;;  %v5500_v28 = vmul.f32 %v5257_v14, %v1472_v47 }
 0x35e   : > { %v1483_v21 = vpack.c.bf16 %v5500_v28, %v5485_v0 }
 0x360   : > { %1496 = vrot.lane.b32.xlu1 %v5500_v28, %s5083_s15  ;;  %1626 = vrot.lane.b32.xlu0 %v5476_v56, %s5084_s18 }
 0x364   : > { %1628 = vrot.lane.b32.xlu1 %v5488_v62, %s5084_s18  ;;  %1622 = vrot.lane.b32.xlu0 %v5485_v0, %s5084_s18 }
 0x368   : > { %1624 = vrot.lane.b32.xlu1 %v5500_v28, %s5084_s18  ;;  %1868 = vrot.lane.b32.xlu0 %v5476_v56, %s5085_s5 }
 0x36c   : > { %1870 = vrot.lane.b32.xlu1 %v5488_v62, %s5085_s5  ;;  %1996 = vrot.lane.b32.xlu0 %v5476_v56, %s5086_s7 }
 0x370   : > { %1998 = vrot.lane.b32.xlu1 %v5488_v62, %s5086_s7  ;;  %1864 = vrot.lane.b32.xlu0 %v5485_v0, %s5085_s5 }
 0x374   : > { %1866 = vrot.lane.b32.xlu1 %v5500_v28, %s5085_s5  ;;  %1992 = vrot.lane.b32.xlu0 %v5485_v0, %s5086_s7 }
 0x378   : > { %1994 = vrot.lane.b32.xlu1 %v5500_v28, %s5086_s7 }
 0x3ca   : > { %v1499_v9 = vpop.permute.xlu0 %1498 }
 0x3cb   : > { %v1504_v11 = vmul.f32 %v1499_v9, %v5313_v33 }
 0x3ce   : > { %v1501_v54 = vpop.permute.xlu1 %1500  ;;  %v1495_v52 = vpop.permute.xlu0 %1494 }
 0x3cf   : > { %v1505_v61 = vmul.f32 %v1501_v54, %v5318_v35  ;;  %v1502_v38 = vmul.f32 %v1495_v52, %v6097_v45  ;;  %v1484_v35 = vpack.c.bf16 %v5488_v62, %v5476_v56  ;;  %v4934_v54 = vld [vmem:[%s5196_s2 + $0x100] sm:$0xff]   ;;  %v6109_v52 = vld [vmem:[#allocation19_spill] sm:$0xff]  ;;  %v4936_v45 = vld [vmem:[%s5196_s2 + $0x108] sm:$0xff]  }
 0x3d1   : > { %v1507_v23 = vpack.c.bf16 %v1505_v61, %v1504_v11  ;;  %v6110_v61 = vld [vmem:[#allocation20_spill] sm:$0xff] }
 0x3d2   : > { %v1497_v63 = vpop.permute.xlu1 %1496  ;;  %v1627_v1 = vpop.permute.xlu0 %1626 }
 0x3d3   : > { %v1503_v6 = vmul.f32 %v1497_v63, %v6098_v2  ;;  %4661 = vmatprep.subr.bf16.mxu1 %v1507_v23  ;;  %v1632_v18 = vmul.f32 %v6099_v17, %v1627_v1  ;;  %v4935_v1 = vld [vmem:[%s5196_s2 + $0xf8] sm:$0xff]   ;;  %v4938_v2 = vld [vmem:[%s5196_s2 + $0x120] sm:$0xff]  }
 0x3d4   : > { %4662 = vmatpush3.bf16.msra.mxu1 %v1507_v23  ;;  %v4943_v17 = vld [vmem:[%s5201_s14 + $0x20] sm:$0xff]  }
 0x3d5   : > { %v1506_v36 = vpack.c.bf16 %v1503_v6, %v1502_v38  ;;  %v4937_v38 = vld [vmem:[%s5196_s2 + $0x110] sm:$0xff]   ;;  %v4939_v6 = vld [vmem:[%s5196_s2 + $0x118] sm:$0xff]  }
 0x3d6   : > { %v1629_v8 = vpop.permute.xlu1 %1628  ;;  %v1623_v12 = vpop.permute.xlu0 %1622 }
 0x3d7   : > { %v1633_v33 = vmul.f32 %v6100_v19, %v1629_v8  ;;  %4663 = vmatprep.subr.bf16.mxu1 %v1506_v36  ;;  %v1630_v39 = vmul.f32 %v6101_v34, %v1623_v12  ;;  %v4941_v8 = vld [vmem:[%s5196_s2 + $0x130] sm:$0xff]   ;;  %v4942_v12 = vld [vmem:[%s5196_s2 + $0x138] sm:$0xff]  }
 0x3d8   : > { %4664 = vmatpush3.bf16.msra.mxu1 %v1506_v36  ;;  %v4940_v36 = vld [vmem:[%s5196_s2 + $0x128] sm:$0xff]  }
 0x3d9   : > { %v1635_v25 = vpack.c.bf16 %v1633_v33, %v1632_v18  ;;  %4685 = vmatprep.subr.bf16.mxu1 %v1484_v35 }
 0x3da   : > { %v1625_v27 = vpop.permute.xlu1 %1624  ;;  %v1869_v31 = vpop.permute.xlu0 %1868 }
 0x3db   : > { %v1631_v41 = vmul.f32 %v6102_v40, %v1625_v27  ;;  %4666 = vmatmul.mubr.msk.bf16.vlgmr.msra.gmra.mxu1 %vm733_vm2, %v4924_v22  ;;  %4673 = vmatprep.subr.bf16.mxu0 %v1635_v25  ;;  %v1874_v53 = vmul.f32 %v6103_v51, %v1869_v31 }
 0x3dc   : > { %4674 = vmatpush3.bf16.msra.mxu0 %v1635_v25  ;;  %4686 = vmatpush3.bf16.msra.mxu1 %v1484_v35 }
 0x3dd   : > { %v1634_v43 = vpack.c.bf16 %v1631_v41, %v1630_v39  ;;  %4687 = vmatprep.subr.bf16.mxu1 %v1483_v21  ;;  %4669 = vmatprep.mubr.msk.bf16.mxu1 %vm733_vm2, %v4926_v26 }
 0x3de   : > { %v1871_v44 = vpop.permute.xlu1 %1870  ;;  %v1997_v48 = vpop.permute.xlu0 %1996 }
 0x3df   : > { %v1875_v58 = vmul.f32 %v6104_v57, %v1871_v44  ;;  %4675 = vmatprep.subr.bf16.mxu0 %v1634_v43  ;;  %v2002_v16 = vmul.f32 %v6105_v10, %v1997_v48 }
 0x3e0   : > { %4676 = vmatpush3.bf16.msra.mxu0 %v1634_v43  ;;  %4688 = vmatpush3.bf16.msra.mxu1 %v1483_v21 }
 0x3e1   : > { %v1877_v7 = vpack.c.bf16 %v1875_v58, %v1874_v53 }
 0x3e2   : > { %v1999_v46 = vpop.permute.xlu1 %1998  ;;  %v1865_v49 = vpop.permute.xlu0 %1864 }
 0x3e3   : > { %v2003_v50 = vmul.f32 %v6106_v29, %v1999_v46  ;;  %4670 = vmatmul.mubr.msk.bf16.gmra.mxu1 %vm733_vm2, %v4927_v59  ;;  %4678 = vmatmul.mubr.msk.bf16.vlgmr.msra.gmra.mxu0 %vm733_vm2, %v4928_v5  ;;  %v1872_v32 = vmul.f32 %v6107_v3, %v1865_v49  ;;  %v4107_v29 = vld [vmem:[%s6096_s28 + $0x70] sm:$0xff] }
 0x3e4   : > { %4697 = vmatprep.subr.bf16.mxu0 %v1877_v7  ;;  %4681 = vmatprep.mubr.msk.bf16.mxu0 %vm733_vm2, %v4929_v42 }
 0x3e5   : > { %v2005_v55 = vpack.c.bf16 %v2003_v50, %v2002_v16  ;;  %4698 = vmatpush3.bf16.msra.mxu0 %v1877_v7  ;;  %4689 = vmatprep.mubr.msk.bf16.mxu1 %vm733_vm2, %v4930_v15 }
 0x3e6   : > { %v1867_v13 = vpop.permute.xlu1 %1866  ;;  %v1993_v47 = vpop.permute.xlu0 %1992 }
 0x3e7   : > { %v1873_v4 = vmul.f32 %v6108_v37, %v1867_v13  ;;  %4709 = vmatprep.subr.bf16.mxu1 %v2005_v55  ;;  %v2000_v11 = vmul.f32 %v6109_v52, %v1993_v47  ;;  %v4105_v13 = vld [vmem:[%s6096_s28 + $0x60] sm:$0xff]  ;;  %v4104_v52 = vld [vmem:[%s6096_s28 + $0x58] sm:$0xff] }
 0x3e9   : > { %v1876_v24 = vpack.c.bf16 %v1873_v4, %v1872_v32  ;;  %v4108_v4 = vld [vmem:[%s6096_s28 + $0x78] sm:$0xff] }
 0x3ea   : > { %v1995_v9 = vpop.permute.xlu1 %1994 }
 0x3eb   : > { %v2001_v23 = vmul.f32 %v6110_v61, %v1995_v9  ;;  %4682 = vmatmul.mubr.msk.bf16.gmra.mxu0 %vm733_vm2, %v4931_v60  ;;  %4690 = vmatmul.mubr.msk.bf16.vlgmr.msra.gmra.mxu1 %vm733_vm2, %v4932_v20 }
 0x3ec   : > { %4699 = vmatprep.subr.bf16.mxu0 %v1876_v24  ;;  %4710 = vmatpush3.bf16.msra.mxu1 %v2005_v55 }
 0x3ed   : > { %v2004_v63 = vpack.c.bf16 %v2001_v23, %v2000_v11  ;;  %4700 = vmatpush3.bf16.msra.mxu0 %v1876_v24  ;;  %4693 = vmatprep.mubr.msk.bf16.mxu1 %vm733_vm2, %v4933_v30  ;;  %v4106_v30 = vld [vmem:[%s6096_s28 + $0x68] sm:$0xff] }
 0x3ee   : > { %4701 = vmatprep.mubr.msk.bf16.mxu0 %vm733_vm2, %v4934_v54  ;;  %v4103_v54 = vld [vmem:[%s6096_s28 + $0x50] sm:$0xff] }
 0x3ef   : > { %4711 = vmatprep.subr.bf16.mxu1 %v2004_v63 }
 0x3f0   : > { %4712 = vmatpush3.bf16.msra.mxu1 %v2004_v63 }
 0x3f3   : > { %4694 = vmatmul.mubr.msk.bf16.gmra.mxu1 %vm733_vm2, %v4935_v1  ;;  %4702 = vmatmul.mubr.msk.bf16.vlgmr.msra.gmra.mxu0 %vm733_vm2, %v4936_v45  ;;  %v4101_v45 = vld [vmem:[%s6096_s28 + $0x40] sm:$0xff] }
 0x3f4   : > { %4705 = vmatprep.mubr.msk.bf16.mxu0 %vm733_vm2, %v4937_v38  ;;  %4713 = vmatprep.mubr.msk.bf16.mxu1 %vm733_vm2, %v4938_v2  ;;  %v4102_v38 = vld [vmem:[%s6096_s28 + $0x48] sm:$0xff] }
 0x3fb   : > { %4706 = vmatmul.mubr.msk.bf16.gmra.mxu0 %vm733_vm2, %v4939_v6  ;;  %4714 = vmatmul.mubr.msk.bf16.vlgmr.msra.gmra.mxu1 %vm733_vm2, %v4940_v36 }
 0x3fc   : > { %4717 = vmatprep.mubr.msk.bf16.mxu1 %vm733_vm2, %v4941_v8  ;;  %4725 = vmatprep.mubr.msk.bf16.mxu0 %vm733_vm2, %v4943_v17 }
 0x403   : > { %4718 = vmatmul.mubr.msk.bf16.gmra.mxu1 %vm733_vm2, %v4942_v12 }
 0x417   : > { %v5588_v18 = vpop.f32.mrf.mxu0 }
 0x419   : > { %v5590_v19 = vpop.f32.mrf.mxu0 }
 0x41b   : > { %v5592_v35 = vpop.f32.mrf.mxu0 }
 0x41d   : > { %v5594_v26 = vpop.f32.mrf.mxu0 }
 0x41e   : > { %6111 = vst [vmem:[#allocation7_spill] sm:$0xff] %v5594_v26 }
 0x49b   : > { %v4667_v33 = vpop.f32.mrf.mxu1 }
 0x49c   : > { %v1616_v12 = vadd.f32 %v4667_v33, %v4103_v54 }
 0x49d   : > { %v1583_v22 = vpop.f32.mrf.mxu1 }
 0x49f   : > { %v4668_v25 = vpop.f32.mrf.mxu1 }
 0x4a0   : > { %v1617_v17 = vadd.f32 %v4668_v25, %v4104_v52 }
 0x4a1   : > { %v1586_v27 = vpop.f32.mrf.mxu1 }
 0x4a2   : > { %v1615_v14 = vadd.f32 %v4102_v38, %v1586_v27 }
 0x4a3   : > { %v4671_v31 = vpop.f32.mrf.mxu1  ;;  %v4679_v34 = vpop.f32.mrf.mxu0 }
 0x4a4   : > { %v1620_v37 = vadd.f32 %v4671_v31, %v4107_v29 }
 0x4a5   : > { %v1599_v39 = vpop.f32.mrf.mxu1  ;;  %v5596_v40 = vpop.f32.mrf.mxu0 }
 0x4a6   : > { %v1618_v47 = vadd.f32 %v4105_v13, %v1599_v39 }
 0x4a7   : > { %v4672_v41 = vpop.f32.mrf.mxu1  ;;  %v4680_v21 = vpop.f32.mrf.mxu0 }
 0x4a8   : > { %v1621_v11 = vadd.f32 %v4672_v41, %v4108_v4  ;;  %v1744_v41 = vadd.f32 %v4679_v34, %v1616_v12 }
 0x4a9   : > { %v1602_v43 = vpop.f32.mrf.mxu1  ;;  %v1714_v44 = vpop.f32.mrf.mxu0 }
 0x4aa   : > { %v1619_v2 = vadd.f32 %v4106_v30, %v1602_v43 }
 0x4ab   : > { %v4683_v48 = vpop.f32.mrf.mxu0  ;;  %v4691_v51 = vpop.f32.mrf.mxu1 }
 0x4ac   : > { %v1748_v24 = vadd.f32 %v4683_v48, %v1620_v37  ;;  %v1614_v37 = vadd.f32 %v4101_v45, %v1583_v22  ;;  %v1858_v33 = vadd.f32 %v4691_v51, %v1744_v41 }
 0x4ad   : > { %v1727_v53 = vpop.f32.mrf.mxu0  ;;  %v5598_v57 = vpop.f32.mrf.mxu1 }
 0x4ae   : > { %v1746_v61 = vadd.f32 %v1727_v53, %v1618_v47  ;;  %v1745_v53 = vadd.f32 %v4680_v21, %v1617_v17 }
 0x4af   : > { %v4684_v58 = vpop.f32.mrf.mxu0  ;;  %v4692_v59 = vpop.f32.mrf.mxu1 }
 0x4b0   : > { %v1749_v6 = vadd.f32 %v4684_v58, %v1621_v11  ;;  %v1742_v58 = vadd.f32 %v5596_v40, %v1614_v37  ;;  %v1859_v25 = vadd.f32 %v4692_v59, %v1745_v53  ;;  %v4197_v37 = vld [vmem:[%s5206_s17 + $0x40] sm:$0xff] }
 0x4b1   : > { %v1730_v5 = vpop.f32.mrf.mxu0  ;;  %v1828_v42 = vpop.f32.mrf.mxu1 }
 0x4b2   : > { %v1747_v39 = vadd.f32 %v1730_v5, %v1619_v2  ;;  %v1856_v22 = vadd.f32 %v5598_v57, %v1742_v58  ;;  %v1372_v58 = vld [vmem:[%s5206_s17 + $0x30] sm:$0xff] }
 0x4b3   : > { %v4695_v7 = vpop.f32.mrf.mxu1  ;;  %v4703_v15 = vpop.f32.mrf.mxu0 }
 0x4b4   : > { %v1862_v23 = vadd.f32 %v4695_v7, %v1748_v24  ;;  %v1986_v34 = vadd.f32 %v4703_v15, %v1858_v33 }
 0x4b5   : > { %v1841_v46 = vpop.f32.mrf.mxu1  ;;  %v5600_v49 = vpop.f32.mrf.mxu0 }
 0x4b6   : > { %v1860_v36 = vadd.f32 %v1841_v46, %v1746_v61  ;;  %v1743_v46 = vadd.f32 %v1714_v44, %v1615_v14  ;;  %v1984_v52 = vadd.f32 %v5600_v49, %v1856_v22  ;;  %v1465_v22 = vadd.f32 %v5588_v18, %v1372_v58 }
 0x4b7   : > { %v4696_v10 = vpop.f32.mrf.mxu1  ;;  %v4704_v16 = vpop.f32.mrf.mxu0 }
 0x4b8   : > { %v1863_v48 = vadd.f32 %v4696_v10, %v1749_v6  ;;  %v1857_v27 = vadd.f32 %v1828_v42, %v1743_v46  ;;  %v1987_v30 = vadd.f32 %v4704_v16, %v1859_v25  ;;  %v5628_v46 = vld [vmem:[%s6078_s29] ss:$0 sm:$0xff] }
 0x4b9   : > { %v1844_v50 = vpop.f32.mrf.mxu1  ;;  %v1956_v55 = vpop.f32.mrf.mxu0 }
 0x4ba   : > { %v1861_v47 = vadd.f32 %v1844_v50, %v1747_v39  ;;  %v1985_v14 = vadd.f32 %v1956_v55, %v1857_v27  ;;  %v4945_v39 = vld [vmem:[%s5201_s14 + $0x30] sm:$0xff]   ;;  %v1370_v27 = vld [vmem:[%s5206_s17 + $0x20] sm:$0xff] }
 0x4bb   : > { %v4707_v3 = vpop.f32.mrf.mxu0  ;;  %v4715_v32 = vpop.f32.mrf.mxu1  ;;  %v1457_v18 = vadd.f32 %v5590_v19, %v1370_v27  ;;  %v4949_v19 = vld [vmem:[%s5196_s2 + $0x160] sm:$0xff]   ;;  %v4953_v27 = vld [vmem:[%s5196_s2 + $0x170] sm:$0xff]  }
 0x4bc   : > { %v1990_v8 = vadd.f32 %v4707_v3, %v1862_v23  ;;  %v2114_v40 = vadd.f32 %v4715_v32, %v1986_v34 }
 0x4bd   : > { %v1969_v60 = vpop.f32.mrf.mxu0  ;;  %v2081_v20 = vpop.f32.mrf.mxu1 }
 0x4be   : > { %v1988_v29 = vadd.f32 %v1969_v60, %v1860_v36  ;;  %v2112_v59 = vadd.f32 %v2081_v20, %v1984_v52 }
 0x4bf   : > { %v4716_v9 = vpop.f32.mrf.mxu1  ;;  %v4708_v63 = vpop.f32.mrf.mxu0 }
 0x4c0   : > { %v1991_v24 = vadd.f32 %v4708_v63, %v1863_v48  ;;  %v2115_v44 = vadd.f32 %v4716_v9, %v1987_v30  ;;  %v4946_v48 = vld [vmem:[%s5201_s14 + $0x38] sm:$0xff]   ;;  %v4947_v30 = vld [vmem:[%s5196_s2 + $0x140] sm:$0xff]  }
 0x4c1   : > { %v2084_v1 = vpop.f32.mrf.mxu1  ;;  %v1972_v7 = vpop.f32.mrf.mxu0  ;;  %4737 = vmatprep.mubr.msk.bf16.mxu1 %vm733_vm2, %v4947_v30 }
 0x4c2   : > { %v1989_v5 = vadd.f32 %v1972_v7, %v1861_v47  ;;  %v4200_v7 = vld [vmem:[%s5206_s17 + $0x58] sm:$0xff] }
 0x4c3   : > { %v4719_v31 = vpop.f32.mrf.mxu1 }
 0x4c4   : > { %v2118_v13 = vadd.f32 %v4719_v31, %v1990_v8  ;;  %v4944_v31 = vld [vmem:[%s5201_s14 + $0x28] sm:$0xff]  }
 0x4c5   : > { %v2097_v4 = vpop.f32.mrf.mxu1 }
 0x4c6   : > { %v2126_v26 = vmul.f32 0.5, %v2118_v13  ;;  %v2116_v43 = vadd.f32 %v2097_v4, %v1988_v29  ;;  %v4199_v29 = vld [vmem:[%s5206_s17 + $0x50] sm:$0xff] }
 0x4c7   : > { %v4720_v3 = vpop.f32.mrf.mxu1 }
 0x4c8   : > { %5009 = vtanh.f32 %v2126_v26  ;;  %v2124_v10 = vmul.f32 0.5, %v2116_v43  ;;  %v2119_v60 = vadd.f32 %v4720_v3, %v1991_v24  ;;  %v2113_v26 = vadd.f32 %v2084_v1, %v1985_v14  ;;  %v4198_v43 = vld [vmem:[%s5206_s17 + $0x48] sm:$0xff]  ;;  %v4204_v14 = vld [vmem:[%s5206_s17 + $0x78] sm:$0xff] }
 0x4c9   : > { %v2100_v21 = vpop.f32.mrf.mxu1 }
 0x4ca   : > { %5011 = vtanh.f32 %v2124_v10  ;;  %v2127_v50 = vmul.f32 0.5, %v2119_v60  ;;  %v2117_v54 = vadd.f32 %v2100_v21, %v1989_v5  ;;  %v4201_v21 = vld [vmem:[%s5206_s17 + $0x60] sm:$0xff] }
 0x4cc   : > { %5013 = vtanh.f32 %v2127_v50  ;;  %v2125_v51 = vmul.f32 0.5, %v2117_v54 }
 0x4ce   : > { %5015 = vtanh.f32 %v2125_v51 }
 0x4cf   : > { %5017 = vtanh.f32 %v2114_v40 }
 0x4d0   : > { %5019 = vtanh.f32 %v2115_v44 }
 0x4d1   : > { %5021 = vtanh.f32 %v2112_v59 }
 0x4d2   : > { %5023 = vtanh.f32 %v2113_v26 }
 0x4d5   : > { %v5010_v57 = vpop.eup %5009 }
 0x4d6   : > { %v2134_v42 = vadd.f32 1.0, %v5010_v57 }
 0x4d7   : > { %v5012_v15 = vpop.eup %5011 }
 0x4d8   : > { %v2132_v16 = vadd.f32 1.0, %v5012_v15  ;;  %v2138_v61 = vmul.f32 0.5, %v2134_v42 }
 0x4d9   : > { %v5014_v11 = vpop.eup %5013 }
 0x4da   : > { %v2135_v23 = vadd.f32 1.0, %v5014_v11  ;;  %v2136_v55 = vmul.f32 0.5, %v2132_v16 }
 0x4db   : > { %v5016_v49 = vpop.eup %5015 }
 0x4dc   : > { %v5018_v32 = vpop.eup %5017  ;;  %v2139_v9 = vmul.f32 0.5, %v2135_v23  ;;  %v2133_v63 = vadd.f32 1.0, %v5016_v49  ;;  %v5704_v49 = vld [vmem:[%s6081_s19 + $0x18] sm:$0xff] }
 0x4dd   : > { %v5020_v20 = vpop.eup %5019  ;;  %v2142_v38 = vmul.f32 %v5018_v32, %v2138_v61  ;;  %v5698_v61 = vld [vmem:[%s6081_s19 + $0x10] sm:$0xff]  ;;  %6114 = vst [vmem:[#allocation10_spill] sm:$0xff] %v5704_v49 }
 0x4de   : > { %v5022_v1 = vpop.eup %5021  ;;  %v2137_v45 = vmul.f32 0.5, %v2133_v63  ;;  %v2143_v2 = vmul.f32 %v5020_v20, %v2139_v9  ;;  %6113 = vst [vmem:[#allocation9_spill] sm:$0xff] %v5698_v61  ;;  %v5710_v20 = vld [vmem:[%s6081_s19] sm:$0xff] }
 0x4df   : > { %v5024_v6 = vpop.eup %5023  ;;  %v2140_v8 = vmul.f32 %v5022_v1, %v2136_v55  ;;  %6115 = vst [vmem:[#allocation11_spill] sm:$0xff] %v5710_v20 }
 0x4e0   : > { %v2145_v36 = vpack.c.bf16 %v2143_v2, %v2142_v38  ;;  %v2141_v12 = vmul.f32 %v5024_v6, %v2137_v45  ;;  %v5716_v45 = vld [vmem:[%s6081_s19 + $0x8] sm:$0xff] }
 0x4e1   : > { %6116 = vst [vmem:[#allocation12_spill] sm:$0xff] %v5716_v45 }
 0x4e2   : > { %4721 = vmatprep.subr.bf16.mxu0 %v2145_v36  ;;  %v2144_v17 = vpack.c.bf16 %v2141_v12, %v2140_v8  ;;  %v5722_v8 = vld [vmem:[%s6081_s19 + $0x30] sm:$0xff] }
 0x4e3   : > { %4722 = vmatpush3.bf16.msra.mxu0 %v2145_v36  ;;  %6117 = vst [vmem:[#allocation13_spill] sm:$0xff] %v5722_v8 }
 0x4e4   : > { %4723 = vmatprep.subr.bf16.mxu0 %v2144_v17 }
 0x4e7   : > { %4724 = vmatpush3.bf16.msra.mxu0 %v2144_v17  ;;  %v5728_v17 = vld [vmem:[%s6081_s19 + $0x38] sm:$0xff] }
 0x4e8   : > { %6118 = vst [vmem:[#allocation14_spill] sm:$0xff] %v5728_v17 }
 0x4ea   : > { %4726 = vmatmul.mubr.msk.bf16.vlgmr.msra.gmra.mxu0 %vm733_vm2, %v4944_v31 }
 0x4eb   : > { %4729 = vmatprep.mubr.msk.bf16.mxu0 %vm733_vm2, %v4945_v39 }
 0x4f2   : > { %4730 = vmatmul.mubr.msk.bf16.gmra.mxu0 %vm733_vm2, %v4946_v48  ;;  %v4948_v48 = vld [vmem:[%s5196_s2 + $0x148] sm:$0xff]  }
 0x4f3   : > { %4749 = vmatprep.mubr.msk.bf16.mxu0 %vm733_vm2, %v4949_v19 }
 0x5aa   : > { %v4727_v13 = vpop.f32.mrf.mxu0 }
 0x5ab   : > { %v2239_v41 = vadd.f32 %v4727_v13, %v4199_v29  ;;  %v4950_v13 = vld [vmem:[%s5196_s2 + $0x150] sm:$0xff]  }
 0x5ac   : > { %v2230_v53 = vpop.f32.mrf.mxu0 }
 0x5ad   : > { %v2263_v4 = vadd.f32 %v2239_v41, %v5476_v56  ;;  %v2231_v47 = vadd.f32 %v4197_v37, %v2230_v53  ;;  %v4203_v56 = vld [vmem:[%s5206_s17 + $0x70] sm:$0xff]  ;;  %v5738_v53 = vld [vmem:[%s6081_s19 + $0x20] sm:$0xff] }
 0x5ae   : > { %v4728_v24 = vpop.f32.mrf.mxu0  ;;  %6119 = vst [vmem:[#allocation15_spill] sm:$0xff] %v5738_v53 }
 0x5af   : > { %v5631_v33 = vmul.f32 %v5628_v46, %v2263_v4  ;;  %v2261_v25 = vadd.f32 %v2231_v47, %v5485_v0  ;;  %v2242_v3 = vadd.f32 %v4728_v24, %v4200_v7  ;;  %v5744_v4 = vld [vmem:[%s6081_s19 + $0x28] sm:$0xff] }
 0x5b0   : > { %v2233_v5 = vpop.f32.mrf.mxu0  ;;  %6120 = vst [vmem:[#allocation16_spill] sm:$0xff] %v5744_v4 }
 0x5b1   : > { %v2264_v10 = vadd.f32 %v2242_v3, %v5488_v62  ;;  %v2234_v60 = vadd.f32 %v4198_v43, %v2233_v5  ;;  %2288 = vrot.lane.b32.xlu0 %v5631_v33, %s5083_s15  ;;  %v5643_v50 = vmul.f32 %v5628_v46, %v2261_v25  ;;  %v1373_v62 = vld [vmem:[%s5206_s17 + $0x38] sm:$0xff]  ;;  %v5754_v3 = vld [vmem:[%s6081_s19 + $0x50] sm:$0xff] }
 0x5b2   : > { %v4731_v34 = vpop.f32.mrf.mxu0  ;;  %6121 = vst [vmem:[#allocation17_spill] sm:$0xff] %v5754_v3 }
 0x5b3   : > { %v5646_v0 = vmul.f32 %v5628_v46, %v2264_v10  ;;  %v2262_v54 = vadd.f32 %v2234_v60, %v5500_v28  ;;  %v2255_v52 = vadd.f32 %v4731_v34, %v4203_v56  ;;  %v1468_v28 = vadd.f32 %v5592_v35, %v1373_v62  ;;  %v5760_v56 = vld [vmem:[%s6081_s19 + $0x58] sm:$0xff] }
 0x5b4   : > { %v2246_v40 = vpop.f32.mrf.mxu0  ;;  %6122 = vst [vmem:[#allocation18_spill] sm:$0xff] %v5760_v56  ;;  %v4951_v60 = vld [vmem:[%s5196_s2 + $0x158] sm:$0xff]  }
 0x5b5   : > { %v5653_v44 = vadd.f32 %v2255_v52, %v1465_v22  ;;  %v2247_v51 = vadd.f32 %v4201_v21, %v2246_v40  ;;  %2290 = vrot.lane.b32.xlu1 %v5646_v0, %s5083_s15  ;;  %2284 = vrot.lane.b32.xlu0 %v5643_v50, %s5083_s15  ;;  %v5661_v26 = vmul.f32 %v5628_v46, %v2262_v54  ;;  %v4952_v22 = vld [vmem:[%s5196_s2 + $0x168] sm:$0xff]   ;;  %v4954_v21 = vld [vmem:[%s5196_s2 + $0x180] sm:$0xff]  }
 0x5b6   : > { %v4732_v59 = vpop.f32.mrf.mxu0  ;;  %v2274_v39 = vpack.c.bf16 %v5646_v0, %v5631_v33  ;;  %v5770_v52 = vld [vmem:[%s6081_s19 + $0x70] sm:$0xff]  ;;  %v5776_v40 = vld [vmem:[%s6081_s19 + $0x78] sm:$0xff] }
 0x5b7   : > { %v5663_v57 = vadd.f32 %v2247_v51, %v1457_v18  ;;  %v2258_v42 = vadd.f32 %v4732_v59, %v4204_v14  ;;  %v2273_v24 = vpack.c.bf16 %v5661_v26, %v5643_v50  ;;  %6123 = vst [vmem:[#allocation19_spill] sm:$0xff] %v5770_v52  ;;  %6124 = vst [vmem:[#allocation20_spill] sm:$0xff] %v5776_v40  ;;  %v5786_v59 = vld [vmem:[%s6081_s19 + $0x40] sm:$0xff] }
 0x5b8   : > { %6125 = vst [vmem:[#allocation21_spill] sm:$0xff] %v5786_v59 }
 0x5b9   : > { %v5665_v15 = vadd.f32 %v2258_v42, %v1468_v28  ;;  %2286 = vrot.lane.b32.xlu1 %v5661_v26, %s5083_s15  ;;  %2416 = vrot.lane.b32.xlu0 %v5631_v33, %s5084_s18  ;;  %v5792_v42 = vld [vmem:[%s6081_s19 + $0x48] sm:$0xff] }
 0x5ba   : > { %6126 = vst [vmem:[#allocation22_spill] sm:$0xff] %v5792_v42 }
 0x5bb   : > { %6112 = vst [vmem:[#allocation8_spill] sm:$0xff] %v5665_v15 }
 0x5bd   : > { %2418 = vrot.lane.b32.xlu1 %v5646_v0, %s5084_s18  ;;  %2412 = vrot.lane.b32.xlu0 %v5643_v50, %s5084_s18 }
 0x5c1   : > { %2414 = vrot.lane.b32.xlu1 %v5661_v26, %s5084_s18  ;;  %2658 = vrot.lane.b32.xlu0 %v5631_v33, %s5085_s5 }
 0x5c5   : > { %2660 = vrot.lane.b32.xlu1 %v5646_v0, %s5085_s5  ;;  %2786 = vrot.lane.b32.xlu0 %v5631_v33, %s5086_s7 }
 0x5c9   : > { %2788 = vrot.lane.b32.xlu1 %v5646_v0, %s5086_s7  ;;  %2654 = vrot.lane.b32.xlu0 %v5643_v50, %s5085_s5 }
 0x5cd   : > { %2656 = vrot.lane.b32.xlu1 %v5661_v26, %s5085_s5  ;;  %2782 = vrot.lane.b32.xlu0 %v5643_v50, %s5086_s7 }
 0x5d1   : > { %2784 = vrot.lane.b32.xlu1 %v5661_v26, %s5086_s7 }
 0x623   : > { %v2289_v35 = vpop.permute.xlu0 %2288 }
 0x624   : > { %v2294_v23 = vmul.f32 %v5698_v61, %v2289_v35  ;;  %v4955_v35 = vld [vmem:[%s5196_s2 + $0x178] sm:$0xff]  }
 0x627   : > { %v2291_v16 = vpop.permute.xlu1 %2290  ;;  %v2285_v11 = vpop.permute.xlu0 %2284 }
 0x628   : > { %v2295_v32 = vmul.f32 %v5704_v49, %v2291_v16  ;;  %v2292_v1 = vmul.f32 %v5710_v20, %v2285_v11  ;;  %v4956_v16 = vld [vmem:[%s5196_s2 + $0x188] sm:$0xff]  }
 0x62a   : > { %v2297_v55 = vpack.c.bf16 %v2295_v32, %v2294_v23  ;;  %v4957_v32 = vld [vmem:[%s5196_s2 + $0x190] sm:$0xff]  }
 0x62b   : > { %v2287_v9 = vpop.permute.xlu1 %2286  ;;  %v2417_v63 = vpop.permute.xlu0 %2416 }
 0x62c   : > { %v2293_v38 = vmul.f32 %v5716_v45, %v2287_v9  ;;  %4733 = vmatprep.subr.bf16.mxu1 %v2297_v55  ;;  %v2422_v12 = vmul.f32 %v5722_v8, %v2417_v63  ;;  %v4958_v9 = vld [vmem:[%s5196_s2 + $0x1a0] sm:$0xff]  }
 0x62d   : > { %4734 = vmatpush3.bf16.msra.mxu1 %v2297_v55  ;;  %v5802_v63 = vld [vmem:[%s6081_s19 + $0x60] sm:$0xff] }
 0x62e   : > { %v2296_v2 = vpack.c.bf16 %v2293_v38, %v2292_v1  ;;  %6127 = vst [vmem:[#allocation23_spill] sm:$0xff] %v5802_v63  ;;  %v5808_v38 = vld [vmem:[%s6081_s19 + $0x68] sm:$0xff] }
 0x62f   : > { %v2419_v6 = vpop.permute.xlu1 %2418  ;;  %v2413_v36 = vpop.permute.xlu0 %2412  ;;  %6128 = vst [vmem:[#allocation24_spill] sm:$0xff] %v5808_v38 }
 0x630   : > { %v2423_v31 = vmul.f32 %v5728_v17, %v2419_v6  ;;  %4735 = vmatprep.subr.bf16.mxu1 %v2296_v2  ;;  %v2420_v7 = vmul.f32 %v5738_v53, %v2413_v36  ;;  %v4959_v36 = vld [vmem:[%s5196_s2 + $0x198] sm:$0xff]  }
 0x631   : > { %4736 = vmatpush3.bf16.msra.mxu1 %v2296_v2 }
 0x632   : > { %v2425_v29 = vpack.c.bf16 %v2423_v31, %v2422_v12  ;;  %4757 = vmatprep.subr.bf16.mxu1 %v2274_v39  ;;  %v4960_v12 = vld [vmem:[%s5196_s2 + $0x1a8] sm:$0xff]   ;;  %v4961_v31 = vld [vmem:[%s5196_s2 + $0x1b0] sm:$0xff]  }
 0x633   : > { %v2415_v37 = vpop.permute.xlu1 %2414  ;;  %v2659_v41 = vpop.permute.xlu0 %2658 }
 0x634   : > { %v2421_v47 = vmul.f32 %v5744_v4, %v2415_v37  ;;  %4738 = vmatmul.mubr.msk.bf16.vlgmr.msra.gmra.mxu1 %vm733_vm2, %v4948_v48  ;;  %4745 = vmatprep.subr.bf16.mxu0 %v2425_v29  ;;  %v2664_v5 = vmul.f32 %v5754_v3, %v2659_v41  ;;  %v4963_v48 = vld [vmem:[%s5196_s2 + $0x1b8] sm:$0xff]   ;;  %v4967_v41 = vld [vmem:[%s5201_s14 + $0x40] sm:$0xff]   ;;  %v4214_v4 = vld [vmem:[%s6096_s28 + $0x88] sm:$0xff] }
 0x635   : > { %4746 = vmatpush3.bf16.msra.mxu0 %v2425_v29  ;;  %4758 = vmatpush3.bf16.msra.mxu1 %v2274_v39  ;;  %v4962_v39 = vld [vmem:[%s5196_s2 + $0x1c0] sm:$0xff]   ;;  %v4964_v29 = vld [vmem:[%s5196_s2 + $0x1c8] sm:$0xff]   ;;  %v4966_v37 = vld [vmem:[%s5196_s2 + $0x1d8] sm:$0xff]  }
 0x636   : > { %v2424_v43 = vpack.c.bf16 %v2421_v47, %v2420_v7  ;;  %4759 = vmatprep.subr.bf16.mxu1 %v2273_v24  ;;  %4741 = vmatprep.mubr.msk.bf16.mxu1 %vm733_vm2, %v4950_v13  ;;  %v4965_v13 = vld [vmem:[%s5196_s2 + $0x1d0] sm:$0xff]   ;;  %v4213_v3 = vld [vmem:[%s6096_s28 + $0x80] sm:$0xff] }
 0x637   : > { %v2661_v58 = vpop.permute.xlu1 %2660  ;;  %v2787_v25 = vpop.permute.xlu0 %2786 }
 0x638   : > { %v2665_v10 = vmul.f32 %v5760_v56, %v2661_v58  ;;  %4747 = vmatprep.subr.bf16.mxu0 %v2424_v43  ;;  %v2792_v62 = vmul.f32 %v5770_v52, %v2787_v25 }
 0x639   : > { %4748 = vmatpush3.bf16.msra.mxu0 %v2424_v43  ;;  %4760 = vmatpush3.bf16.msra.mxu1 %v2273_v24  ;;  %v5833_v43 = vpop.f32.mrf.mxu0 }
 0x63a   : > { %v2667_v34 = vpack.c.bf16 %v2665_v10, %v2664_v5  ;;  %6129 = vst [vmem:[#allocation25_spill] sm:$0xff] %v5833_v43 }
 0x63b   : > { %v2789_v30 = vpop.permute.xlu1 %2788  ;;  %v2655_v54 = vpop.permute.xlu0 %2654 }
 0x63c   : > { %v2793_v14 = vmul.f32 %v5776_v40, %v2789_v30  ;;  %4742 = vmatmul.mubr.msk.bf16.gmra.mxu1 %vm733_vm2, %v4951_v60  ;;  %4750 = vmatmul.mubr.msk.bf16.vlgmr.msra.gmra.mxu0 %vm733_vm2, %v4952_v22  ;;  %v2662_v28 = vmul.f32 %v5786_v59, %v2655_v54 }
 0x63d   : > { %4769 = vmatprep.subr.bf16.mxu0 %v2667_v34  ;;  %4753 = vmatprep.mubr.msk.bf16.mxu0 %vm733_vm2, %v4953_v27 }
 0x63e   : > { %v2795_v18 = vpack.c.bf16 %v2793_v14, %v2792_v62  ;;  %4770 = vmatpush3.bf16.msra.mxu0 %v2667_v34  ;;  %4761 = vmatprep.mubr.msk.bf16.mxu1 %vm733_vm2, %v4954_v21 }
 0x63f   : > { %v2657_v51 = vpop.permute.xlu1 %2656  ;;  %v2783_v11 = vpop.permute.xlu0 %2782 }
 0x640   : > { %v2663_v19 = vmul.f32 %v5792_v42, %v2657_v51  ;;  %4781 = vmatprep.subr.bf16.mxu1 %v2795_v18  ;;  %v2790_v1 = vmul.f32 %v5802_v63, %v2783_v11  ;;  %v4216_v63 = vld [vmem:[%s6096_s28 + $0x98] sm:$0xff] }
 0x642   : > { %v2666_v23 = vpack.c.bf16 %v2663_v19, %v2662_v28 }
 0x643   : > { %v2785_v55 = vpop.permute.xlu1 %2784 }
 0x644   : > { %v2791_v2 = vmul.f32 %v5808_v38, %v2785_v55  ;;  %4754 = vmatmul.mubr.msk.bf16.gmra.mxu0 %vm733_vm2, %v4955_v35  ;;  %4762 = vmatmul.mubr.msk.bf16.vlgmr.msra.gmra.mxu1 %vm733_vm2, %v4956_v16  ;;  %v4215_v38 = vld [vmem:[%s6096_s28 + $0x90] sm:$0xff] }
 0x645   : > { %4771 = vmatprep.subr.bf16.mxu0 %v2666_v23  ;;  %4782 = vmatpush3.bf16.msra.mxu1 %v2795_v18 }
 0x646   : > { %v2794_v6 = vpack.c.bf16 %v2791_v2, %v2790_v1  ;;  %4772 = vmatpush3.bf16.msra.mxu0 %v2666_v23  ;;  %4765 = vmatprep.mubr.msk.bf16.mxu1 %vm733_vm2, %v4957_v32 }
 0x647   : > { %4773 = vmatprep.mubr.msk.bf16.mxu0 %vm733_vm2, %v4958_v9  ;;  %v4219_v9 = vld [vmem:[%s6096_s28 + $0xb0] sm:$0xff] }
 0x648   : > { %4783 = vmatprep.subr.bf16.mxu1 %v2794_v6 }
 0x649   : > { %4784 = vmatpush3.bf16.msra.mxu1 %v2794_v6  ;;  %v4217_v6 = vld [vmem:[%s6096_s28 + $0xa0] sm:$0xff] }
 0x64c   : > { %4766 = vmatmul.mubr.msk.bf16.gmra.mxu1 %vm733_vm2, %v4959_v36  ;;  %4774 = vmatmul.mubr.msk.bf16.vlgmr.msra.gmra.mxu0 %vm733_vm2, %v4960_v12 }
 0x64d   : > { %4777 = vmatprep.mubr.msk.bf16.mxu0 %vm733_vm2, %v4961_v31  ;;  %4785 = vmatprep.mubr.msk.bf16.mxu1 %vm733_vm2, %v4962_v39  ;;  %v4220_v39 = vld [vmem:[%s6096_s28 + $0xb8] sm:$0xff] }
 0x654   : > { %4778 = vmatmul.mubr.msk.bf16.gmra.mxu0 %vm733_vm2, %v4963_v48  ;;  %4786 = vmatmul.mubr.msk.bf16.vlgmr.msra.gmra.mxu1 %vm733_vm2, %v4964_v29 }
 0x655   : > { %4789 = vmatprep.mubr.msk.bf16.mxu1 %vm733_vm2, %v4965_v13  ;;  %4797 = vmatprep.mubr.msk.bf16.mxu0 %vm733_vm2, %v4967_v41  ;;  %v4218_v41 = vld [vmem:[%s6096_s28 + $0xa8] sm:$0xff] }
 0x65c   : > { %4790 = vmatmul.mubr.msk.bf16.gmra.mxu1 %vm733_vm2, %v4966_v37 }
 0x6f4   : > { %v4739_v7 = vpop.f32.mrf.mxu1 }
 0x6f5   : > { %v2406_v8 = vadd.f32 %v4739_v7, %v4215_v38 }
 0x6f6   : > { %v2373_v47 = vpop.f32.mrf.mxu1 }
 0x6f7   : > { %v2404_v49 = vadd.f32 %v4213_v3, %v2373_v47 }
 0x6f8   : > { %v4740_v24 = vpop.f32.mrf.mxu1 }
 0x6f9   : > { %v2407_v45 = vadd.f32 %v4740_v24, %v4216_v63 }
 0x6fa   : > { %v2376_v58 = vpop.f32.mrf.mxu1 }
 0x6fb   : > { %v2405_v61 = vadd.f32 %v4214_v4, %v2376_v58 }
 0x6fc   : > { %v4743_v25 = vpop.f32.mrf.mxu1  ;;  %v4751_v5 = vpop.f32.mrf.mxu0 }
 0x6fd   : > { %v2410_v31 = vadd.f32 %v4743_v25, %v4219_v9 }
 0x6fe   : > { %v2389_v10 = vpop.f32.mrf.mxu1  ;;  %v5835_v60 = vpop.f32.mrf.mxu0 }
 0x6ff   : > { %v2408_v13 = vadd.f32 %v4217_v6, %v2389_v10 }
 0x700   : > { %v4744_v22 = vpop.f32.mrf.mxu1  ;;  %v4752_v27 = vpop.f32.mrf.mxu0 }
 0x701   : > { %v2411_v42 = vadd.f32 %v4744_v22, %v4220_v39  ;;  %v2534_v22 = vadd.f32 %v4751_v5, %v2406_v8 }
 0x702   : > { %v2392_v34 = vpop.f32.mrf.mxu1  ;;  %v2504_v21 = vpop.f32.mrf.mxu0 }
 0x703   : > { %v2409_v53 = vadd.f32 %v4218_v41, %v2392_v34 }
 0x704   : > { %v4755_v30 = vpop.f32.mrf.mxu0  ;;  %v4763_v54 = vpop.f32.mrf.mxu1 }
 0x705   : > { %v2538_v37 = vadd.f32 %v4755_v30, %v2410_v31 }
 0x706   : > { %v2517_v62 = vpop.f32.mrf.mxu0  ;;  %v5837_v14 = vpop.f32.mrf.mxu1 }
 0x707   : > { %v2536_v59 = vadd.f32 %v2517_v62, %v2408_v13  ;;  %v2535_v62 = vadd.f32 %v4752_v27, %v2407_v45 }
 0x708   : > { %v4756_v18 = vpop.f32.mrf.mxu0  ;;  %v4764_v51 = vpop.f32.mrf.mxu1 }
 0x709   : > { %v2539_v17 = vadd.f32 %v4756_v18, %v2411_v42  ;;  %v2648_v42 = vadd.f32 %v4763_v54, %v2534_v22  ;;  %v2649_v63 = vadd.f32 %v4764_v51, %v2535_v62 }
 0x70a   : > { %v2520_v28 = vpop.f32.mrf.mxu0  ;;  %v2618_v19 = vpop.f32.mrf.mxu1 }
 0x70b   : > { %v2537_v10 = vadd.f32 %v2520_v28, %v2409_v53 }
 0x70c   : > { %v4767_v35 = vpop.f32.mrf.mxu1  ;;  %v4775_v16 = vpop.f32.mrf.mxu0 }
 0x70d   : > { %v2652_v40 = vadd.f32 %v4767_v35, %v2538_v37  ;;  %v2776_v45 = vadd.f32 %v4775_v16, %v2648_v42 }
 0x70e   : > { %v2631_v11 = vpop.f32.mrf.mxu1  ;;  %v5839_v23 = vpop.f32.mrf.mxu0 }
 0x70f   : > { %v2650_v25 = vadd.f32 %v2631_v11, %v2536_v59  ;;  %v2532_v59 = vadd.f32 %v5835_v60, %v2404_v49 }
 0x710   : > { %v4768_v32 = vpop.f32.mrf.mxu1  ;;  %v4776_v55 = vpop.f32.mrf.mxu0 }
 0x711   : > { %v2653_v30 = vadd.f32 %v4768_v32, %v2539_v17  ;;  %v2646_v4 = vadd.f32 %v5837_v14, %v2532_v59  ;;  %v2777_v7 = vadd.f32 %v4776_v55, %v2649_v63 }
 0x712   : > { %v2634_v1 = vpop.f32.mrf.mxu1  ;;  %v2746_v2 = vpop.f32.mrf.mxu0 }
 0x713   : > { %v2651_v13 = vadd.f32 %v2634_v1, %v2537_v10  ;;  %v2774_v24 = vadd.f32 %v5839_v23, %v2646_v4  ;;  %v4970_v10 = vld [vmem:[%s5201_s14 + $0x58] sm:$0xff]   ;;  %v4313_v4 = vld [vmem:[%s5206_s17 + $0xa0] sm:$0xff] }
 0x714   : > { %v4779_v36 = vpop.f32.mrf.mxu0  ;;  %v4787_v12 = vpop.f32.mrf.mxu1 }
 0x715   : > { %v2780_v9 = vadd.f32 %v4779_v36, %v2652_v40  ;;  %v2533_v40 = vadd.f32 %v2504_v21, %v2405_v61  ;;  %v2904_v49 = vadd.f32 %v4787_v12, %v2776_v45 }
 0x716   : > { %v2759_v48 = vpop.f32.mrf.mxu0  ;;  %v2871_v29 = vpop.f32.mrf.mxu1 }
 0x717   : > { %v2778_v6 = vadd.f32 %v2759_v48, %v2650_v25  ;;  %v2647_v8 = vadd.f32 %v2618_v19, %v2533_v40  ;;  %v2902_v60 = vadd.f32 %v2871_v29, %v2774_v24  ;;  %v4968_v25 = vld [vmem:[%s5201_s14 + $0x48] sm:$0xff]  }
 0x718   : > { %v4788_v43 = vpop.f32.mrf.mxu1  ;;  %v4780_v52 = vpop.f32.mrf.mxu0 }
 0x719   : > { %v2781_v37 = vadd.f32 %v4780_v52, %v2653_v30  ;;  %v2775_v61 = vadd.f32 %v2746_v2, %v2647_v8  ;;  %v2905_v58 = vadd.f32 %v4788_v43, %v2777_v7  ;;  %v4311_v30 = vld [vmem:[%s5206_s17 + $0x90] sm:$0xff]  ;;  %v4971_v8 = vld [vmem:[%s5196_s2 + $0x1e0] sm:$0xff]  }
 0x71a   : > { %v2874_v56 = vpop.f32.mrf.mxu1  ;;  %v2762_v35 = vpop.f32.mrf.mxu0  ;;  %4809 = vmatprep.mubr.msk.bf16.mxu1 %vm733_vm2, %v4971_v8  ;;  %v6142_v8 = vld [vmem:[#allocation20_spill] sm:$0xff] }
 0x71b   : > { %v2779_v53 = vadd.f32 %v2762_v35, %v2651_v13  ;;  %v4312_v35 = vld [vmem:[%s5206_s17 + $0x98] sm:$0xff] }
 0x71c   : > { %v4791_v20 = vpop.f32.mrf.mxu1 }
 0x71d   : > { %v2908_v31 = vadd.f32 %v4791_v20, %v2780_v9  ;;  %v4969_v9 = vld [vmem:[%s5201_s14 + $0x50] sm:$0xff]  }
 0x71e   : > { %v2887_v39 = vpop.f32.mrf.mxu1 }
 0x71f   : > { %v2916_v15 = vmul.f32 0.5, %v2908_v31  ;;  %v2906_v34 = vadd.f32 %v2887_v39, %v2778_v6  ;;  %v4309_v31 = vld [vmem:[%s5206_s17 + $0x80] sm:$0xff] }
 0x720   : > { %v4792_v38 = vpop.f32.mrf.mxu1 }
 0x721   : > { %5025 = vtanh.f32 %v2916_v15  ;;  %v2914_v17 = vmul.f32 0.5, %v2906_v34  ;;  %v2909_v20 = vadd.f32 %v4792_v38, %v2781_v37  ;;  %v2903_v15 = vadd.f32 %v2874_v56, %v2775_v61  ;;  %v4310_v34 = vld [vmem:[%s5206_s17 + $0x88] sm:$0xff]  ;;  %v4315_v38 = vld [vmem:[%s5206_s17 + $0xb0] sm:$0xff] }
 0x722   : > { %v2890_v3 = vpop.f32.mrf.mxu1 }
 0x723   : > { %5027 = vtanh.f32 %v2914_v17  ;;  %v2917_v52 = vmul.f32 0.5, %v2909_v20  ;;  %v2907_v47 = vadd.f32 %v2890_v3, %v2779_v53 }
 0x725   : > { %5029 = vtanh.f32 %v2917_v52  ;;  %v2915_v5 = vmul.f32 0.5, %v2907_v47 }
 0x727   : > { %5031 = vtanh.f32 %v2915_v5 }
 0x728   : > { %5033 = vtanh.f32 %v2904_v49 }
 0x729   : > { %5035 = vtanh.f32 %v2905_v58 }
 0x72a   : > { %5037 = vtanh.f32 %v2902_v60  ;;  %v6130_v60 = vld [vmem:[#allocation8_spill] sm:$0xff] }
 0x72b   : > { %5039 = vtanh.f32 %v2903_v15 }
 0x72e   : > { %v5026_v27 = vpop.eup %5025 }
 0x72f   : > { %v2924_v21 = vadd.f32 1.0, %v5026_v27 }
 0x730   : > { %v5028_v54 = vpop.eup %5027 }
 0x731   : > { %v2922_v14 = vadd.f32 1.0, %v5028_v54  ;;  %v2928_v51 = vmul.f32 0.5, %v2924_v21  ;;  %v6131_v21 = vld [vmem:[#allocation9_spill] sm:$0xff] }
 0x732   : > { %v5030_v18 = vpop.eup %5029 }
 0x733   : > { %v2925_v28 = vadd.f32 1.0, %v5030_v18  ;;  %v2926_v11 = vmul.f32 0.5, %v2922_v14  ;;  %v6132_v14 = vld [vmem:[#allocation10_spill] sm:$0xff] }
 0x734   : > { %v5032_v19 = vpop.eup %5031 }
 0x735   : > { %v5034_v16 = vpop.eup %5033  ;;  %v2929_v43 = vmul.f32 0.5, %v2925_v28  ;;  %v2923_v23 = vadd.f32 1.0, %v5032_v19 }
 0x736   : > { %v5036_v56 = vpop.eup %5035  ;;  %v2932_v1 = vmul.f32 %v5034_v16, %v2928_v51  ;;  %v6133_v16 = vld [vmem:[#allocation11_spill] sm:$0xff] }
 0x737   : > { %v5038_v32 = vpop.eup %5037  ;;  %v2927_v55 = vmul.f32 0.5, %v2923_v23  ;;  %v2933_v2 = vmul.f32 %v5036_v56, %v2929_v43  ;;  %v6134_v43 = vld [vmem:[#allocation12_spill] sm:$0xff] }
 0x738   : > { %v5040_v36 = vpop.eup %5039  ;;  %v2930_v48 = vmul.f32 %v5038_v32, %v2926_v11 }
 0x739   : > { %v2935_v12 = vpack.c.bf16 %v2933_v2, %v2932_v1  ;;  %v2931_v29 = vmul.f32 %v5040_v36, %v2927_v55  ;;  %v6135_v1 = vld [vmem:[#allocation13_spill] sm:$0xff]  ;;  %v6136_v36 = vld [vmem:[#allocation14_spill] sm:$0xff] }
 0x73b   : > { %4793 = vmatprep.subr.bf16.mxu0 %v2935_v12  ;;  %v2934_v41 = vpack.c.bf16 %v2931_v29, %v2930_v48  ;;  %v4972_v48 = vld [vmem:[%s5196_s2 + $0x1e8] sm:$0xff]  }
 0x73c   : > { %4794 = vmatpush3.bf16.msra.mxu0 %v2935_v12 }
 0x73d   : > { %4795 = vmatprep.subr.bf16.mxu0 %v2934_v41 }
 0x740   : > { %4796 = vmatpush3.bf16.msra.mxu0 %v2934_v41  ;;  %v4974_v41 = vld [vmem:[%s5196_s2 + $0x1f0] sm:$0xff]  }
 0x743   : > { %4798 = vmatmul.mubr.msk.bf16.vlgmr.msra.gmra.mxu0 %vm733_vm2, %v4968_v25 }
 0x744   : > { %4801 = vmatprep.mubr.msk.bf16.mxu0 %vm733_vm2, %v4969_v9 }
 0x74b   : > { %4802 = vmatmul.mubr.msk.bf16.gmra.mxu0 %vm733_vm2, %v4970_v10  ;;  %v6137_v10 = vld [vmem:[#allocation15_spill] sm:$0xff] }
 0x803   : > { %v4799_v6 = vpop.f32.mrf.mxu0 }
 0x804   : > { %v3029_v22 = vadd.f32 %v4799_v6, %v4311_v30  ;;  %v6138_v6 = vld [vmem:[#allocation16_spill] sm:$0xff] }
 0x805   : > { %v3020_v62 = vpop.f32.mrf.mxu0 }
 0x806   : > { %v3053_v39 = vadd.f32 %v3029_v22, %v5631_v33  ;;  %v3021_v13 = vadd.f32 %v4309_v31, %v3020_v62 }
 0x807   : > { %v4800_v37 = vpop.f32.mrf.mxu0 }
 0x808   : > { %v3057_v59 = vmul.f32 %v5628_v46, %v3053_v39  ;;  %v3051_v40 = vadd.f32 %v3021_v13, %v5643_v50  ;;  %v3032_v42 = vadd.f32 %v4800_v37, %v4312_v35  ;;  %v4316_v50 = vld [vmem:[%s5206_s17 + $0xb8] sm:$0xff]  ;;  %v6139_v39 = vld [vmem:[#allocation17_spill] sm:$0xff]  ;;  %v6140_v37 = vld [vmem:[#allocation18_spill] sm:$0xff] }
 0x809   : > { %v3023_v63 = vpop.f32.mrf.mxu0 }
 0x80a   : > { %v3054_v53 = vadd.f32 %v3032_v42, %v5646_v0  ;;  %v3024_v17 = vadd.f32 %v4310_v34, %v3023_v63  ;;  %3078 = vrot.lane.b32.xlu0 %v3057_v59, %s5083_s15  ;;  %v3055_v33 = vmul.f32 %v5628_v46, %v3051_v40  ;;  %v4976_v40 = vld [vmem:[%s5196_s2 + $0x208] sm:$0xff]   ;;  %v4977_v42 = vld [vmem:[%s5196_s2 + $0x210] sm:$0xff]  }
 0x80b   : > { %v4803_v20 = vpop.f32.mrf.mxu0 }
 0x80c   : > { %v3058_v45 = vmul.f32 %v5628_v46, %v3054_v53  ;;  %v3052_v3 = vadd.f32 %v3024_v17, %v5661_v26  ;;  %v3045_v7 = vadd.f32 %v4803_v20, %v4315_v38  ;;  %v4978_v38 = vld [vmem:[%s5196_s2 + $0x220] sm:$0xff]   ;;  %v6141_v20 = vld [vmem:[#allocation19_spill] sm:$0xff] }
 0x80d   : > { %v3036_v52 = vpop.f32.mrf.mxu0 }
 0x80e   : > { %v3056_v0 = vmul.f32 %v5628_v46, %v3052_v3  ;;  %v5877_v47 = vadd.f32 %v3045_v7, %v5653_v44  ;;  %v3037_v24 = vadd.f32 %v4313_v4, %v3036_v52  ;;  %3080 = vrot.lane.b32.xlu1 %v3058_v45, %s5083_s15  ;;  %3074 = vrot.lane.b32.xlu0 %v3055_v33, %s5083_s15  ;;  %v4973_v46 = vld [vmem:[%s5196_s2 + $0x200] sm:$0xff]   ;;  %v6143_v7 = vld [vmem:[#allocation21_spill] sm:$0xff] }
 0x80f   : > { %v4804_v49 = vpop.f32.mrf.mxu0  ;;  %v3064_v61 = vpack.c.bf16 %v3058_v45, %v3057_v59  ;;  %4821 = vmatprep.mubr.msk.bf16.mxu0 %vm733_vm2, %v4973_v46  ;;  %v4982_v46 = vld [vmem:[%s5196_s2 + $0x240] sm:$0xff]  }
 0x810   : > { %v5882_v26 = vadd.f32 %v3037_v24, %v5663_v57  ;;  %v3048_v58 = vadd.f32 %v4804_v49, %v4316_v50  ;;  %v3063_v5 = vpack.c.bf16 %v3056_v0, %v3055_v33  ;;  %v6144_v50 = vld [vmem:[#allocation22_spill] sm:$0xff]  ;;  %v4979_v24 = vld [vmem:[%s5196_s2 + $0x218] sm:$0xff]   ;;  %v4980_v49 = vld [vmem:[%s5196_s2 + $0x228] sm:$0xff]  }
 0x812   : > { %v5885_v15 = vadd.f32 %v3048_v58, %v6130_v60  ;;  %3076 = vrot.lane.b32.xlu1 %v3056_v0, %s5083_s15  ;;  %3206 = vrot.lane.b32.xlu0 %v3057_v59, %s5084_s18 }
 0x816   : > { %3208 = vrot.lane.b32.xlu1 %v3058_v45, %s5084_s18  ;;  %3202 = vrot.lane.b32.xlu0 %v3055_v33, %s5084_s18 }
 0x81a   : > { %3204 = vrot.lane.b32.xlu1 %v3056_v0, %s5084_s18  ;;  %3448 = vrot.lane.b32.xlu0 %v3057_v59, %s5085_s5 }
 0x81e   : > { %3450 = vrot.lane.b32.xlu1 %v3058_v45, %s5085_s5  ;;  %3576 = vrot.lane.b32.xlu0 %v3057_v59, %s5086_s7  ;;  %v4975_v59 = vld [vmem:[%s5196_s2 + $0x1f8] sm:$0xff]  }
 0x822   : > { %3578 = vrot.lane.b32.xlu1 %v3058_v45, %s5086_s7  ;;  %3444 = vrot.lane.b32.xlu0 %v3055_v33, %s5085_s5 }
 0x826   : > { %3446 = vrot.lane.b32.xlu1 %v3056_v0, %s5085_s5  ;;  %3572 = vrot.lane.b32.xlu0 %v3055_v33, %s5086_s7 }
 0x82a   : > { %3574 = vrot.lane.b32.xlu1 %v3056_v0, %s5086_s7 }
 0x87c   : > { %v3079_v44 = vpop.permute.xlu0 %3078 }
 0x87d   : > { %v3084_v54 = vmul.f32 %v6131_v21, %v3079_v44  ;;  %v6145_v44 = vld [vmem:[#allocation23_spill] sm:$0xff] }
 0x880   : > { %v3081_v57 = vpop.permute.xlu1 %3080  ;;  %v3075_v27 = vpop.permute.xlu0 %3074 }
 0x881   : > { %v3085_v18 = vmul.f32 %v6132_v14, %v3081_v57  ;;  %v3082_v11 = vmul.f32 %v6133_v16, %v3075_v27  ;;  %v6146_v27 = vld [vmem:[#allocation24_spill] sm:$0xff]  ;;  %v4983_v14 = vld [vmem:[%s5196_s2 + $0x238] sm:$0xff]   ;;  %v4988_v16 = vld [vmem:[%s5196_s2 + $0x268] sm:$0xff]  }
 0x883   : > { %v3087_v51 = vpack.c.bf16 %v3085_v18, %v3084_v54  ;;  %v4984_v18 = vld [vmem:[%s5196_s2 + $0x248] sm:$0xff]  }
 0x884   : > { %v3077_v28 = vpop.permute.xlu1 %3076  ;;  %v3207_v19 = vpop.permute.xlu0 %3206 }
 0x885   : > { %v3083_v23 = vmul.f32 %v6134_v43, %v3077_v28  ;;  %4805 = vmatprep.subr.bf16.mxu1 %v3087_v51  ;;  %v3212_v2 = vmul.f32 %v6135_v1, %v3207_v19  ;;  %v4986_v28 = vld [vmem:[%s5196_s2 + $0x260] sm:$0xff]   ;;  %v4987_v19 = vld [vmem:[%s5196_s2 + $0x258] sm:$0xff]   ;;  %v5956_v1 = vpop.f32.mrf.mxu0 }
 0x886   : > { %4806 = vmatpush3.bf16.msra.mxu1 %v3087_v51  ;;  %v4985_v51 = vld [vmem:[%s5196_s2 + $0x250] sm:$0xff]   ;;  %v4990_v43 = vld [vmem:[%s5196_s2 + $0x278] sm:$0xff]  }
 0x887   : > { %v3086_v56 = vpack.c.bf16 %v3083_v23, %v3082_v11  ;;  %v4989_v11 = vld [vmem:[%s5196_s2 + $0x270] sm:$0xff]   ;;  %v4991_v23 = vld [vmem:[%s5201_s14 + $0x60] sm:$0xff]  }
 0x888   : > { %v3209_v32 = vpop.permute.xlu1 %3208  ;;  %v3203_v55 = vpop.permute.xlu0 %3202 }
 0x889   : > { %v3213_v12 = vmul.f32 %v6136_v36, %v3209_v32  ;;  %4807 = vmatprep.subr.bf16.mxu1 %v3086_v56  ;;  %v3210_v30 = vmul.f32 %v6137_v10, %v3203_v55 }
 0x88a   : > { %4808 = vmatpush3.bf16.msra.mxu1 %v3086_v56 }
 0x88b   : > { %v3215_v29 = vpack.c.bf16 %v3213_v12, %v3212_v2  ;;  %4829 = vmatprep.subr.bf16.mxu1 %v3064_v61 }
 0x88c   : > { %v3205_v25 = vpop.permute.xlu1 %3204  ;;  %v3449_v9 = vpop.permute.xlu0 %3448 }
 0x88d   : > { %v3211_v31 = vmul.f32 %v6138_v6, %v3205_v25  ;;  %4810 = vmatmul.mubr.msk.bf16.vlgmr.msra.gmra.mxu1 %vm733_vm2, %v4972_v48  ;;  %4817 = vmatprep.subr.bf16.mxu0 %v3215_v29  ;;  %v3454_v13 = vmul.f32 %v6139_v39, %v3449_v9 }
 0x88e   : > { %4818 = vmatpush3.bf16.msra.mxu0 %v3215_v29  ;;  %4830 = vmatpush3.bf16.msra.mxu1 %v3064_v61 }
 0x88f   : > { %v3214_v22 = vpack.c.bf16 %v3211_v31, %v3210_v30  ;;  %4831 = vmatprep.subr.bf16.mxu1 %v3063_v5  ;;  %4813 = vmatprep.mubr.msk.bf16.mxu1 %vm733_vm2, %v4974_v41 }
 0x890   : > { %v3451_v62 = vpop.permute.xlu1 %3450  ;;  %v3577_v35 = vpop.permute.xlu0 %3576 }
 0x891   : > { %v3455_v34 = vmul.f32 %v6140_v37, %v3451_v62  ;;  %4819 = vmatprep.subr.bf16.mxu0 %v3214_v22  ;;  %v3582_v4 = vmul.f32 %v6141_v20, %v3577_v35  ;;  %v4329_v20 = vld [vmem:[%s6096_s28 + $0xe0] sm:$0xff] }
 0x892   : > { %4820 = vmatpush3.bf16.msra.mxu0 %v3214_v22  ;;  %4832 = vmatpush3.bf16.msra.mxu1 %v3063_v5  ;;  %v4981_v5 = vld [vmem:[%s5196_s2 + $0x230] sm:$0xff]  }
 0x893   : > { %v3457_v63 = vpack.c.bf16 %v3455_v34, %v3454_v13 }
 0x894   : > { %v3579_v53 = vpop.permute.xlu1 %3578  ;;  %v3445_v17 = vpop.permute.xlu0 %3444 }
 0x895   : > { %v3583_v33 = vmul.f32 %v6142_v8, %v3579_v53  ;;  %4814 = vmatmul.mubr.msk.bf16.gmra.mxu1 %vm733_vm2, %v4975_v59  ;;  %4822 = vmatmul.mubr.msk.bf16.vlgmr.msra.gmra.mxu0 %vm733_vm2, %v4976_v40  ;;  %v3452_v52 = vmul.f32 %v6143_v7, %v3445_v17 }
 0x896   : > { %4841 = vmatprep.subr.bf16.mxu0 %v3457_v63  ;;  %4825 = vmatprep.mubr.msk.bf16.mxu0 %vm733_vm2, %v4977_v42 }
 0x897   : > { %v3585_v45 = vpack.c.bf16 %v3583_v33, %v3582_v4  ;;  %4842 = vmatpush3.bf16.msra.mxu0 %v3457_v63  ;;  %4833 = vmatprep.mubr.msk.bf16.mxu1 %vm733_vm2, %v4978_v38  ;;  %v4331_v38 = vld [vmem:[%s6096_s28 + $0xf0] sm:$0xff] }
 0x898   : > { %v3447_v3 = vpop.permute.xlu1 %3446  ;;  %v3573_v61 = vpop.permute.xlu0 %3572 }
 0x899   : > { %v3453_v0 = vmul.f32 %v6144_v50, %v3447_v3  ;;  %4853 = vmatprep.subr.bf16.mxu1 %v3585_v45  ;;  %v3580_v57 = vmul.f32 %v6145_v44, %v3573_v61  ;;  %v4328_v61 = vld [vmem:[%s6096_s28 + $0xd8] sm:$0xff] }
 0x89b   : > { %v3456_v58 = vpack.c.bf16 %v3453_v0, %v3452_v52  ;;  %v4330_v0 = vld [vmem:[%s6096_s28 + $0xe8] sm:$0xff] }
 0x89c   : > { %v3575_v60 = vpop.permute.xlu1 %3574 }
 0x89d   : > { %v3581_v21 = vmul.f32 %v6146_v27, %v3575_v60  ;;  %4826 = vmatmul.mubr.msk.bf16.gmra.mxu0 %vm733_vm2, %v4979_v24  ;;  %4834 = vmatmul.mubr.msk.bf16.vlgmr.msra.gmra.mxu1 %vm733_vm2, %v4980_v49  ;;  %v4327_v49 = vld [vmem:[%s6096_s28 + $0xd0] sm:$0xff]  ;;  %v4326_v27 = vld [vmem:[%s6096_s28 + $0xc8] sm:$0xff] }
 0x89e   : > { %4843 = vmatprep.subr.bf16.mxu0 %v3456_v58  ;;  %4854 = vmatpush3.bf16.msra.mxu1 %v3585_v45  ;;  %v4332_v45 = vld [vmem:[%s6096_s28 + $0xf8] sm:$0xff] }
 0x89f   : > { %v3584_v54 = vpack.c.bf16 %v3581_v21, %v3580_v57  ;;  %4844 = vmatpush3.bf16.msra.mxu0 %v3456_v58  ;;  %4837 = vmatprep.mubr.msk.bf16.mxu1 %vm733_vm2, %v4981_v5  ;;  %v4325_v57 = vld [vmem:[%s6096_s28 + $0xc0] sm:$0xff] }
 0x8a0   : > { %4845 = vmatprep.mubr.msk.bf16.mxu0 %vm733_vm2, %v4982_v46 }
 0x8a1   : > { %4855 = vmatprep.subr.bf16.mxu1 %v3584_v54 }
 0x8a2   : > { %4856 = vmatpush3.bf16.msra.mxu1 %v3584_v54 }
 0x8a5   : > { %4838 = vmatmul.mubr.msk.bf16.gmra.mxu1 %vm733_vm2, %v4983_v14  ;;  %4846 = vmatmul.mubr.msk.bf16.vlgmr.msra.gmra.mxu0 %vm733_vm2, %v4984_v18 }
 0x8a6   : > { %4849 = vmatprep.mubr.msk.bf16.mxu0 %vm733_vm2, %v4985_v51  ;;  %4857 = vmatprep.mubr.msk.bf16.mxu1 %vm733_vm2, %v4986_v28 }
 0x8ad   : > { %4850 = vmatmul.mubr.msk.bf16.gmra.mxu0 %vm733_vm2, %v4987_v19  ;;  %4858 = vmatmul.mubr.msk.bf16.vlgmr.msra.gmra.mxu1 %vm733_vm2, %v4988_v16 }
 0x8ae   : > { %4861 = vmatprep.mubr.msk.bf16.mxu1 %vm733_vm2, %v4989_v11  ;;  %4869 = vmatprep.mubr.msk.bf16.mxu0 %vm733_vm2, %v4991_v23 }
 0x8b5   : > { %4862 = vmatmul.mubr.msk.bf16.gmra.mxu1 %vm733_vm2, %v4990_v43 }
 0x94d   : > { %v4811_v56 = vpop.f32.mrf.mxu1 }
 0x94e   : > { %v3196_v51 = vadd.f32 %v4811_v56, %v4327_v49 }
 0x94f   : > { %v3163_v32 = vpop.f32.mrf.mxu1 }
 0x951   : > { %v4812_v55 = vpop.f32.mrf.mxu1 }
 0x952   : > { %v3197_v28 = vadd.f32 %v4812_v55, %v4328_v61 }
 0x953   : > { %v3166_v2 = vpop.f32.mrf.mxu1 }
 0x955   : > { %v4815_v36 = vpop.f32.mrf.mxu1  ;;  %v4823_v12 = vpop.f32.mrf.mxu0 }
 0x956   : > { %v3200_v33 = vadd.f32 %v4815_v36, %v4331_v38  ;;  %v3194_v36 = vadd.f32 %v4325_v57, %v3163_v32 }
 0x957   : > { %v3179_v48 = vpop.f32.mrf.mxu1  ;;  %v5958_v29 = vpop.f32.mrf.mxu0 }
 0x958   : > { %v3198_v52 = vadd.f32 %v4329_v20, %v3179_v48  ;;  %v3195_v48 = vadd.f32 %v4326_v27, %v3166_v2 }
 0x959   : > { %v4816_v41 = vpop.f32.mrf.mxu1  ;;  %v4824_v25 = vpop.f32.mrf.mxu0 }
 0x95a   : > { %v3201_v58 = vadd.f32 %v4816_v41, %v4332_v45  ;;  %v3324_v41 = vadd.f32 %v4823_v12, %v3196_v51 }
 0x95b   : > { %v3182_v9 = vpop.f32.mrf.mxu1  ;;  %v3294_v10 = vpop.f32.mrf.mxu0 }
 0x95c   : > { %v3199_v21 = vadd.f32 %v4330_v0, %v3182_v9 }
 0x95d   : > { %v4827_v30 = vpop.f32.mrf.mxu0  ;;  %v4835_v6 = vpop.f32.mrf.mxu1 }
 0x95e   : > { %v3328_v50 = vadd.f32 %v4827_v30, %v3200_v33  ;;  %v3325_v30 = vadd.f32 %v4824_v25, %v3197_v28  ;;  %v3438_v56 = vadd.f32 %v4835_v6, %v3324_v41  ;;  %v4992_v28 = vld [vmem:[%s5201_s14 + $0x68] sm:$0xff]  }
 0x95f   : > { %v3307_v31 = vpop.f32.mrf.mxu0  ;;  %v5960_v22 = vpop.f32.mrf.mxu1 }
 0x960   : > { %v3326_v5 = vadd.f32 %v3307_v31, %v3198_v52 }
 0x961   : > { %v4828_v62 = vpop.f32.mrf.mxu0  ;;  %v4836_v35 = vpop.f32.mrf.mxu1 }
 0x962   : > { %v3329_v54 = vadd.f32 %v4828_v62, %v3201_v58  ;;  %v3322_v62 = vadd.f32 %v5958_v29, %v3194_v36  ;;  %v3439_v55 = vadd.f32 %v4836_v35, %v3325_v30 }
 0x963   : > { %v3310_v39 = vpop.f32.mrf.mxu0  ;;  %v3408_v13 = vpop.f32.mrf.mxu1 }
 0x964   : > { %v3327_v16 = vadd.f32 %v3310_v39, %v3199_v21  ;;  %v3436_v32 = vadd.f32 %v5960_v22, %v3322_v62 }
 0x965   : > { %v4839_v37 = vpop.f32.mrf.mxu1  ;;  %v4847_v34 = vpop.f32.mrf.mxu0 }
 0x966   : > { %v3442_v60 = vadd.f32 %v4839_v37, %v3328_v50  ;;  %v3566_v12 = vadd.f32 %v4847_v34, %v3438_v56 }
 0x967   : > { %v3421_v59 = vpop.f32.mrf.mxu1  ;;  %v5962_v40 = vpop.f32.mrf.mxu0 }
 0x968   : > { %v3440_v14 = vadd.f32 %v3421_v59, %v3326_v5  ;;  %v3323_v59 = vadd.f32 %v3294_v10, %v3195_v48  ;;  %v3564_v50 = vadd.f32 %v5962_v40, %v3436_v32  ;;  %v6147_v48 = vld [vmem:[#allocation25_spill] sm:$0xff] }
 0x969   : > { %v4840_v42 = vpop.f32.mrf.mxu1  ;;  %v4848_v63 = vpop.f32.mrf.mxu0 }
 0x96a   : > { %v3443_v11 = vadd.f32 %v4840_v42, %v3329_v54  ;;  %v3437_v2 = vadd.f32 %v3408_v13, %v3323_v59  ;;  %v4418_v59 = vld [vmem:[%s5206_s17 + $0xc8] sm:$0xff] }
 0x96b   : > { %v3424_v53 = vpop.f32.mrf.mxu1  ;;  %v3536_v17 = vpop.f32.mrf.mxu0 }
 0x96c   : > { %v3441_v38 = vadd.f32 %v3424_v53, %v3327_v16  ;;  %v3565_v10 = vadd.f32 %v3536_v17, %v3437_v2  ;;  %v4202_v16 = vld [vmem:[%s5206_s17 + $0x68] sm:$0xff] }
 0x96d   : > { %v4851_v4 = vpop.f32.mrf.mxu0  ;;  %v4859_v8 = vpop.f32.mrf.mxu1  ;;  %v2250_v41 = vadd.f32 %v4202_v16, %v6147_v48 }
 0x96e   : > { %v3570_v18 = vadd.f32 %v4851_v4, %v3442_v60  ;;  %v3694_v29 = vadd.f32 %v4859_v8, %v3566_v12  ;;  %v5074_v12 = vld [vmem:[%s6078_s29] ss:$0 sm:$0xff] }
 0x96f   : > { %v3549_v3 = vpop.f32.mrf.mxu0  ;;  %v3661_v7 = vpop.f32.mrf.mxu1 }
 0x970   : > { %v3568_v43 = vadd.f32 %v3549_v3, %v3440_v14  ;;  %v3567_v3 = vadd.f32 %v4848_v63, %v3439_v55  ;;  %v3692_v0 = vadd.f32 %v3661_v7, %v3564_v50 }
 0x971   : > { %v4860_v24 = vpop.f32.mrf.mxu1  ;;  %v4852_v46 = vpop.f32.mrf.mxu0 }
 0x972   : > { %v3571_v20 = vadd.f32 %v4852_v46, %v3443_v11  ;;  %v3695_v6 = vadd.f32 %v4860_v24, %v3567_v3  ;;  %v4419_v11 = vld [vmem:[%s5206_s17 + $0xd0] sm:$0xff] }
 0x973   : > { %v3664_v44 = vpop.f32.mrf.mxu1  ;;  %v3552_v31 = vpop.f32.mrf.mxu0 }
 0x974   : > { %v3569_v39 = vadd.f32 %v3552_v31, %v3441_v38  ;;  %v3693_v49 = vadd.f32 %v3664_v44, %v3565_v10  ;;  %v4420_v38 = vld [vmem:[%s5206_s17 + $0xd8] sm:$0xff]  ;;  %v3812_v10 = vld [vmem:[%s5216_s3] sm:$0x3] }
 0x975   : > { %v4863_v19 = vpop.f32.mrf.mxu1 }
 0x976   : > { %v3698_v23 = vadd.f32 %v4863_v19, %v3570_v18  ;;  %v5087_v19 = vmov 0.0  }
 0x977   : > { %v3677_v37 = vpop.f32.mrf.mxu1 }
 0x978   : > { %v3706_v33 = vmul.f32 0.5, %v3698_v23  ;;  %v3696_v9 = vadd.f32 %v3677_v37, %v3568_v43  ;;  %v1371_v43 = vld [vmem:[%s5206_s17 + $0x28] sm:$0xff]  ;;  %v4417_v37 = vld [vmem:[%s5206_s17 + $0xc0] sm:$0xff] }
 0x979   : > { %v4864_v4 = vpop.f32.mrf.mxu1  ;;  %v4314_v23 = vld [vmem:[%s5206_s17 + $0xa8] sm:$0xff] }
 0x97a   : > { %5041 = vtanh.f32 %v3706_v33  ;;  %v3704_v42 = vmul.f32 0.5, %v3696_v9  ;;  %v3699_v45 = vadd.f32 %v4864_v4, %v3571_v20  ;;  %v6148_v20 = vld [vmem:[#allocation7_spill] sm:$0xff]  ;;  %v3040_v9 = vadd.f32 %v4314_v23, %v5956_v1 }
 0x97b   : > { %v3680_v25 = vpop.f32.mrf.mxu1  ;;  %v1460_v33 = vadd.f32 %v6148_v20, %v1371_v43 }
 0x97c   : > { %5043 = vtanh.f32 %v3704_v42  ;;  %v3707_v53 = vmul.f32 0.5, %v3699_v45  ;;  %v3697_v52 = vadd.f32 %v3680_v25, %v3569_v39 }
 0x97d   : > { %v2270_v56 = vadd.f32 %v2250_v41, %v1460_v33 }
 0x97e   : > { %5045 = vtanh.f32 %v3707_v53  ;;  %v3705_v35 = vmul.f32 0.5, %v3697_v52 }
 0x97f   : > { %v3060_v45 = vadd.f32 %v3040_v9, %v2270_v56 }
 0x980   : > { %5047 = vtanh.f32 %v3705_v35 }
 0x981   : > { %5049 = vtanh.f32 %v3694_v29 }
 0x982   : > { %5051 = vtanh.f32 %v3695_v6 }
 0x983   : > { %5053 = vtanh.f32 %v3692_v0 }
 0x984   : > { %5055 = vtanh.f32 %v3693_v49 }
 0x987   : > { %v5042_v22 = vpop.eup %5041 }
 0x988   : > { %v3714_v13 = vadd.f32 1.0, %v5042_v22 }
 0x989   : > { %v5044_v34 = vpop.eup %5043 }
 0x98a   : > { %v3712_v63 = vadd.f32 1.0, %v5044_v34  ;;  %v3718_v58 = vmul.f32 0.5, %v3714_v13 }
 0x98b   : > { %v5046_v61 = vpop.eup %5045 }
 0x98c   : > { %v3715_v5 = vadd.f32 1.0, %v5046_v61  ;;  %v3716_v17 = vmul.f32 0.5, %v3712_v63 }
 0x98d   : > { %v5048_v40 = vpop.eup %5047 }
 0x98e   : > { %v5050_v8 = vpop.eup %5049  ;;  %v3719_v24 = vmul.f32 0.5, %v3715_v5  ;;  %v3713_v60 = vadd.f32 1.0, %v5048_v40 }
 0x98f   : > { %v5052_v7 = vpop.eup %5051  ;;  %v3722_v57 = vmul.f32 %v5050_v8, %v3718_v58 }
 0x990   : > { %v5054_v46 = vpop.eup %5053  ;;  %v3717_v44 = vmul.f32 0.5, %v3713_v60  ;;  %v3723_v27 = vmul.f32 %v5052_v7, %v3719_v24 }
 0x991   : > { %v5056_v21 = vpop.eup %5055  ;;  %v3720_v14 = vmul.f32 %v5054_v46, %v3716_v17 }
 0x992   : > { %v3725_v54 = vpack.c.bf16 %v3723_v27, %v3722_v57  ;;  %v3721_v18 = vmul.f32 %v5056_v21, %v3717_v44 }
 0x994   : > { %4865 = vmatprep.subr.bf16.mxu0 %v3725_v54  ;;  %v3724_v51 = vpack.c.bf16 %v3721_v18, %v3720_v14 }
 0x995   : > { %4866 = vmatpush3.bf16.msra.mxu0 %v3725_v54 }
 0x996   : > { %4867 = vmatprep.subr.bf16.mxu0 %v3724_v51 }
 0x999   : > { %4868 = vmatpush3.bf16.msra.mxu0 %v3724_v51 }
 0x99a   : > { %4873 = vmatprep.subr.bf16.mxu0 %v5087_v19 }
 0x99c   : > { %4870 = vmatmul.mubr.msk.bf16.vlgmr.msra.gmra.mxu0 %vm733_vm2, %v4992_v28 }
 0x99d   : > { %4877 = vmatprep.mubr.msk.bf16.mxu0 %vm5088_vm3, %v5087_v19 }
 0xa5c   : > { %v4871_v36 = vpop.f32.mrf.mxu0 }
 0xa5d   : > { %v3795_v30 = vadd.f32 %v4871_v36, %v4419_v11 }
 0xa5e   : > { %v3786_v31 = vpop.f32.mrf.mxu0 }
 0xa5f   : > { %v3803_v55 = vadd.f32 %v3795_v30, %v5877_v47  ;;  %v3787_v4 = vadd.f32 %v4417_v37, %v3786_v31 }
 0xa60   : > { %v4872_v62 = vpop.f32.mrf.mxu0 }
 0xa61   : > { %v3798_v39 = vadd.f32 %v4872_v62, %v4420_v38  ;;  %v3807_v25 = vmul.f32 %v5074_v12, %v3803_v55  ;;  %v3801_v1 = vadd.f32 %v3787_v4, %v5882_v26 }
 0xa62   : > { %v3789_v42 = vpop.f32.mrf.mxu0 }
 0xa63   : > { %v3804_v32 = vadd.f32 %v3798_v39, %v5885_v15  ;;  %v3790_v2 = vadd.f32 %v4418_v59, %v3789_v42  ;;  %v3805_v50 = vmul.f32 %v5074_v12, %v3801_v1  ;;  %v3809_v15 = vld [vmem:[%s550_s22] sm:$0x1] }
 0xa65   : > { %v3808_v3 = vmul.f32 %v5074_v12, %v3804_v32  ;;  %v3802_v53 = vadd.f32 %v3790_v2, %v3060_v45 }
 0xa67   : > { %v3811_v52 = vpack.c.bf16 %v3808_v3, %v3807_v25  ;;  %v3806_v47 = vmul.f32 %v5074_v12, %v3802_v53 }
 0xa69   : > { %4874 = vmatpush3.bf16.msra.mxu0 %v3811_v52  ;;  %v3810_v29 = vpack.c.bf16 %v3806_v47, %v3805_v50 }
 0xa6a   : > { %4875 = vmatprep.subr.bf16.mxu0 %v5087_v19 }
 0xa6d   : > { %4876 = vmatpush3.bf16.msra.mxu0 %v3810_v29 }
 0xa70   : > { %4878 = vmatmul.mubr.msk.bf16.vlgmr.msra.gmra.mxu0 %vm733_vm2, %v3809_v15 }
 0xb30   : > { %v3850_v6 = vpop.f32.mrf.mxu0 }
 0xb31   : > { %v3851_v35 = vadd.f32 %v3850_v6, %v3812_v10 }
 0xb32   : > { %v4879_v26 = vpop.f32.mrf.mxu0  ;;  %3859 = sbr.rel (%p4426_p7) target bundleno = 2877 (0xb3d), region = 76 }
 0xb33   : > { %v3856_v0 = vmul.f32 %v5074_v12, %v3851_v35 }
 0xb34   : > { %v3853_v49 = vpop.f32.mrf.mxu0 }
 0xb36   : > { %v4880_v22 = vpop.f32.mrf.mxu0 }
 0xb37   : > { %v6149_v13 = vld [vmem:[#allocation4_spill] sm:$0xff]  ;;  %v6150_v34 = vld [vmem:[#allocation6_spill] sm:$0xff] }
 0xb38   : > { %v3860_v63 = vmul.f32 %v6150_v34, %v6149_v13 }
 0xb3a   : > { %v3861_v61 = vadd.f32 %v3860_v63, %v3856_v0 }
 0xb3c   : > { %3862 = vst [vmem:[%s6028_s13] sm:$0x3] %v3861_v61 }
 0xb3d PF: > { %p4427_p8 = scmp.ne.s32.totalorder %s6157_s21, 1 }
 0xb3f   : > { %3865 = sbr.rel (%p4427_p8) target bundleno = 2890 (0xb4a), region = 80 }
 0xb44   : > { %v6151_v58 = vld [vmem:[#allocation5_spill] sm:$0xff]  ;;  %v6152_v5 = vld [vmem:[#allocation6_spill] sm:$0xff] }
 0xb45   : > { %v3866_v40 = vmul.f32 %v6152_v5, %v6151_v58 }
 0xb47   : > { %v3867_v8 = vadd.f32 %v3866_v40, %v3856_v0 }
 0xb49   : > { %3868 = vst [vmem:[%s6027_s12] sm:$0x3] %v3867_v8 }
 0xb4a PF: > { %s6153_s3 = sld [smem:[#allocation2_spill]] }
 0xb50   : > { %s24_s25 = sadd.s32 1, %s6153_s3  }
 0xb51   : > { %p21_p9 = scmp.ge.s32.totalorder %s24_s25, 6  }
 0xb53   :  { %23 = sbr.rel (!%p21_p9) target bundleno = 6 (0x6), region = 166 }

</bundles_post_ra>
